<compile_context>
chip_gen: v6e
topology: v6e:2x2x1
jax: 0.10.0
libtpu: 0.0.40
codegen_flags: <defaults>
</compile_context>

<pallas_src>
import functools

import jax
import jax.numpy as jnp
from jax.experimental import pallas as pl
from jax.experimental.pallas import tpu as pltpu


def _lstm_kernel(x_ref, wih0_ref, b0_ref, whh0_hbm, w1a_hbm, w1b_hbm,
                 b1_ref, fcw_ref, fcb_ref, out_ref,
                 whh0_buf, w1a_buf, w1b_buf, dma_sem, *, batch, seq_len):
    B, T = batch, seq_len
    HP = whh0_buf.shape[0]            # lane-padded hidden size (multiple of 128)

    # Kick off recurrent-weight DMAs (HBM -> VMEM scratch); they overlap the
    # prologue matmul below and are only needed once the time loop starts.
    cp_whh0 = pltpu.make_async_copy(whh0_hbm, whh0_buf, dma_sem.at[0])
    cp_w1a = pltpu.make_async_copy(w1a_hbm, w1a_buf, dma_sem.at[1])
    cp_w1b = pltpu.make_async_copy(w1b_hbm, w1b_buf, dma_sem.at[2])
    cp_whh0.start()
    cp_w1a.start()
    cp_w1b.start()

    # ---- Prologue (off the recurrence): layer-0 input projection for every
    # timestep at once, bias folded in: (T*B, IN)bf16 @ (IN, 4*HP)bf16 -> f32.
    xg0 = (jnp.dot(x_ref[...], wih0_ref[...],
                   preferred_element_type=jnp.float32) + b0_ref[...])
    # Hoisted bias broadcast (JAX doesn't CSE broadcast_in_dim across the
    # unrolled loop).
    b1b = jnp.broadcast_to(b1_ref[...], (B, 4 * HP))

    cp_whh0.wait()
    cp_w1a.wait()
    cp_w1b.wait()
    whh0 = whh0_buf[...]              # (HP, 4*HP)  bf16, constant across steps
    w1a = w1a_buf[...]                # (HP, 4*HP)  acts on h0
    w1b = w1b_buf[...]                # (HP, 4*HP)  acts on h1

    def act(gates, c_prev):
        # Gate column order is (i, f, o, g): one contiguous sigmoid + one tanh.
        s = jax.nn.sigmoid(gates[:, :3 * HP])
        g_g = jnp.tanh(gates[:, 3 * HP:])
        i_g = s[:, 0 * HP:1 * HP]
        f_g = s[:, 1 * HP:2 * HP]
        o_g = s[:, 2 * HP:3 * HP]
        c_new = f_g * c_prev + i_g * g_g
        h_new = o_g * jnp.tanh(c_new)
        return h_new, c_new

    bf16 = jnp.bfloat16
    h0 = c0 = h1 = c1 = jnp.zeros((B, HP), jnp.float32)
    # T is static and tiny -> fully unrolled recurrence; states live in vregs,
    # slices below are static and sublane-aligned (B is a multiple of 8).
    for t in range(T):
        # Layer 0: only the recurrent matmul sits on the serial chain.
        g0 = xg0[t * B:(t + 1) * B, :] + jnp.dot(
            h0.astype(bf16), whh0, preferred_element_type=jnp.float32)
        h0, c0 = act(g0, c0)
        # Layer 1: two independent matmuls (no per-step concat); the h1 term
        # does not depend on the new h0 and can issue early.
        g1 = (jnp.dot(h0.astype(bf16), w1a, preferred_element_type=jnp.float32)
              + jnp.dot(h1.astype(bf16), w1b, preferred_element_type=jnp.float32)
              + b1b)
        h1, c1 = act(g1, c1)

    # Final head on the last hidden state: out = h_T @ fc_w^T + fc_b
    # (padded lanes of h1 are exactly 0, padded fc rows/cols are 0 -> exact;
    # output is lane-dense (128 cols) so the store is unmasked).
    out_ref[...] = (jnp.dot(h1.astype(bf16), fcw_ref[...],
                            preferred_element_type=jnp.float32) + fcb_ref[...])


@functools.partial(jax.jit, static_argnames=("num_classes",))
def lstm_forward(x, kparams, *, num_classes):
    """x: (B, T, IN) float32, batch_first.  kparams: packed kernel weights."""
    B, T, IN = x.shape
    HP = kparams["whh0"].shape[0]
    CP = kparams["fcw"].shape[1]
    BP = max(8, ((B + 7) // 8) * 8)          # pad batch to a full sublane group

    # batch_first -> time-major, merge (T, B) so the hoisted layer-0 input
    # projection is a single 2-D matmul; zero-pad the extra batch rows.
    x_p = jnp.zeros((BP, T, IN), jnp.float32).at[:B].set(x)
    x2d = x_p.transpose(1, 0, 2).reshape(T * BP, IN).astype(jnp.bfloat16)

    kernel = functools.partial(_lstm_kernel, batch=BP, seq_len=T)
    vmem = pl.BlockSpec(memory_space=pltpu.MemorySpace.VMEM)
    hbm = pl.BlockSpec(memory_space=pl.ANY)
    out = pl.pallas_call(
        kernel,
        out_shape=jax.ShapeDtypeStruct((BP, CP), jnp.float32),
        in_specs=[vmem, vmem, vmem, hbm, hbm, hbm, vmem, vmem, vmem],
        out_specs=vmem,
        scratch_shapes=[
            pltpu.VMEM((HP, 4 * HP), jnp.bfloat16),   # whh0
            pltpu.VMEM((HP, 4 * HP), jnp.bfloat16),   # w1a (h0 weights, layer 1)
            pltpu.VMEM((HP, 4 * HP), jnp.bfloat16),   # w1b (h1 weights, layer 1)
            pltpu.SemaphoreType.DMA((3,)),
        ],
    )(x2d, kparams["wih0"], kparams["b0"],
      kparams["whh0"], kparams["w1a"], kparams["w1b"],
      kparams["b1"], kparams["fcw"], kparams["fcb"])
    return out[:B, :num_classes]


def init_torch_lstm_params(key, input_size, hidden_size, num_classes):
    """Deterministic synthetic parameters, shapes match nn.LSTM / nn.Linear."""
    H = hidden_size
    ks = jax.random.split(key, 10)
    bound = 1.0 / jnp.sqrt(H)
    u = lambda k, shape: jax.random.uniform(k, shape, jnp.float32, -bound, bound)
    return {
        "wih0": u(ks[0], (4 * H, input_size)),  # weight_ih_l0
        "whh0": u(ks[1], (4 * H, H)),           # weight_hh_l0
        "bih0": u(ks[2], (4 * H,)),
        "bhh0": u(ks[3], (4 * H,)),
        "wih1": u(ks[4], (4 * H, H)),           # weight_ih_l1
        "whh1": u(ks[5], (4 * H, H)),           # weight_hh_l1
        "bih1": u(ks[6], (4 * H,)),
        "bhh1": u(ks[7], (4 * H,)),
        "fcw":  u(ks[8], (num_classes, H)),     # fc.weight
        "fcb":  u(ks[9], (num_classes,)),       # fc.bias
    }


def pack_kernel_params(p, hidden_size, lane=128):
    """Transpose / reorder / lane-pad the PyTorch-layout LSTM weights (bf16).

    PyTorch gate order along the 4H axis is (i, f, g, o); each gate is packed
    into its own 128-lane block in order (i, f, o, g) so the kernel applies one
    contiguous sigmoid over the first 3*HP lanes and one tanh over the last HP.
    Padded weight rows/cols and padded bias lanes are zero, which keeps the
    padded state lanes at exactly 0 through the recurrence.
    """
    H = hidden_size
    HP = ((H + lane - 1) // lane) * lane
    dst_to_torch_gate = (0, 1, 3, 2)            # (i, f, o, g) <- torch (i, f, g, o)

    def gate_pad_cols(w_t):                      # (K, 4H) -> (K, 4*HP)
        K = w_t.shape[0]
        out = jnp.zeros((K, 4 * HP), jnp.float32)
        for dst, src in enumerate(dst_to_torch_gate):
            out = out.at[:, dst * HP:dst * HP + H].set(w_t[:, src * H:(src + 1) * H])
        return out

    def row_pad(w, rows):                        # (K, N) -> (rows, N)
        return jnp.zeros((rows, w.shape[1]), w.dtype).at[:w.shape[0]].set(w)

    bf16 = jnp.bfloat16
    wih0 = gate_pad_cols(p["wih0"].T).astype(bf16)               # (IN, 4*HP)
    whh0 = row_pad(gate_pad_cols(p["whh0"].T), HP).astype(bf16)  # (HP, 4*HP)
    b0 = gate_pad_cols((p["bih0"] + p["bhh0"])[None, :])         # (1, 4*HP) f32

    # Layer 1 kept split: w1a multiplies h0, w1b multiplies h1 (no concat).
    w1a = row_pad(gate_pad_cols(p["wih1"].T), HP).astype(bf16)   # (HP, 4*HP)
    w1b = row_pad(gate_pad_cols(p["whh1"].T), HP).astype(bf16)   # (HP, 4*HP)
    b1 = gate_pad_cols((p["bih1"] + p["bhh1"])[None, :])         # (1, 4*HP) f32

    # Lane-dense classifier head.
    C = p["fcw"].shape[0]
    CP = ((C + lane - 1) // lane) * lane
    fcw = jnp.zeros((HP, CP), jnp.float32).at[:H, :C].set(p["fcw"].T).astype(bf16)
    fcb = jnp.zeros((1, CP), jnp.float32).at[0, :C].set(p["fcb"])
    return {"wih0": wih0, "whh0": whh0, "b0": b0,
            "w1a": w1a, "w1b": w1b, "b1": b1, "fcw": fcw, "fcb": fcb}


def reference_forward(x, p):
    """Pure-JAX f32 reference replicating torch.nn.LSTM (gate order i,f,g,o) + Linear."""
    B, T, _ = x.shape
    H = p["whh0"].shape[1]

    def cell(x_t, h, c, wih, whh, b):
        gates = x_t @ wih.T + h @ whh.T + b
        i = jax.nn.sigmoid(gates[:, 0 * H:1 * H])
        f = jax.nn.sigmoid(gates[:, 1 * H:2 * H])
        g = jnp.tanh(gates[:, 2 * H:3 * H])
        o = jax.nn.sigmoid(gates[:, 3 * H:4 * H])
        c = f * c + i * g
        h = o * jnp.tanh(c)
        return h, c

    h0 = c0 = h1 = c1 = jnp.zeros((B, H), jnp.float32)
    b0 = p["bih0"] + p["bhh0"]
    b1 = p["bih1"] + p["bhh1"]
    for t in range(T):
        h0, c0 = cell(x[:, t, :], h0, c0, p["wih0"], p["whh0"], b0)
        h1, c1 = cell(h0, h1, c1, p["wih1"], p["whh1"], b1)
    return h1 @ p["fcw"].T + p["fcb"]


def reference_forward_bf16(x, p):
    """Pure-JAX emulation of the kernel's bf16-operand / f32-accumulate math."""
    B, T, _ = x.shape
    H = p["whh0"].shape[1]
    bf16 = jnp.bfloat16

    def mm(a, w):   # a @ w.T with bf16 operands, f32 accumulation (MXU-style)
        return jnp.dot(a.astype(bf16), w.astype(bf16).T,
                       preferred_element_type=jnp.float32)

    def cell(pre, h, c, whh):
        gates = pre + mm(h, whh)
        i = jax.nn.sigmoid(gates[:, 0 * H:1 * H])
        f = jax.nn.sigmoid(gates[:, 1 * H:2 * H])
        g = jnp.tanh(gates[:, 2 * H:3 * H])
        o = jax.nn.sigmoid(gates[:, 3 * H:4 * H])
        c = f * c + i * g
        h = o * jnp.tanh(c)
        return h, c

    h0 = c0 = h1 = c1 = jnp.zeros((B, H), jnp.float32)
    b0 = p["bih0"] + p["bhh0"]
    b1 = p["bih1"] + p["bhh1"]
    for t in range(T):
        h0, c0 = cell(mm(x[:, t, :], p["wih0"]) + b0, h0, c0, p["whh0"])
        h1, c1 = cell(mm(h0, p["wih1"]) + b1, h1, c1, p["whh1"])
    return mm(h1, p["fcw"]) + p["fcb"]


if __name__ == "__main__":
    B, T, INPUT, HIDDEN, NUM_CLASSES = 2, 8, 16, 32, 10

    key = jax.random.PRNGKey(0)
    kx, kp = jax.random.split(key)
    x = jax.random.normal(kx, (B, T, INPUT), jnp.float32)
    torch_params = init_torch_lstm_params(kp, INPUT, HIDDEN, NUM_CLASSES)
    kparams = pack_kernel_params(torch_params, HIDDEN)

    out = jax.block_until_ready(lstm_forward(x, kparams, num_classes=NUM_CLASSES))
    assert out.shape == (B, NUM_CLASSES)

    # Tight check against a bf16-operand emulation of the kernel math, plus a
    # looser check against the f32 torch-semantics reference (bf16 rounding).
    ref_bf16 = reference_forward_bf16(x, torch_params)
    ref_f32 = reference_forward(x, torch_params)
    assert jnp.allclose(out, ref_bf16, atol=5e-3, rtol=5e-3), (out, ref_bf16)
    assert jnp.allclose(out, ref_f32, atol=6e-2, rtol=6e-2), (out, ref_f32)
    print("KERNEL_OK")
</pallas_src>

<mosaic_0001>
module attributes {stable_mosaic.version = 11 : i64} {
  func.func @_lstm_kernel(%arg0: memref<64x16xbf16, #tpu.memory_space<vmem>>, %arg1: memref<16x512xbf16, #tpu.memory_space<vmem>>, %arg2: memref<1x512xf32, #tpu.memory_space<vmem>>, %arg3: memref<128x512xbf16, #tpu.memory_space<any>>, %arg4: memref<128x512xbf16, #tpu.memory_space<any>>, %arg5: memref<128x512xbf16, #tpu.memory_space<any>>, %arg6: memref<1x512xf32, #tpu.memory_space<vmem>>, %arg7: memref<128x128xbf16, #tpu.memory_space<vmem>>, %arg8: memref<1x128xf32, #tpu.memory_space<vmem>>, %arg9: memref<8x128xf32, #tpu.memory_space<vmem>>, %arg10: memref<128x512xbf16, #tpu.memory_space<vmem>>, %arg11: memref<128x512xbf16, #tpu.memory_space<vmem>>, %arg12: memref<128x512xbf16, #tpu.memory_space<vmem>>, %arg13: memref<3x!tpu.dma_semaphore, #tpu.memory_space<semaphore_mem>>) attributes {dimension_semantics = [], scalar_prefetch = 0 : i64, scratch_operands = 4 : i64, tpu.core_type = #tpu.core_type<tc>} {
    %c0_i32 = arith.constant 0 : i32
    %0 = tpu.memref_slice %arg13[%c0_i32] : memref<3x!tpu.dma_semaphore, #tpu.memory_space<semaphore_mem>> -> memref<1x!tpu.dma_semaphore, #tpu.memory_space<semaphore_mem>>
    %1 = tpu.memref_squeeze %0 : memref<1x!tpu.dma_semaphore, #tpu.memory_space<semaphore_mem>> -> memref<!tpu.dma_semaphore, #tpu.memory_space<semaphore_mem>>
    tpu.enqueue_dma source(%arg3 : memref<128x512xbf16, #tpu.memory_space<any>>) target(%arg10 : memref<128x512xbf16, #tpu.memory_space<vmem>>) target_semaphore(%1 : memref<!tpu.dma_semaphore, #tpu.memory_space<semaphore_mem>>)
    %c1_i32 = arith.constant 1 : i32
    %2 = tpu.memref_slice %arg13[%c1_i32] : memref<3x!tpu.dma_semaphore, #tpu.memory_space<semaphore_mem>> -> memref<1x!tpu.dma_semaphore, #tpu.memory_space<semaphore_mem>>
    %3 = tpu.memref_squeeze %2 : memref<1x!tpu.dma_semaphore, #tpu.memory_space<semaphore_mem>> -> memref<!tpu.dma_semaphore, #tpu.memory_space<semaphore_mem>>
    tpu.enqueue_dma source(%arg4 : memref<128x512xbf16, #tpu.memory_space<any>>) target(%arg11 : memref<128x512xbf16, #tpu.memory_space<vmem>>) target_semaphore(%3 : memref<!tpu.dma_semaphore, #tpu.memory_space<semaphore_mem>>)
    %c2_i32 = arith.constant 2 : i32
    %4 = tpu.memref_slice %arg13[%c2_i32] : memref<3x!tpu.dma_semaphore, #tpu.memory_space<semaphore_mem>> -> memref<1x!tpu.dma_semaphore, #tpu.memory_space<semaphore_mem>>
    %5 = tpu.memref_squeeze %4 : memref<1x!tpu.dma_semaphore, #tpu.memory_space<semaphore_mem>> -> memref<!tpu.dma_semaphore, #tpu.memory_space<semaphore_mem>>
    tpu.enqueue_dma source(%arg5 : memref<128x512xbf16, #tpu.memory_space<any>>) target(%arg12 : memref<128x512xbf16, #tpu.memory_space<vmem>>) target_semaphore(%5 : memref<!tpu.dma_semaphore, #tpu.memory_space<semaphore_mem>>)
    %c0 = arith.constant 0 : index
    %c0_0 = arith.constant 0 : index
    %6 = vector.load %arg0[%c0, %c0_0] : memref<64x16xbf16, #tpu.memory_space<vmem>>, vector<64x16xbf16>
    %c0_1 = arith.constant 0 : index
    %c0_2 = arith.constant 0 : index
    %7 = vector.load %arg1[%c0_1, %c0_2] : memref<16x512xbf16, #tpu.memory_space<vmem>>, vector<16x512xbf16>
    %cst = arith.constant dense<0.000000e+00> : vector<64x512xf32>
    %8 = tpu.matmul %6, %7, %cst {dimension_numbers = #tpu.dot_dimension_numbers<[1], [0], [0], [1], [0, 0, 1, 1], [], []>} : vector<64x16xbf16>, vector<16x512xbf16>, vector<64x512xf32> -> vector<64x512xf32>
    %c0_3 = arith.constant 0 : index
    %c0_4 = arith.constant 0 : index
    %9 = vector.load %arg2[%c0_3, %c0_4] : memref<1x512xf32, #tpu.memory_space<vmem>>, vector<1x512xf32>
    %10 = vector.broadcast %9 : vector<1x512xf32> to vector<64x512xf32>
    %11 = arith.addf %8, %10 : vector<64x512xf32>
    %c0_5 = arith.constant 0 : index
    %c0_6 = arith.constant 0 : index
    %12 = vector.load %arg6[%c0_5, %c0_6] : memref<1x512xf32, #tpu.memory_space<vmem>>, vector<1x512xf32>
    %13 = vector.shape_cast %12 : vector<1x512xf32> to vector<1x512xf32>
    %14 = vector.broadcast %13 : vector<1x512xf32> to vector<8x512xf32>
    %c0_i32_7 = arith.constant 0 : i32
    %15 = tpu.memref_slice %arg13[%c0_i32_7] : memref<3x!tpu.dma_semaphore, #tpu.memory_space<semaphore_mem>> -> memref<1x!tpu.dma_semaphore, #tpu.memory_space<semaphore_mem>>
    %16 = tpu.memref_squeeze %15 : memref<1x!tpu.dma_semaphore, #tpu.memory_space<semaphore_mem>> -> memref<!tpu.dma_semaphore, #tpu.memory_space<semaphore_mem>>
    tpu.wait_dma2 semaphore(%16 : memref<!tpu.dma_semaphore, #tpu.memory_space<semaphore_mem>>) src(%arg3 : memref<128x512xbf16, #tpu.memory_space<any>>) dst(%arg10 : memref<128x512xbf16, #tpu.memory_space<vmem>>)
    %c1_i32_8 = arith.constant 1 : i32
    %17 = tpu.memref_slice %arg13[%c1_i32_8] : memref<3x!tpu.dma_semaphore, #tpu.memory_space<semaphore_mem>> -> memref<1x!tpu.dma_semaphore, #tpu.memory_space<semaphore_mem>>
    %18 = tpu.memref_squeeze %17 : memref<1x!tpu.dma_semaphore, #tpu.memory_space<semaphore_mem>> -> memref<!tpu.dma_semaphore, #tpu.memory_space<semaphore_mem>>
    tpu.wait_dma2 semaphore(%18 : memref<!tpu.dma_semaphore, #tpu.memory_space<semaphore_mem>>) src(%arg4 : memref<128x512xbf16, #tpu.memory_space<any>>) dst(%arg11 : memref<128x512xbf16, #tpu.memory_space<vmem>>)
    %c2_i32_9 = arith.constant 2 : i32
    %19 = tpu.memref_slice %arg13[%c2_i32_9] : memref<3x!tpu.dma_semaphore, #tpu.memory_space<semaphore_mem>> -> memref<1x!tpu.dma_semaphore, #tpu.memory_space<semaphore_mem>>
    %20 = tpu.memref_squeeze %19 : memref<1x!tpu.dma_semaphore, #tpu.memory_space<semaphore_mem>> -> memref<!tpu.dma_semaphore, #tpu.memory_space<semaphore_mem>>
    tpu.wait_dma2 semaphore(%20 : memref<!tpu.dma_semaphore, #tpu.memory_space<semaphore_mem>>) src(%arg5 : memref<128x512xbf16, #tpu.memory_space<any>>) dst(%arg12 : memref<128x512xbf16, #tpu.memory_space<vmem>>)
    %c0_10 = arith.constant 0 : index
    %c0_11 = arith.constant 0 : index
    %21 = vector.load %arg10[%c0_10, %c0_11] : memref<128x512xbf16, #tpu.memory_space<vmem>>, vector<128x512xbf16>
    %c0_12 = arith.constant 0 : index
    %c0_13 = arith.constant 0 : index
    %22 = vector.load %arg11[%c0_12, %c0_13] : memref<128x512xbf16, #tpu.memory_space<vmem>>, vector<128x512xbf16>
    %c0_14 = arith.constant 0 : index
    %c0_15 = arith.constant 0 : index
    %23 = vector.load %arg12[%c0_14, %c0_15] : memref<128x512xbf16, #tpu.memory_space<vmem>>, vector<128x512xbf16>
    %cst_16 = arith.constant 0.000000e+00 : f32
    %24 = vector.broadcast %cst_16 : f32 to vector<8x128xf32>
    %25 = vector.extract_strided_slice %11 {offsets = [0, 0], sizes = [8, 512], strides = [1, 1]} : vector<64x512xf32> to vector<8x512xf32>
    %26 = arith.truncf %24 : vector<8x128xf32> to vector<8x128xbf16>
    %cst_17 = arith.constant dense<0.000000e+00> : vector<8x512xf32>
    %27 = tpu.matmul %26, %21, %cst_17 {dimension_numbers = #tpu.dot_dimension_numbers<[1], [0], [0], [1], [0, 0, 1, 1], [], []>} : vector<8x128xbf16>, vector<128x512xbf16>, vector<8x512xf32> -> vector<8x512xf32>
    %28 = arith.addf %25, %27 : vector<8x512xf32>
    %29 = vector.extract_strided_slice %28 {offsets = [0, 0], sizes = [8, 384], strides = [1, 1]} : vector<8x512xf32> to vector<8x384xf32>
    %30 = arith.negf %29 : vector<8x384xf32>
    %31 = math.exp %30 : vector<8x384xf32>
    %cst_18 = arith.constant 1.000000e+00 : f32
    %32 = vector.broadcast %cst_18 : f32 to vector<8x384xf32>
    %33 = arith.addf %32, %31 : vector<8x384xf32>
    %34 = arith.divf %32, %33 : vector<8x384xf32>
    %35 = vector.extract_strided_slice %28 {offsets = [0, 384], sizes = [8, 128], strides = [1, 1]} : vector<8x512xf32> to vector<8x128xf32>
    %36 = math.tanh %35 : vector<8x128xf32>
    %37 = vector.extract_strided_slice %34 {offsets = [0, 0], sizes = [8, 128], strides = [1, 1]} : vector<8x384xf32> to vector<8x128xf32>
    %38 = vector.extract_strided_slice %34 {offsets = [0, 128], sizes = [8, 128], strides = [1, 1]} : vector<8x384xf32> to vector<8x128xf32>
    %39 = vector.extract_strided_slice %34 {offsets = [0, 256], sizes = [8, 128], strides = [1, 1]} : vector<8x384xf32> to vector<8x128xf32>
    %40 = arith.mulf %38, %24 : vector<8x128xf32>
    %41 = arith.mulf %37, %36 : vector<8x128xf32>
    %42 = arith.addf %40, %41 : vector<8x128xf32>
    %43 = math.tanh %42 : vector<8x128xf32>
    %44 = arith.mulf %39, %43 : vector<8x128xf32>
    %45 = arith.truncf %44 : vector<8x128xf32> to vector<8x128xbf16>
    %cst_19 = arith.constant dense<0.000000e+00> : vector<8x512xf32>
    %46 = tpu.matmul %45, %22, %cst_19 {dimension_numbers = #tpu.dot_dimension_numbers<[1], [0], [0], [1], [0, 0, 1, 1], [], []>} : vector<8x128xbf16>, vector<128x512xbf16>, vector<8x512xf32> -> vector<8x512xf32>
    %47 = arith.truncf %24 : vector<8x128xf32> to vector<8x128xbf16>
    %cst_20 = arith.constant dense<0.000000e+00> : vector<8x512xf32>
    %48 = tpu.matmul %47, %23, %cst_20 {dimension_numbers = #tpu.dot_dimension_numbers<[1], [0], [0], [1], [0, 0, 1, 1], [], []>} : vector<8x128xbf16>, vector<128x512xbf16>, vector<8x512xf32> -> vector<8x512xf32>
    %49 = arith.addf %46, %48 : vector<8x512xf32>
    %50 = arith.addf %49, %14 : vector<8x512xf32>
    %51 = vector.extract_strided_slice %50 {offsets = [0, 0], sizes = [8, 384], strides = [1, 1]} : vector<8x512xf32> to vector<8x384xf32>
    %52 = arith.negf %51 : vector<8x384xf32>
    %53 = math.exp %52 : vector<8x384xf32>
    %cst_21 = arith.constant 1.000000e+00 : f32
    %54 = vector.broadcast %cst_21 : f32 to vector<8x384xf32>
    %55 = arith.addf %54, %53 : vector<8x384xf32>
    %56 = arith.divf %54, %55 : vector<8x384xf32>
    %57 = vector.extract_strided_slice %50 {offsets = [0, 384], sizes = [8, 128], strides = [1, 1]} : vector<8x512xf32> to vector<8x128xf32>
    %58 = math.tanh %57 : vector<8x128xf32>
    %59 = vector.extract_strided_slice %56 {offsets = [0, 0], sizes = [8, 128], strides = [1, 1]} : vector<8x384xf32> to vector<8x128xf32>
    %60 = vector.extract_strided_slice %56 {offsets = [0, 128], sizes = [8, 128], strides = [1, 1]} : vector<8x384xf32> to vector<8x128xf32>
    %61 = vector.extract_strided_slice %56 {offsets = [0, 256], sizes = [8, 128], strides = [1, 1]} : vector<8x384xf32> to vector<8x128xf32>
    %62 = arith.mulf %60, %24 : vector<8x128xf32>
    %63 = arith.mulf %59, %58 : vector<8x128xf32>
    %64 = arith.addf %62, %63 : vector<8x128xf32>
    %65 = math.tanh %64 : vector<8x128xf32>
    %66 = arith.mulf %61, %65 : vector<8x128xf32>
    %67 = vector.extract_strided_slice %11 {offsets = [8, 0], sizes = [8, 512], strides = [1, 1]} : vector<64x512xf32> to vector<8x512xf32>
    %68 = arith.truncf %44 : vector<8x128xf32> to vector<8x128xbf16>
    %cst_22 = arith.constant dense<0.000000e+00> : vector<8x512xf32>
    %69 = tpu.matmul %68, %21, %cst_22 {dimension_numbers = #tpu.dot_dimension_numbers<[1], [0], [0], [1], [0, 0, 1, 1], [], []>} : vector<8x128xbf16>, vector<128x512xbf16>, vector<8x512xf32> -> vector<8x512xf32>
    %70 = arith.addf %67, %69 : vector<8x512xf32>
    %71 = vector.extract_strided_slice %70 {offsets = [0, 0], sizes = [8, 384], strides = [1, 1]} : vector<8x512xf32> to vector<8x384xf32>
    %72 = arith.negf %71 : vector<8x384xf32>
    %73 = math.exp %72 : vector<8x384xf32>
    %cst_23 = arith.constant 1.000000e+00 : f32
    %74 = vector.broadcast %cst_23 : f32 to vector<8x384xf32>
    %75 = arith.addf %74, %73 : vector<8x384xf32>
    %76 = arith.divf %74, %75 : vector<8x384xf32>
    %77 = vector.extract_strided_slice %70 {offsets = [0, 384], sizes = [8, 128], strides = [1, 1]} : vector<8x512xf32> to vector<8x128xf32>
    %78 = math.tanh %77 : vector<8x128xf32>
    %79 = vector.extract_strided_slice %76 {offsets = [0, 0], sizes = [8, 128], strides = [1, 1]} : vector<8x384xf32> to vector<8x128xf32>
    %80 = vector.extract_strided_slice %76 {offsets = [0, 128], sizes = [8, 128], strides = [1, 1]} : vector<8x384xf32> to vector<8x128xf32>
    %81 = vector.extract_strided_slice %76 {offsets = [0, 256], sizes = [8, 128], strides = [1, 1]} : vector<8x384xf32> to vector<8x128xf32>
    %82 = arith.mulf %80, %42 : vector<8x128xf32>
    %83 = arith.mulf %79, %78 : vector<8x128xf32>
    %84 = arith.addf %82, %83 : vector<8x128xf32>
    %85 = math.tanh %84 : vector<8x128xf32>
    %86 = arith.mulf %81, %85 : vector<8x128xf32>
    %87 = arith.truncf %86 : vector<8x128xf32> to vector<8x128xbf16>
    %cst_24 = arith.constant dense<0.000000e+00> : vector<8x512xf32>
    %88 = tpu.matmul %87, %22, %cst_24 {dimension_numbers = #tpu.dot_dimension_numbers<[1], [0], [0], [1], [0, 0, 1, 1], [], []>} : vector<8x128xbf16>, vector<128x512xbf16>, vector<8x512xf32> -> vector<8x512xf32>
    %89 = arith.truncf %66 : vector<8x128xf32> to vector<8x128xbf16>
    %cst_25 = arith.constant dense<0.000000e+00> : vector<8x512xf32>
    %90 = tpu.matmul %89, %23, %cst_25 {dimension_numbers = #tpu.dot_dimension_numbers<[1], [0], [0], [1], [0, 0, 1, 1], [], []>} : vector<8x128xbf16>, vector<128x512xbf16>, vector<8x512xf32> -> vector<8x512xf32>
    %91 = arith.addf %88, %90 : vector<8x512xf32>
    %92 = arith.addf %91, %14 : vector<8x512xf32>
    %93 = vector.extract_strided_slice %92 {offsets = [0, 0], sizes = [8, 384], strides = [1, 1]} : vector<8x512xf32> to vector<8x384xf32>
    %94 = arith.negf %93 : vector<8x384xf32>
    %95 = math.exp %94 : vector<8x384xf32>
    %cst_26 = arith.constant 1.000000e+00 : f32
    %96 = vector.broadcast %cst_26 : f32 to vector<8x384xf32>
    %97 = arith.addf %96, %95 : vector<8x384xf32>
    %98 = arith.divf %96, %97 : vector<8x384xf32>
    %99 = vector.extract_strided_slice %92 {offsets = [0, 384], sizes = [8, 128], strides = [1, 1]} : vector<8x512xf32> to vector<8x128xf32>
    %100 = math.tanh %99 : vector<8x128xf32>
    %101 = vector.extract_strided_slice %98 {offsets = [0, 0], sizes = [8, 128], strides = [1, 1]} : vector<8x384xf32> to vector<8x128xf32>
    %102 = vector.extract_strided_slice %98 {offsets = [0, 128], sizes = [8, 128], strides = [1, 1]} : vector<8x384xf32> to vector<8x128xf32>
    %103 = vector.extract_strided_slice %98 {offsets = [0, 256], sizes = [8, 128], strides = [1, 1]} : vector<8x384xf32> to vector<8x128xf32>
    %104 = arith.mulf %102, %64 : vector<8x128xf32>
    %105 = arith.mulf %101, %100 : vector<8x128xf32>
    %106 = arith.addf %104, %105 : vector<8x128xf32>
    %107 = math.tanh %106 : vector<8x128xf32>
    %108 = arith.mulf %103, %107 : vector<8x128xf32>
    %109 = vector.extract_strided_slice %11 {offsets = [16, 0], sizes = [8, 512], strides = [1, 1]} : vector<64x512xf32> to vector<8x512xf32>
    %110 = arith.truncf %86 : vector<8x128xf32> to vector<8x128xbf16>
    %cst_27 = arith.constant dense<0.000000e+00> : vector<8x512xf32>
    %111 = tpu.matmul %110, %21, %cst_27 {dimension_numbers = #tpu.dot_dimension_numbers<[1], [0], [0], [1], [0, 0, 1, 1], [], []>} : vector<8x128xbf16>, vector<128x512xbf16>, vector<8x512xf32> -> vector<8x512xf32>
    %112 = arith.addf %109, %111 : vector<8x512xf32>
    %113 = vector.extract_strided_slice %112 {offsets = [0, 0], sizes = [8, 384], strides = [1, 1]} : vector<8x512xf32> to vector<8x384xf32>
    %114 = arith.negf %113 : vector<8x384xf32>
    %115 = math.exp %114 : vector<8x384xf32>
    %cst_28 = arith.constant 1.000000e+00 : f32
    %116 = vector.broadcast %cst_28 : f32 to vector<8x384xf32>
    %117 = arith.addf %116, %115 : vector<8x384xf32>
    %118 = arith.divf %116, %117 : vector<8x384xf32>
    %119 = vector.extract_strided_slice %112 {offsets = [0, 384], sizes = [8, 128], strides = [1, 1]} : vector<8x512xf32> to vector<8x128xf32>
    %120 = math.tanh %119 : vector<8x128xf32>
    %121 = vector.extract_strided_slice %118 {offsets = [0, 0], sizes = [8, 128], strides = [1, 1]} : vector<8x384xf32> to vector<8x128xf32>
    %122 = vector.extract_strided_slice %118 {offsets = [0, 128], sizes = [8, 128], strides = [1, 1]} : vector<8x384xf32> to vector<8x128xf32>
    %123 = vector.extract_strided_slice %118 {offsets = [0, 256], sizes = [8, 128], strides = [1, 1]} : vector<8x384xf32> to vector<8x128xf32>
    %124 = arith.mulf %122, %84 : vector<8x128xf32>
    %125 = arith.mulf %121, %120 : vector<8x128xf32>
    %126 = arith.addf %124, %125 : vector<8x128xf32>
    %127 = math.tanh %126 : vector<8x128xf32>
    %128 = arith.mulf %123, %127 : vector<8x128xf32>
    %129 = arith.truncf %128 : vector<8x128xf32> to vector<8x128xbf16>
    %cst_29 = arith.constant dense<0.000000e+00> : vector<8x512xf32>
    %130 = tpu.matmul %129, %22, %cst_29 {dimension_numbers = #tpu.dot_dimension_numbers<[1], [0], [0], [1], [0, 0, 1, 1], [], []>} : vector<8x128xbf16>, vector<128x512xbf16>, vector<8x512xf32> -> vector<8x512xf32>
    %131 = arith.truncf %108 : vector<8x128xf32> to vector<8x128xbf16>
    %cst_30 = arith.constant dense<0.000000e+00> : vector<8x512xf32>
    %132 = tpu.matmul %131, %23, %cst_30 {dimension_numbers = #tpu.dot_dimension_numbers<[1], [0], [0], [1], [0, 0, 1, 1], [], []>} : vector<8x128xbf16>, vector<128x512xbf16>, vector<8x512xf32> -> vector<8x512xf32>
    %133 = arith.addf %130, %132 : vector<8x512xf32>
    %134 = arith.addf %133, %14 : vector<8x512xf32>
    %135 = vector.extract_strided_slice %134 {offsets = [0, 0], sizes = [8, 384], strides = [1, 1]} : vector<8x512xf32> to vector<8x384xf32>
    %136 = arith.negf %135 : vector<8x384xf32>
    %137 = math.exp %136 : vector<8x384xf32>
    %cst_31 = arith.constant 1.000000e+00 : f32
    %138 = vector.broadcast %cst_31 : f32 to vector<8x384xf32>
    %139 = arith.addf %138, %137 : vector<8x384xf32>
    %140 = arith.divf %138, %139 : vector<8x384xf32>
    %141 = vector.extract_strided_slice %134 {offsets = [0, 384], sizes = [8, 128], strides = [1, 1]} : vector<8x512xf32> to vector<8x128xf32>
    %142 = math.tanh %141 : vector<8x128xf32>
    %143 = vector.extract_strided_slice %140 {offsets = [0, 0], sizes = [8, 128], strides = [1, 1]} : vector<8x384xf32> to vector<8x128xf32>
    %144 = vector.extract_strided_slice %140 {offsets = [0, 128], sizes = [8, 128], strides = [1, 1]} : vector<8x384xf32> to vector<8x128xf32>
    %145 = vector.extract_strided_slice %140 {offsets = [0, 256], sizes = [8, 128], strides = [1, 1]} : vector<8x384xf32> to vector<8x128xf32>
    %146 = arith.mulf %144, %106 : vector<8x128xf32>
    %147 = arith.mulf %143, %142 : vector<8x128xf32>
    %148 = arith.addf %146, %147 : vector<8x128xf32>
    %149 = math.tanh %148 : vector<8x128xf32>
    %150 = arith.mulf %145, %149 : vector<8x128xf32>
    %151 = vector.extract_strided_slice %11 {offsets = [24, 0], sizes = [8, 512], strides = [1, 1]} : vector<64x512xf32> to vector<8x512xf32>
    %152 = arith.truncf %128 : vector<8x128xf32> to vector<8x128xbf16>
    %cst_32 = arith.constant dense<0.000000e+00> : vector<8x512xf32>
    %153 = tpu.matmul %152, %21, %cst_32 {dimension_numbers = #tpu.dot_dimension_numbers<[1], [0], [0], [1], [0, 0, 1, 1], [], []>} : vector<8x128xbf16>, vector<128x512xbf16>, vector<8x512xf32> -> vector<8x512xf32>
    %154 = arith.addf %151, %153 : vector<8x512xf32>
    %155 = vector.extract_strided_slice %154 {offsets = [0, 0], sizes = [8, 384], strides = [1, 1]} : vector<8x512xf32> to vector<8x384xf32>
    %156 = arith.negf %155 : vector<8x384xf32>
    %157 = math.exp %156 : vector<8x384xf32>
    %cst_33 = arith.constant 1.000000e+00 : f32
    %158 = vector.broadcast %cst_33 : f32 to vector<8x384xf32>
    %159 = arith.addf %158, %157 : vector<8x384xf32>
    %160 = arith.divf %158, %159 : vector<8x384xf32>
    %161 = vector.extract_strided_slice %154 {offsets = [0, 384], sizes = [8, 128], strides = [1, 1]} : vector<8x512xf32> to vector<8x128xf32>
    %162 = math.tanh %161 : vector<8x128xf32>
    %163 = vector.extract_strided_slice %160 {offsets = [0, 0], sizes = [8, 128], strides = [1, 1]} : vector<8x384xf32> to vector<8x128xf32>
    %164 = vector.extract_strided_slice %160 {offsets = [0, 128], sizes = [8, 128], strides = [1, 1]} : vector<8x384xf32> to vector<8x128xf32>
    %165 = vector.extract_strided_slice %160 {offsets = [0, 256], sizes = [8, 128], strides = [1, 1]} : vector<8x384xf32> to vector<8x128xf32>
    %166 = arith.mulf %164, %126 : vector<8x128xf32>
    %167 = arith.mulf %163, %162 : vector<8x128xf32>
    %168 = arith.addf %166, %167 : vector<8x128xf32>
    %169 = math.tanh %168 : vector<8x128xf32>
    %170 = arith.mulf %165, %169 : vector<8x128xf32>
    %171 = arith.truncf %170 : vector<8x128xf32> to vector<8x128xbf16>
    %cst_34 = arith.constant dense<0.000000e+00> : vector<8x512xf32>
    %172 = tpu.matmul %171, %22, %cst_34 {dimension_numbers = #tpu.dot_dimension_numbers<[1], [0], [0], [1], [0, 0, 1, 1], [], []>} : vector<8x128xbf16>, vector<128x512xbf16>, vector<8x512xf32> -> vector<8x512xf32>
    %173 = arith.truncf %150 : vector<8x128xf32> to vector<8x128xbf16>
    %cst_35 = arith.constant dense<0.000000e+00> : vector<8x512xf32>
    %174 = tpu.matmul %173, %23, %cst_35 {dimension_numbers = #tpu.dot_dimension_numbers<[1], [0], [0], [1], [0, 0, 1, 1], [], []>} : vector<8x128xbf16>, vector<128x512xbf16>, vector<8x512xf32> -> vector<8x512xf32>
    %175 = arith.addf %172, %174 : vector<8x512xf32>
    %176 = arith.addf %175, %14 : vector<8x512xf32>
    %177 = vector.extract_strided_slice %176 {offsets = [0, 0], sizes = [8, 384], strides = [1, 1]} : vector<8x512xf32> to vector<8x384xf32>
    %178 = arith.negf %177 : vector<8x384xf32>
    %179 = math.exp %178 : vector<8x384xf32>
    %cst_36 = arith.constant 1.000000e+00 : f32
    %180 = vector.broadcast %cst_36 : f32 to vector<8x384xf32>
    %181 = arith.addf %180, %179 : vector<8x384xf32>
    %182 = arith.divf %180, %181 : vector<8x384xf32>
    %183 = vector.extract_strided_slice %176 {offsets = [0, 384], sizes = [8, 128], strides = [1, 1]} : vector<8x512xf32> to vector<8x128xf32>
    %184 = math.tanh %183 : vector<8x128xf32>
    %185 = vector.extract_strided_slice %182 {offsets = [0, 0], sizes = [8, 128], strides = [1, 1]} : vector<8x384xf32> to vector<8x128xf32>
    %186 = vector.extract_strided_slice %182 {offsets = [0, 128], sizes = [8, 128], strides = [1, 1]} : vector<8x384xf32> to vector<8x128xf32>
    %187 = vector.extract_strided_slice %182 {offsets = [0, 256], sizes = [8, 128], strides = [1, 1]} : vector<8x384xf32> to vector<8x128xf32>
    %188 = arith.mulf %186, %148 : vector<8x128xf32>
    %189 = arith.mulf %185, %184 : vector<8x128xf32>
    %190 = arith.addf %188, %189 : vector<8x128xf32>
    %191 = math.tanh %190 : vector<8x128xf32>
    %192 = arith.mulf %187, %191 : vector<8x128xf32>
    %193 = vector.extract_strided_slice %11 {offsets = [32, 0], sizes = [8, 512], strides = [1, 1]} : vector<64x512xf32> to vector<8x512xf32>
    %194 = arith.truncf %170 : vector<8x128xf32> to vector<8x128xbf16>
    %cst_37 = arith.constant dense<0.000000e+00> : vector<8x512xf32>
    %195 = tpu.matmul %194, %21, %cst_37 {dimension_numbers = #tpu.dot_dimension_numbers<[1], [0], [0], [1], [0, 0, 1, 1], [], []>} : vector<8x128xbf16>, vector<128x512xbf16>, vector<8x512xf32> -> vector<8x512xf32>
    %196 = arith.addf %193, %195 : vector<8x512xf32>
    %197 = vector.extract_strided_slice %196 {offsets = [0, 0], sizes = [8, 384], strides = [1, 1]} : vector<8x512xf32> to vector<8x384xf32>
    %198 = arith.negf %197 : vector<8x384xf32>
    %199 = math.exp %198 : vector<8x384xf32>
    %cst_38 = arith.constant 1.000000e+00 : f32
    %200 = vector.broadcast %cst_38 : f32 to vector<8x384xf32>
    %201 = arith.addf %200, %199 : vector<8x384xf32>
    %202 = arith.divf %200, %201 : vector<8x384xf32>
    %203 = vector.extract_strided_slice %196 {offsets = [0, 384], sizes = [8, 128], strides = [1, 1]} : vector<8x512xf32> to vector<8x128xf32>
    %204 = math.tanh %203 : vector<8x128xf32>
    %205 = vector.extract_strided_slice %202 {offsets = [0, 0], sizes = [8, 128], strides = [1, 1]} : vector<8x384xf32> to vector<8x128xf32>
    %206 = vector.extract_strided_slice %202 {offsets = [0, 128], sizes = [8, 128], strides = [1, 1]} : vector<8x384xf32> to vector<8x128xf32>
    %207 = vector.extract_strided_slice %202 {offsets = [0, 256], sizes = [8, 128], strides = [1, 1]} : vector<8x384xf32> to vector<8x128xf32>
    %208 = arith.mulf %206, %168 : vector<8x128xf32>
    %209 = arith.mulf %205, %204 : vector<8x128xf32>
    %210 = arith.addf %208, %209 : vector<8x128xf32>
    %211 = math.tanh %210 : vector<8x128xf32>
    %212 = arith.mulf %207, %211 : vector<8x128xf32>
    %213 = arith.truncf %212 : vector<8x128xf32> to vector<8x128xbf16>
    %cst_39 = arith.constant dense<0.000000e+00> : vector<8x512xf32>
    %214 = tpu.matmul %213, %22, %cst_39 {dimension_numbers = #tpu.dot_dimension_numbers<[1], [0], [0], [1], [0, 0, 1, 1], [], []>} : vector<8x128xbf16>, vector<128x512xbf16>, vector<8x512xf32> -> vector<8x512xf32>
    %215 = arith.truncf %192 : vector<8x128xf32> to vector<8x128xbf16>
    %cst_40 = arith.constant dense<0.000000e+00> : vector<8x512xf32>
    %216 = tpu.matmul %215, %23, %cst_40 {dimension_numbers = #tpu.dot_dimension_numbers<[1], [0], [0], [1], [0, 0, 1, 1], [], []>} : vector<8x128xbf16>, vector<128x512xbf16>, vector<8x512xf32> -> vector<8x512xf32>
    %217 = arith.addf %214, %216 : vector<8x512xf32>
    %218 = arith.addf %217, %14 : vector<8x512xf32>
    %219 = vector.extract_strided_slice %218 {offsets = [0, 0], sizes = [8, 384], strides = [1, 1]} : vector<8x512xf32> to vector<8x384xf32>
    %220 = arith.negf %219 : vector<8x384xf32>
    %221 = math.exp %220 : vector<8x384xf32>
    %cst_41 = arith.constant 1.000000e+00 : f32
    %222 = vector.broadcast %cst_41 : f32 to vector<8x384xf32>
    %223 = arith.addf %222, %221 : vector<8x384xf32>
    %224 = arith.divf %222, %223 : vector<8x384xf32>
    %225 = vector.extract_strided_slice %218 {offsets = [0, 384], sizes = [8, 128], strides = [1, 1]} : vector<8x512xf32> to vector<8x128xf32>
    %226 = math.tanh %225 : vector<8x128xf32>
    %227 = vector.extract_strided_slice %224 {offsets = [0, 0], sizes = [8, 128], strides = [1, 1]} : vector<8x384xf32> to vector<8x128xf32>
    %228 = vector.extract_strided_slice %224 {offsets = [0, 128], sizes = [8, 128], strides = [1, 1]} : vector<8x384xf32> to vector<8x128xf32>
    %229 = vector.extract_strided_slice %224 {offsets = [0, 256], sizes = [8, 128], strides = [1, 1]} : vector<8x384xf32> to vector<8x128xf32>
    %230 = arith.mulf %228, %190 : vector<8x128xf32>
    %231 = arith.mulf %227, %226 : vector<8x128xf32>
    %232 = arith.addf %230, %231 : vector<8x128xf32>
    %233 = math.tanh %232 : vector<8x128xf32>
    %234 = arith.mulf %229, %233 : vector<8x128xf32>
    %235 = vector.extract_strided_slice %11 {offsets = [40, 0], sizes = [8, 512], strides = [1, 1]} : vector<64x512xf32> to vector<8x512xf32>
    %236 = arith.truncf %212 : vector<8x128xf32> to vector<8x128xbf16>
    %cst_42 = arith.constant dense<0.000000e+00> : vector<8x512xf32>
    %237 = tpu.matmul %236, %21, %cst_42 {dimension_numbers = #tpu.dot_dimension_numbers<[1], [0], [0], [1], [0, 0, 1, 1], [], []>} : vector<8x128xbf16>, vector<128x512xbf16>, vector<8x512xf32> -> vector<8x512xf32>
    %238 = arith.addf %235, %237 : vector<8x512xf32>
    %239 = vector.extract_strided_slice %238 {offsets = [0, 0], sizes = [8, 384], strides = [1, 1]} : vector<8x512xf32> to vector<8x384xf32>
    %240 = arith.negf %239 : vector<8x384xf32>
    %241 = math.exp %240 : vector<8x384xf32>
    %cst_43 = arith.constant 1.000000e+00 : f32
    %242 = vector.broadcast %cst_43 : f32 to vector<8x384xf32>
    %243 = arith.addf %242, %241 : vector<8x384xf32>
    %244 = arith.divf %242, %243 : vector<8x384xf32>
    %245 = vector.extract_strided_slice %238 {offsets = [0, 384], sizes = [8, 128], strides = [1, 1]} : vector<8x512xf32> to vector<8x128xf32>
    %246 = math.tanh %245 : vector<8x128xf32>
    %247 = vector.extract_strided_slice %244 {offsets = [0, 0], sizes = [8, 128], strides = [1, 1]} : vector<8x384xf32> to vector<8x128xf32>
    %248 = vector.extract_strided_slice %244 {offsets = [0, 128], sizes = [8, 128], strides = [1, 1]} : vector<8x384xf32> to vector<8x128xf32>
    %249 = vector.extract_strided_slice %244 {offsets = [0, 256], sizes = [8, 128], strides = [1, 1]} : vector<8x384xf32> to vector<8x128xf32>
    %250 = arith.mulf %248, %210 : vector<8x128xf32>
    %251 = arith.mulf %247, %246 : vector<8x128xf32>
    %252 = arith.addf %250, %251 : vector<8x128xf32>
    %253 = math.tanh %252 : vector<8x128xf32>
    %254 = arith.mulf %249, %253 : vector<8x128xf32>
    %255 = arith.truncf %254 : vector<8x128xf32> to vector<8x128xbf16>
    %cst_44 = arith.constant dense<0.000000e+00> : vector<8x512xf32>
    %256 = tpu.matmul %255, %22, %cst_44 {dimension_numbers = #tpu.dot_dimension_numbers<[1], [0], [0], [1], [0, 0, 1, 1], [], []>} : vector<8x128xbf16>, vector<128x512xbf16>, vector<8x512xf32> -> vector<8x512xf32>
    %257 = arith.truncf %234 : vector<8x128xf32> to vector<8x128xbf16>
    %cst_45 = arith.constant dense<0.000000e+00> : vector<8x512xf32>
    %258 = tpu.matmul %257, %23, %cst_45 {dimension_numbers = #tpu.dot_dimension_numbers<[1], [0], [0], [1], [0, 0, 1, 1], [], []>} : vector<8x128xbf16>, vector<128x512xbf16>, vector<8x512xf32> -> vector<8x512xf32>
    %259 = arith.addf %256, %258 : vector<8x512xf32>
    %260 = arith.addf %259, %14 : vector<8x512xf32>
    %261 = vector.extract_strided_slice %260 {offsets = [0, 0], sizes = [8, 384], strides = [1, 1]} : vector<8x512xf32> to vector<8x384xf32>
    %262 = arith.negf %261 : vector<8x384xf32>
    %263 = math.exp %262 : vector<8x384xf32>
    %cst_46 = arith.constant 1.000000e+00 : f32
    %264 = vector.broadcast %cst_46 : f32 to vector<8x384xf32>
    %265 = arith.addf %264, %263 : vector<8x384xf32>
    %266 = arith.divf %264, %265 : vector<8x384xf32>
    %267 = vector.extract_strided_slice %260 {offsets = [0, 384], sizes = [8, 128], strides = [1, 1]} : vector<8x512xf32> to vector<8x128xf32>
    %268 = math.tanh %267 : vector<8x128xf32>
    %269 = vector.extract_strided_slice %266 {offsets = [0, 0], sizes = [8, 128], strides = [1, 1]} : vector<8x384xf32> to vector<8x128xf32>
    %270 = vector.extract_strided_slice %266 {offsets = [0, 128], sizes = [8, 128], strides = [1, 1]} : vector<8x384xf32> to vector<8x128xf32>
    %271 = vector.extract_strided_slice %266 {offsets = [0, 256], sizes = [8, 128], strides = [1, 1]} : vector<8x384xf32> to vector<8x128xf32>
    %272 = arith.mulf %270, %232 : vector<8x128xf32>
    %273 = arith.mulf %269, %268 : vector<8x128xf32>
    %274 = arith.addf %272, %273 : vector<8x128xf32>
    %275 = math.tanh %274 : vector<8x128xf32>
    %276 = arith.mulf %271, %275 : vector<8x128xf32>
    %277 = vector.extract_strided_slice %11 {offsets = [48, 0], sizes = [8, 512], strides = [1, 1]} : vector<64x512xf32> to vector<8x512xf32>
    %278 = arith.truncf %254 : vector<8x128xf32> to vector<8x128xbf16>
    %cst_47 = arith.constant dense<0.000000e+00> : vector<8x512xf32>
    %279 = tpu.matmul %278, %21, %cst_47 {dimension_numbers = #tpu.dot_dimension_numbers<[1], [0], [0], [1], [0, 0, 1, 1], [], []>} : vector<8x128xbf16>, vector<128x512xbf16>, vector<8x512xf32> -> vector<8x512xf32>
    %280 = arith.addf %277, %279 : vector<8x512xf32>
    %281 = vector.extract_strided_slice %280 {offsets = [0, 0], sizes = [8, 384], strides = [1, 1]} : vector<8x512xf32> to vector<8x384xf32>
    %282 = arith.negf %281 : vector<8x384xf32>
    %283 = math.exp %282 : vector<8x384xf32>
    %cst_48 = arith.constant 1.000000e+00 : f32
    %284 = vector.broadcast %cst_48 : f32 to vector<8x384xf32>
    %285 = arith.addf %284, %283 : vector<8x384xf32>
    %286 = arith.divf %284, %285 : vector<8x384xf32>
    %287 = vector.extract_strided_slice %280 {offsets = [0, 384], sizes = [8, 128], strides = [1, 1]} : vector<8x512xf32> to vector<8x128xf32>
    %288 = math.tanh %287 : vector<8x128xf32>
    %289 = vector.extract_strided_slice %286 {offsets = [0, 0], sizes = [8, 128], strides = [1, 1]} : vector<8x384xf32> to vector<8x128xf32>
    %290 = vector.extract_strided_slice %286 {offsets = [0, 128], sizes = [8, 128], strides = [1, 1]} : vector<8x384xf32> to vector<8x128xf32>
    %291 = vector.extract_strided_slice %286 {offsets = [0, 256], sizes = [8, 128], strides = [1, 1]} : vector<8x384xf32> to vector<8x128xf32>
    %292 = arith.mulf %290, %252 : vector<8x128xf32>
    %293 = arith.mulf %289, %288 : vector<8x128xf32>
    %294 = arith.addf %292, %293 : vector<8x128xf32>
    %295 = math.tanh %294 : vector<8x128xf32>
    %296 = arith.mulf %291, %295 : vector<8x128xf32>
    %297 = arith.truncf %296 : vector<8x128xf32> to vector<8x128xbf16>
    %cst_49 = arith.constant dense<0.000000e+00> : vector<8x512xf32>
    %298 = tpu.matmul %297, %22, %cst_49 {dimension_numbers = #tpu.dot_dimension_numbers<[1], [0], [0], [1], [0, 0, 1, 1], [], []>} : vector<8x128xbf16>, vector<128x512xbf16>, vector<8x512xf32> -> vector<8x512xf32>
    %299 = arith.truncf %276 : vector<8x128xf32> to vector<8x128xbf16>
    %cst_50 = arith.constant dense<0.000000e+00> : vector<8x512xf32>
    %300 = tpu.matmul %299, %23, %cst_50 {dimension_numbers = #tpu.dot_dimension_numbers<[1], [0], [0], [1], [0, 0, 1, 1], [], []>} : vector<8x128xbf16>, vector<128x512xbf16>, vector<8x512xf32> -> vector<8x512xf32>
    %301 = arith.addf %298, %300 : vector<8x512xf32>
    %302 = arith.addf %301, %14 : vector<8x512xf32>
    %303 = vector.extract_strided_slice %302 {offsets = [0, 0], sizes = [8, 384], strides = [1, 1]} : vector<8x512xf32> to vector<8x384xf32>
    %304 = arith.negf %303 : vector<8x384xf32>
    %305 = math.exp %304 : vector<8x384xf32>
    %cst_51 = arith.constant 1.000000e+00 : f32
    %306 = vector.broadcast %cst_51 : f32 to vector<8x384xf32>
    %307 = arith.addf %306, %305 : vector<8x384xf32>
    %308 = arith.divf %306, %307 : vector<8x384xf32>
    %309 = vector.extract_strided_slice %302 {offsets = [0, 384], sizes = [8, 128], strides = [1, 1]} : vector<8x512xf32> to vector<8x128xf32>
    %310 = math.tanh %309 : vector<8x128xf32>
    %311 = vector.extract_strided_slice %308 {offsets = [0, 0], sizes = [8, 128], strides = [1, 1]} : vector<8x384xf32> to vector<8x128xf32>
    %312 = vector.extract_strided_slice %308 {offsets = [0, 128], sizes = [8, 128], strides = [1, 1]} : vector<8x384xf32> to vector<8x128xf32>
    %313 = vector.extract_strided_slice %308 {offsets = [0, 256], sizes = [8, 128], strides = [1, 1]} : vector<8x384xf32> to vector<8x128xf32>
    %314 = arith.mulf %312, %274 : vector<8x128xf32>
    %315 = arith.mulf %311, %310 : vector<8x128xf32>
    %316 = arith.addf %314, %315 : vector<8x128xf32>
    %317 = math.tanh %316 : vector<8x128xf32>
    %318 = arith.mulf %313, %317 : vector<8x128xf32>
    %319 = vector.extract_strided_slice %11 {offsets = [56, 0], sizes = [8, 512], strides = [1, 1]} : vector<64x512xf32> to vector<8x512xf32>
    %320 = arith.truncf %296 : vector<8x128xf32> to vector<8x128xbf16>
    %cst_52 = arith.constant dense<0.000000e+00> : vector<8x512xf32>
    %321 = tpu.matmul %320, %21, %cst_52 {dimension_numbers = #tpu.dot_dimension_numbers<[1], [0], [0], [1], [0, 0, 1, 1], [], []>} : vector<8x128xbf16>, vector<128x512xbf16>, vector<8x512xf32> -> vector<8x512xf32>
    %322 = arith.addf %319, %321 : vector<8x512xf32>
    %323 = vector.extract_strided_slice %322 {offsets = [0, 0], sizes = [8, 384], strides = [1, 1]} : vector<8x512xf32> to vector<8x384xf32>
    %324 = arith.negf %323 : vector<8x384xf32>
    %325 = math.exp %324 : vector<8x384xf32>
    %cst_53 = arith.constant 1.000000e+00 : f32
    %326 = vector.broadcast %cst_53 : f32 to vector<8x384xf32>
    %327 = arith.addf %326, %325 : vector<8x384xf32>
    %328 = arith.divf %326, %327 : vector<8x384xf32>
    %329 = vector.extract_strided_slice %322 {offsets = [0, 384], sizes = [8, 128], strides = [1, 1]} : vector<8x512xf32> to vector<8x128xf32>
    %330 = math.tanh %329 : vector<8x128xf32>
    %331 = vector.extract_strided_slice %328 {offsets = [0, 0], sizes = [8, 128], strides = [1, 1]} : vector<8x384xf32> to vector<8x128xf32>
    %332 = vector.extract_strided_slice %328 {offsets = [0, 128], sizes = [8, 128], strides = [1, 1]} : vector<8x384xf32> to vector<8x128xf32>
    %333 = vector.extract_strided_slice %328 {offsets = [0, 256], sizes = [8, 128], strides = [1, 1]} : vector<8x384xf32> to vector<8x128xf32>
    %334 = arith.mulf %332, %294 : vector<8x128xf32>
    %335 = arith.mulf %331, %330 : vector<8x128xf32>
    %336 = arith.addf %334, %335 : vector<8x128xf32>
    %337 = math.tanh %336 : vector<8x128xf32>
    %338 = arith.mulf %333, %337 : vector<8x128xf32>
    %339 = arith.truncf %338 : vector<8x128xf32> to vector<8x128xbf16>
    %cst_54 = arith.constant dense<0.000000e+00> : vector<8x512xf32>
    %340 = tpu.matmul %339, %22, %cst_54 {dimension_numbers = #tpu.dot_dimension_numbers<[1], [0], [0], [1], [0, 0, 1, 1], [], []>} : vector<8x128xbf16>, vector<128x512xbf16>, vector<8x512xf32> -> vector<8x512xf32>
    %341 = arith.truncf %318 : vector<8x128xf32> to vector<8x128xbf16>
    %cst_55 = arith.constant dense<0.000000e+00> : vector<8x512xf32>
    %342 = tpu.matmul %341, %23, %cst_55 {dimension_numbers = #tpu.dot_dimension_numbers<[1], [0], [0], [1], [0, 0, 1, 1], [], []>} : vector<8x128xbf16>, vector<128x512xbf16>, vector<8x512xf32> -> vector<8x512xf32>
    %343 = arith.addf %340, %342 : vector<8x512xf32>
    %344 = arith.addf %343, %14 : vector<8x512xf32>
    %345 = vector.extract_strided_slice %344 {offsets = [0, 0], sizes = [8, 384], strides = [1, 1]} : vector<8x512xf32> to vector<8x384xf32>
    %346 = arith.negf %345 : vector<8x384xf32>
    %347 = math.exp %346 : vector<8x384xf32>
    %cst_56 = arith.constant 1.000000e+00 : f32
    %348 = vector.broadcast %cst_56 : f32 to vector<8x384xf32>
    %349 = arith.addf %348, %347 : vector<8x384xf32>
    %350 = arith.divf %348, %349 : vector<8x384xf32>
    %351 = vector.extract_strided_slice %344 {offsets = [0, 384], sizes = [8, 128], strides = [1, 1]} : vector<8x512xf32> to vector<8x128xf32>
    %352 = math.tanh %351 : vector<8x128xf32>
    %353 = vector.extract_strided_slice %350 {offsets = [0, 0], sizes = [8, 128], strides = [1, 1]} : vector<8x384xf32> to vector<8x128xf32>
    %354 = vector.extract_strided_slice %350 {offsets = [0, 128], sizes = [8, 128], strides = [1, 1]} : vector<8x384xf32> to vector<8x128xf32>
    %355 = vector.extract_strided_slice %350 {offsets = [0, 256], sizes = [8, 128], strides = [1, 1]} : vector<8x384xf32> to vector<8x128xf32>
    %356 = arith.mulf %354, %316 : vector<8x128xf32>
    %357 = arith.mulf %353, %352 : vector<8x128xf32>
    %358 = arith.addf %356, %357 : vector<8x128xf32>
    %359 = math.tanh %358 : vector<8x128xf32>
    %360 = arith.mulf %355, %359 : vector<8x128xf32>
    %361 = arith.truncf %360 : vector<8x128xf32> to vector<8x128xbf16>
    %c0_57 = arith.constant 0 : index
    %c0_58 = arith.constant 0 : index
    %362 = vector.load %arg7[%c0_57, %c0_58] : memref<128x128xbf16, #tpu.memory_space<vmem>>, vector<128x128xbf16>
    %cst_59 = arith.constant dense<0.000000e+00> : vector<8x128xf32>
    %363 = tpu.matmul %361, %362, %cst_59 {dimension_numbers = #tpu.dot_dimension_numbers<[1], [0], [0], [1], [0, 0, 1, 1], [], []>} : vector<8x128xbf16>, vector<128x128xbf16>, vector<8x128xf32> -> vector<8x128xf32>
    %c0_60 = arith.constant 0 : index
    %c0_61 = arith.constant 0 : index
    %364 = vector.load %arg8[%c0_60, %c0_61] : memref<1x128xf32, #tpu.memory_space<vmem>>, vector<1x128xf32>
    %365 = vector.broadcast %364 : vector<1x128xf32> to vector<8x128xf32>
    %366 = arith.addf %363, %365 : vector<8x128xf32>
    %c0_62 = arith.constant 0 : index
    %c0_63 = arith.constant 0 : index
    %367 = vector.load %arg9[%c0_62, %c0_63] : memref<8x128xf32, #tpu.memory_space<vmem>>, vector<8x128xf32>
    tpu.vector_store %arg9[%c0_62, %c0_63], %366 {strides = array<i32>} : memref<8x128xf32, #tpu.memory_space<vmem>>, vector<8x128xf32>,
    return
  }
}

</mosaic_0001>

<bundles_post_ra>
// kernel: lstm_forward.1
= control target key start
LH: loop header
LB: loop body
LE: loop exit
PB: predicated region body
PF: predicated region fallthrough
CT: control target
= control target key end

     0   :  { %v6111_v1 = vmov 0   ;;  %vm136_vm0 = vcmask 130048   ;;  %v76_v9 = vlaneseq  ;;  %s4354_s27 = smov [#allocation3]   ;;  %s6101_s1 = inlined_call_operand.vmem [shape: bf16[16,512], index: 1, kind: input, shape index: {}]   ;;  %s6102_s0 = inlined_call_operand.vmem [shape: bf16[64,16], index: 0, kind: input, shape index: {}]   ;;  %s6103_s6 = inlined_call_operand.vmem [shape: f32[1,512], index: 6, kind: input, shape index: {}]   ;;  %s6104_s3 = inlined_call_operand.hbm [shape: bf16[128,512], index: 3, kind: input, shape index: {}]   ;;  %s6105_s7 = inlined_call_operand.vmem [shape: bf16[128,128], index: 7, kind: input, shape index: {}]   ;;  %s6106_s8 = inlined_call_operand.vmem [shape: f32[1,128], index: 8, kind: input, shape index: {}]   ;;  %s6107_s9 = inlined_call_operand.vmem [shape: f32[8,128], index: 9, kind: output, shape index: {}]   ;;  %s6108_s4 = inlined_call_operand.hbm [shape: bf16[128,512], index: 4, kind: input, shape index: {}]   ;;  %s6109_s5 = inlined_call_operand.hbm [shape: bf16[128,512], index: 5, kind: input, shape index: {}]   ;;  %s6110_s2 = inlined_call_operand.vmem [shape: f32[1,512], index: 2, kind: input, shape index: {}]  }
   0x1   :  { %v3676_v0 = vld [vmem:[%s6101_s1 + $0x4] ss:$16 sps:$4 sm:$0xff]   ;;  %181 = vmatprep.mubr.bf16.mxu0 %v6111_v1  ;;  %254 = vmatprep.mubr.bf16.mxu1 %v6111_v1  ;;  %v3678_v2 = vld [vmem:[%s6101_s1 + $0xc] ss:$16 sps:$4 sm:$0xff]   ;;  %v3680_v3 = vld [vmem:[%s6101_s1] ss:$16 sps:$4 sm:$0xff]  }
   0x2   :  { %163 = vmatprep.subr.bf16.mxu0 %v3676_v0  ;;  %v3681_v4 = vld [vmem:[%s6101_s1 + $0x8] ss:$16 sps:$4 sm:$0xff]   ;;  %236 = vmatprep.subr.bf16.mxu1 %v3678_v2  ;;  %v3682_v5 = vld [vmem:[%s6102_s0] sm:$0xff]   ;;  %v3684_v7 = vld [vmem:[%s6102_s0 + $0x10] sm:$0xff]   ;;  %v77_v10 = vshrl.u32 %v76_v9, 7  ;;  %s46_s28 = sshll.u32 %s4354_s27, 4  ;;  %s47_s28 = int_to_ptr.vmem [resolvable:$true] %s46_s28 }
   0x3   :  { %164 = vmatpush1.bf16.msra.mxu0 %v3680_v3  ;;  %237 = vmatpush1.bf16.msra.mxu1 %v3681_v4  ;;  %v3683_v6 = vld [vmem:[%s6102_s0 + $0x8] sm:$0xff]   ;;  %v3685_v8 = vld [vmem:[%s6102_s0 + $0x18] sm:$0xff]   ;;  %v295_v13 = vld [vmem:[%s6103_s6] sm:$0xf]  ;;  %s4353_s0 = smov [#allocation2]  }
   0x4   :  { %v78_v11 = vsub.s32 0, %v77_v10  ;;  %v86_v12 = vsub.s32 2, %v77_v10  ;;  %v82_v14 = vsub.s32 1, %v77_v10  ;;  %v90_v15 = vsub.s32 3, %v77_v10  ;;  %s34_s26 = sshll.u32 %s4353_s0, 4  ;;  %s35_s26 = int_to_ptr.vmem [resolvable:$true] %s34_s26 }
   0x5   :  { %s4294_s29 = scalar_lea.vmem %s35_s26, 4096  ;;  %p4299_p1 = scmp.lt.s32.totalorder %s35_s26, %s35_s26 }
   0x6   :  { %3477 = vmatmul.mubr.msk.bf16.vlgmr.msra.gmra.mxu0 %vm136_vm0, %v3682_v5  ;;  %3481 = vmatmul.mubr.msk.bf16.vlgmr.msra.gmra.mxu1 %vm136_vm0, %v3682_v5  ;;  %v4451_v16 = vrot.slane %v295_v13, %v78_v11  ;;  %v4453_v17 = vrot.slane %v295_v13, %v86_v12  ;;  %v4455_v18 = vrot.slane %v295_v13, %v82_v14  ;;  %p4295_p0 = scmp.ne.s32.totalorder %s35_s26, %s4294_s29  ;;  %p4300_p2 = scmp.lt.s32.totalorder %s4294_s29, %s4294_s29 }
   0x7   :  { %191 = vmatprep.mubr.bf16.mxu0 %v6111_v1  ;;  %264 = vmatprep.mubr.bf16.mxu1 %v6111_v1  ;;  %v4457_v19 = vrot.slane %v295_v13, %v90_v15 }
   0x8   :  { %6398 = vst [vmem:[#allocation17_spill] sm:$0xff] %v4451_v16  ;;  %6399 = vst [vmem:[#allocation18_spill] sm:$0xff] %v4453_v17  ;;  %p4301_p3 = por %p4300_p2, %p4299_p1 }
   0x9   :  { %6400 = vst [vmem:[#allocation19_spill] sm:$0xff] %v4455_v18  ;;  %6401 = vst [vmem:[#allocation20_spill] sm:$0xff] %v4457_v19 }
   0xa   :  { %p4302_p4 = pnand %p4301_p3, %p4295_p0 }
   0xe   :  { %3478 = vmatmul.mubr.msk.bf16.gmra.mxu0 %vm136_vm0, %v3683_v6  ;;  %3482 = vmatmul.mubr.msk.bf16.gmra.mxu1 %vm136_vm0, %v3683_v6 }
   0xf   :  { %201 = vmatprep.mubr.bf16.mxu0 %v6111_v1  ;;  %274 = vmatprep.mubr.bf16.mxu1 %v6111_v1 }
  0x16   :  { %3479 = vmatmul.mubr.msk.bf16.gmra.mxu0 %vm136_vm0, %v3684_v7  ;;  %3483 = vmatmul.mubr.msk.bf16.gmra.mxu1 %vm136_vm0, %v3684_v7 }
  0x17   :  { %211 = vmatprep.mubr.bf16.mxu0 %v6111_v1  ;;  %284 = vmatprep.mubr.bf16.mxu1 %v6111_v1 }
  0x1e   :  { %3480 = vmatmul.mubr.msk.bf16.gmra.mxu0 %vm136_vm0, %v3685_v8  ;;  %3484 = vmatmul.mubr.msk.bf16.gmra.mxu1 %vm136_vm0, %v3685_v8 }
  0x1f   :  { %4305 = shalt.err (!%p4302_p4)  }
  0x20   :  { %37 = dma.hbm_to_vmem [thread:$0]  %s6104_s3, 4096, %s35_s26, [#allocation5] }
  0x21   :  { %s4314_s10 = scalar_lea.vmem %s47_s28, 4096  ;;  %p4319_p6 = scmp.lt.s32.totalorder %s47_s28, %s47_s28 }
  0x22   :  { %p4315_p5 = scmp.ne.s32.totalorder %s47_s28, %s4314_s10  ;;  %p4320_p7 = scmp.lt.s32.totalorder %s4314_s10, %s4314_s10 }
  0x24   :  { %p4321_p8 = por %p4320_p7, %p4319_p6 }
  0x26   :  { %p4322_p9 = pnand %p4321_p8, %p4315_p5 }
  0x28   :  { %4325 = shalt.err (!%p4322_p9)  }
  0x29   :  { %49 = dma.hbm_to_vmem [thread:$0]  %s6108_s4, 4096, %s47_s28, [#allocation5 + $0x1] }
  0x2a   :  { %s4355_s13 = smov [#allocation4]  }
  0x2b   :  { %s58_s14 = sshll.u32 %s4355_s13, 4  ;;  %s59_s14 = int_to_ptr.vmem [resolvable:$true] %s58_s14 }
  0x2c   :  { %s4334_s15 = scalar_lea.vmem %s59_s14, 4096  ;;  %p4339_p11 = scmp.lt.s32.totalorder %s59_s14, %s59_s14 }
  0x2d   :  { %p4335_p10 = scmp.ne.s32.totalorder %s59_s14, %s4334_s15  ;;  %p4340_p12 = scmp.lt.s32.totalorder %s4334_s15, %s4334_s15 }
  0x2f   :  { %p4341_p13 = por %p4340_p12, %p4339_p11 }
  0x31   :  { %p4342_p0 = pnand %p4341_p13, %p4335_p10 }
  0x33   :  { %4345 = shalt.err (!%p4342_p0)  }
  0x34   :  { %61 = dma.hbm_to_vmem [thread:$0]  %s6109_s5, 4096, %s59_s14, [#allocation5 + $0x2]  ;;  %v74_v20 = vld [vmem:[%s6110_s2] sm:$0xf] }
  0x35   :  { %v79_v21 = vrot.slane %v74_v20, %v78_v11  ;;  %v87_v22 = vrot.slane %v74_v20, %v86_v12  ;;  %v4471_v23 = vrot.slane %v74_v20, %v82_v14  ;;  %v4473_v24 = vrot.slane %v74_v20, %v90_v15 }
  0xc6   :  { %v183_v25 = vpop.f32.mrf.mxu0  ;;  %v256_v26 = vpop.f32.mrf.mxu1 }
  0xc7   :  { %v4475_v27 = vadd.f32 %v183_v25, %v79_v21  ;;  %v4477_v28 = vadd.f32 %v256_v26, %v87_v22 }
  0xc8   :  { %v185_v29 = vpop.f32.mrf.mxu0  ;;  %v258_v30 = vpop.f32.mrf.mxu1 }
  0xc9   :  { %v4480_v31 = vadd.f32 %v185_v29, %v4471_v23  ;;  %v4483_v32 = vadd.f32 %v258_v30, %v4473_v24 }
  0xca   :  { %v187_v33 = vpop.f32.mrf.mxu0  ;;  %v260_v34 = vpop.f32.mrf.mxu1 }
  0xcb   :  { %v4485_v35 = vadd.f32 %v187_v33, %v79_v21  ;;  %v4487_v36 = vadd.f32 %v260_v34, %v87_v22 }
  0xcc   :  { %v189_v37 = vpop.f32.mrf.mxu0  ;;  %v262_v38 = vpop.f32.mrf.mxu1 }
  0xcd   :  { %6402 = vst [vmem:[#allocation21_spill] sm:$0xff] %v4485_v35  ;;  %6403 = vst [vmem:[#allocation22_spill] sm:$0xff] %v4487_v36  ;;  %v4490_v39 = vadd.f32 %v189_v37, %v4471_v23  ;;  %v4493_v40 = vadd.f32 %v262_v38, %v4473_v24 }
  0xce   :  { %v193_v41 = vpop.f32.mrf.mxu0  ;;  %v266_v42 = vpop.f32.mrf.mxu1 }
  0xcf   :  { %6404 = vst [vmem:[#allocation23_spill] sm:$0xff] %v4490_v39  ;;  %6405 = vst [vmem:[#allocation24_spill] sm:$0xff] %v4493_v40  ;;  %v4495_v43 = vadd.f32 %v193_v41, %v79_v21  ;;  %v4497_v44 = vadd.f32 %v266_v42, %v87_v22 }
  0xd0   :  { %v195_v45 = vpop.f32.mrf.mxu0  ;;  %v268_v46 = vpop.f32.mrf.mxu1 }
  0xd1   :  { %6406 = vst [vmem:[#allocation25_spill] sm:$0xff] %v4495_v43  ;;  %6407 = vst [vmem:[#allocation26_spill] sm:$0xff] %v4497_v44  ;;  %v4500_v47 = vadd.f32 %v195_v45, %v4471_v23  ;;  %v4503_v48 = vadd.f32 %v268_v46, %v4473_v24 }
  0xd2   :  { %v197_v49 = vpop.f32.mrf.mxu0  ;;  %v270_v50 = vpop.f32.mrf.mxu1 }
  0xd3   :  { %6408 = vst [vmem:[#allocation27_spill] sm:$0xff] %v4500_v47  ;;  %6409 = vst [vmem:[#allocation28_spill] sm:$0xff] %v4503_v48  ;;  %v4505_v51 = vadd.f32 %v197_v49, %v79_v21  ;;  %v4507_v52 = vadd.f32 %v270_v50, %v87_v22 }
  0xd4   :  { %v199_v53 = vpop.f32.mrf.mxu0  ;;  %v272_v54 = vpop.f32.mrf.mxu1 }
  0xd5   :  { %6410 = vst [vmem:[#allocation29_spill] sm:$0xff] %v4505_v51  ;;  %6411 = vst [vmem:[#allocation30_spill] sm:$0xff] %v4507_v52  ;;  %v4510_v55 = vadd.f32 %v199_v53, %v4471_v23  ;;  %v4513_v56 = vadd.f32 %v272_v54, %v4473_v24 }
  0xd6   :  { %v203_v57 = vpop.f32.mrf.mxu0  ;;  %v276_v58 = vpop.f32.mrf.mxu1 }
  0xd7   :  { %6412 = vst [vmem:[#allocation31_spill] sm:$0xff] %v4510_v55  ;;  %6413 = vst [vmem:[#allocation32_spill] sm:$0xff] %v4513_v56  ;;  %v4515_v59 = vadd.f32 %v203_v57, %v79_v21  ;;  %v4517_v60 = vadd.f32 %v276_v58, %v87_v22 }
  0xd8   :  { %v205_v61 = vpop.f32.mrf.mxu0  ;;  %v278_v62 = vpop.f32.mrf.mxu1 }
  0xd9   :  { %6414 = vst [vmem:[#allocation33_spill] sm:$0xff] %v4515_v59  ;;  %6415 = vst [vmem:[#allocation34_spill] sm:$0xff] %v4517_v60  ;;  %v4520_v63 = vadd.f32 %v205_v61, %v4471_v23  ;;  %v4523_v0 = vadd.f32 %v278_v62, %v4473_v24 }
  0xda   :  { %v207_v2 = vpop.f32.mrf.mxu0  ;;  %v280_v3 = vpop.f32.mrf.mxu1 }
  0xdb   :  { %6416 = vst [vmem:[#allocation35_spill] sm:$0xff] %v4520_v63  ;;  %6417 = vst [vmem:[#allocation36_spill] sm:$0xff] %v4523_v0  ;;  %v4525_v4 = vadd.f32 %v207_v2, %v79_v21  ;;  %v4527_v5 = vadd.f32 %v280_v3, %v87_v22 }
  0xdc   :  { %v209_v6 = vpop.f32.mrf.mxu0  ;;  %v282_v7 = vpop.f32.mrf.mxu1 }
  0xdd   :  { %6418 = vst [vmem:[#allocation37_spill] sm:$0xff] %v4525_v4  ;;  %6419 = vst [vmem:[#allocation38_spill] sm:$0xff] %v4527_v5  ;;  %v4530_v8 = vadd.f32 %v209_v6, %v4471_v23  ;;  %v4533_v9 = vadd.f32 %v282_v7, %v4473_v24 }
  0xde   :  { %v213_v10 = vpop.f32.mrf.mxu0  ;;  %v286_v11 = vpop.f32.mrf.mxu1 }
  0xdf   :  { %6420 = vst [vmem:[#allocation39_spill] sm:$0xff] %v4530_v8  ;;  %6421 = vst [vmem:[#allocation40_spill] sm:$0xff] %v4533_v9  ;;  %v4535_v12 = vadd.f32 %v213_v10, %v79_v21  ;;  %v4537_v13 = vadd.f32 %v286_v11, %v87_v22 }
  0xe0   :  { %v215_v14 = vpop.f32.mrf.mxu0  ;;  %v288_v15 = vpop.f32.mrf.mxu1 }
  0xe1   :  { %6422 = vst [vmem:[#allocation41_spill] sm:$0xff] %v4535_v12  ;;  %6423 = vst [vmem:[#allocation42_spill] sm:$0xff] %v4537_v13  ;;  %v4540_v20 = vadd.f32 %v215_v14, %v4471_v23  ;;  %v4543_v25 = vadd.f32 %v288_v15, %v4473_v24 }
  0xe2   :  { %v217_v26 = vpop.f32.mrf.mxu0  ;;  %v290_v29 = vpop.f32.mrf.mxu1 }
  0xe3   :  { %6424 = vst [vmem:[#allocation43_spill] sm:$0xff] %v4540_v20  ;;  %6425 = vst [vmem:[#allocation44_spill] sm:$0xff] %v4543_v25  ;;  %v4545_v30 = vadd.f32 %v217_v26, %v79_v21  ;;  %v4547_v33 = vadd.f32 %v290_v29, %v87_v22 }
  0xe4   :  { %v219_v34 = vpop.f32.mrf.mxu0  ;;  %v292_v37 = vpop.f32.mrf.mxu1 }
  0xe5   :  { %6426 = vst [vmem:[#allocation45_spill] sm:$0xff] %v4545_v30  ;;  %6427 = vst [vmem:[#allocation46_spill] sm:$0xff] %v4547_v33  ;;  %v4550_v38 = vadd.f32 %v219_v34, %v4471_v23  ;;  %v4553_v41 = vadd.f32 %v292_v37, %v4473_v24 }
  0xe7   :  { %6428 = vst [vmem:[#allocation47_spill] sm:$0xff] %v4550_v38  ;;  %6429 = vst [vmem:[#allocation48_spill] sm:$0xff] %v4553_v41 }
  0xe8   :  { %4346 = dma.done.wait [#allocation5], 4096 }
  0xe9   :  { %4347 = vsyncadd [#allocation5], 4294963200 }
  0xea   :  { %4348 = dma.done.wait [#allocation5 + $0x1], 4096 }
  0xeb   :  { %4349 = vsyncadd [#allocation5 + $0x1], 4294963200 }
  0xec   :  { %4350 = dma.done.wait [#allocation5 + $0x2], 4096 }
  0xed   :  { %4351 = vsyncadd [#allocation5 + $0x2], 4294963200  ;;  %613 = vmatprep.mubr.bf16.mxu0 %v6111_v1  ;;  %654 = vmatprep.mubr.bf16.mxu1 %v6111_v1  ;;  %v4557_v21 = vld [vmem:[#allocation2 + $0xe4] ss:$16 sps:$4 sm:$0xff]   ;;  %v4559_v22 = vld [vmem:[#allocation2 + $0xe0] ss:$16 sps:$4 sm:$0xff]  }
  0xee   :  { %581 = vmatprep.subr.bf16.mxu0 %v4557_v21  ;;  %v4562_v23 = vld [vmem:[#allocation2 + $0xc4] ss:$16 sps:$4 sm:$0xff]   ;;  %v4565_v24 = vld [vmem:[#allocation2 + $0xc0] ss:$16 sps:$4 sm:$0xff]   ;;  %v4570_v45 = vld [vmem:[#allocation2 + $0xec] ss:$16 sps:$4 sm:$0xff]  }
  0xef   :  { %582 = vmatpush1.bf16.msra.mxu0 %v4559_v22  ;;  %v4568_v42 = vld [vmem:[#allocation2 + $0xa4] ss:$16 sps:$4 sm:$0xff]   ;;  %v4572_v46 = vld [vmem:[#allocation2 + $0xe8] ss:$16 sps:$4 sm:$0xff]   ;;  %v4575_v49 = vld [vmem:[#allocation2 + $0xa0] ss:$16 sps:$4 sm:$0xff]   ;;  %622 = vmatprep.subr.bf16.mxu1 %v4570_v45 }
  0xf0   :  { %583 = vmatprep.subr.bf16.mxu0 %v4562_v23  ;;  %v4579_v50 = vld [vmem:[#allocation2 + $0x84] ss:$16 sps:$4 sm:$0xff]   ;;  %623 = vmatpush1.bf16.msra.mxu1 %v4572_v46  ;;  %v4582_v53 = vld [vmem:[#allocation2 + $0xcc] ss:$16 sps:$4 sm:$0xff]   ;;  %v4584_v54 = vld [vmem:[#allocation2 + $0xc8] ss:$16 sps:$4 sm:$0xff]  }
  0xf1   :  { %624 = vmatprep.subr.bf16.mxu1 %v4582_v53  ;;  %v4588_v57 = vld [vmem:[#allocation2 + $0x80] ss:$16 sps:$4 sm:$0xff]   ;;  %v4590_v58 = vld [vmem:[#allocation2 + $0x64] ss:$16 sps:$4 sm:$0xff]   ;;  %v4592_v61 = vld [vmem:[#allocation2 + $0xac] ss:$16 sps:$4 sm:$0xff]  }
  0xf2   :  { %v4596_v62 = vld [vmem:[#allocation2 + $0xa8] ss:$16 sps:$4 sm:$0xff]   ;;  %v4599_v2 = vld [vmem:[#allocation2 + $0x8c] ss:$16 sps:$4 sm:$0xff]   ;;  %v4602_v3 = vld [vmem:[#allocation2 + $0x60] ss:$16 sps:$4 sm:$0xff]  }
  0xf3   :  { %584 = vmatpush1.bf16.msra.mxu0 %v4565_v24  ;;  %v4605_v6 = vld [vmem:[#allocation2 + $0x44] ss:$16 sps:$4 sm:$0xff]   ;;  %v4608_v7 = vld [vmem:[#allocation2 + $0x88] ss:$16 sps:$4 sm:$0xff]   ;;  %v4611_v10 = vld [vmem:[#allocation2 + $0x6c] ss:$16 sps:$4 sm:$0xff]  }
  0xf4   :  { %585 = vmatprep.subr.bf16.mxu0 %v4568_v42  ;;  %625 = vmatpush1.bf16.msra.mxu1 %v4584_v54  ;;  %v4614_v11 = vld [vmem:[#allocation2 + $0x40] ss:$16 sps:$4 sm:$0xff]   ;;  %v4616_v14 = vld [vmem:[#allocation2 + $0x24] ss:$16 sps:$4 sm:$0xff]   ;;  %v4620_v15 = vld [vmem:[#allocation2 + $0x68] ss:$16 sps:$4 sm:$0xff]  }
  0xf5   :  { %626 = vmatprep.subr.bf16.mxu1 %v4592_v61  ;;  %v4623_v26 = vld [vmem:[#allocation2 + $0x4c] ss:$16 sps:$4 sm:$0xff]   ;;  %v4626_v29 = vld [vmem:[#allocation2 + $0x20] ss:$16 sps:$4 sm:$0xff]   ;;  %v4629_v34 = vld [vmem:[#allocation2 + $0x4] ss:$16 sps:$4 sm:$0xff]  }
  0xf6   :  { %v4632_v37 = vld [vmem:[#allocation2 + $0x48] ss:$16 sps:$4 sm:$0xff]   ;;  %v4635_v1 = vld [vmem:[#allocation2 + $0x2c] ss:$16 sps:$4 sm:$0xff]   ;;  %v4637_v41 = vld [vmem:[#allocation2] ss:$16 sps:$4 sm:$0xff]  }
  0xf7   :  { %586 = vmatpush1.bf16.msra.mxu0 %v4575_v49  ;;  %v4640_v33 = vld [vmem:[#allocation2 + $0x28] ss:$16 sps:$4 sm:$0xff]   ;;  %v4642_v38 = vld [vmem:[#allocation2 + $0xc] ss:$16 sps:$4 sm:$0xff]   ;;  %v4644_v30 = vld [vmem:[#allocation4 + $0xe4] ss:$16 sps:$4 sm:$0xff]  }
  0xf8   :  { %587 = vmatprep.subr.bf16.mxu0 %v4579_v50  ;;  %627 = vmatpush1.bf16.msra.mxu1 %v4596_v62  ;;  %v4649_v25 = vld [vmem:[#allocation4 + $0xe0] ss:$16 sps:$4 sm:$0xff]   ;;  %v4651_v13 = vld [vmem:[#allocation2 + $0x8] ss:$16 sps:$4 sm:$0xff]   ;;  %v4653_v20 = vld [vmem:[#allocation4 + $0xc4] ss:$16 sps:$4 sm:$0xff]  }
  0xf9   :  { %628 = vmatprep.subr.bf16.mxu1 %v4599_v2  ;;  %v4656_v12 = vld [vmem:[#allocation4 + $0xec] ss:$16 sps:$4 sm:$0xff]   ;;  %v4661_v9 = vld [vmem:[#allocation4 + $0xc0] ss:$16 sps:$4 sm:$0xff]   ;;  %v6430_v5 = vmov 0   ;;  %vm4357_vm1 = vmmov 0  }
  0xfa   :  { %v4664_v8 = vld [vmem:[#allocation4 + $0xe8] ss:$16 sps:$4 sm:$0xff]   ;;  %v4666_v4 = vld [vmem:[#allocation4 + $0xa4] ss:$16 sps:$4 sm:$0xff]   ;;  %v4669_v0 = vld [vmem:[#allocation4 + $0xcc] ss:$16 sps:$4 sm:$0xff]  }
  0xfb   :  { %588 = vmatpush1.bf16.msra.mxu0 %v4588_v57  ;;  %v4675_v60 = vld [vmem:[#allocation4 + $0xa0] ss:$16 sps:$4 sm:$0xff]   ;;  %v4677_v63 = vld [vmem:[#allocation4 + $0xc8] ss:$16 sps:$4 sm:$0xff]   ;;  %v4687_v59 = vld [vmem:[#allocation4 + $0x84] ss:$16 sps:$4 sm:$0xff]  }
  0xfc   :  { %589 = vmatprep.subr.bf16.mxu0 %v4590_v58  ;;  %629 = vmatpush1.bf16.msra.mxu1 %v4608_v7  ;;  %v4689_v56 = vld [vmem:[#allocation4 + $0xac] ss:$16 sps:$4 sm:$0xff]   ;;  %v4691_v52 = vld [vmem:[#allocation4 + $0x80] ss:$16 sps:$4 sm:$0xff]   ;;  %v4693_v55 = vld [vmem:[#allocation4 + $0xa8] ss:$16 sps:$4 sm:$0xff]  }
  0xfd   :  { %630 = vmatprep.subr.bf16.mxu1 %v4611_v10  ;;  %6431 = vst [vmem:[#allocation49_spill] sm:$0xff] %v4691_v52  ;;  %v4699_v51 = vld [vmem:[#allocation4 + $0x64] ss:$16 sps:$4 sm:$0xff]   ;;  %v4701_v48 = vld [vmem:[#allocation4 + $0x8c] ss:$16 sps:$4 sm:$0xff]  }
  0xfe   :  { %6432 = vst [vmem:[#allocation50_spill] sm:$0xff] %v4699_v51  ;;  %6433 = vst [vmem:[#allocation51_spill] sm:$0xff] %v4701_v48  ;;  %v4703_v44 = vld [vmem:[#allocation4 + $0x60] ss:$16 sps:$4 sm:$0xff]   ;;  %v4705_v47 = vld [vmem:[#allocation4 + $0x88] ss:$16 sps:$4 sm:$0xff]  }
  0xff   :  { %590 = vmatpush1.bf16.msra.mxu0 %v4602_v3  ;;  %6434 = vst [vmem:[#allocation52_spill] sm:$0xff] %v4703_v44  ;;  %6435 = vst [vmem:[#allocation53_spill] sm:$0xff] %v4705_v47  ;;  %v4711_v43 = vld [vmem:[#allocation4 + $0x44] ss:$16 sps:$4 sm:$0xff]   ;;  %v4713_v40 = vld [vmem:[#allocation4 + $0x6c] ss:$16 sps:$4 sm:$0xff]  }
 0x100   :  { %591 = vmatprep.subr.bf16.mxu0 %v4605_v6  ;;  %631 = vmatpush1.bf16.msra.mxu1 %v4620_v15  ;;  %6436 = vst [vmem:[#allocation54_spill] sm:$0xff] %v4711_v43  ;;  %6437 = vst [vmem:[#allocation55_spill] sm:$0xff] %v4713_v40  ;;  %v4715_v36 = vld [vmem:[#allocation4 + $0x40] ss:$16 sps:$4 sm:$0xff]   ;;  %v4717_v39 = vld [vmem:[#allocation4 + $0x68] ss:$16 sps:$4 sm:$0xff]  }
 0x101   :  { %632 = vmatprep.subr.bf16.mxu1 %v4623_v26  ;;  %6438 = vst [vmem:[#allocation56_spill] sm:$0xff] %v4715_v36  ;;  %6439 = vst [vmem:[#allocation57_spill] sm:$0xff] %v4717_v39  ;;  %v4723_v35 = vld [vmem:[#allocation4 + $0x24] ss:$16 sps:$4 sm:$0xff]   ;;  %v4725_v19 = vld [vmem:[#allocation4 + $0x4c] ss:$16 sps:$4 sm:$0xff]  }
 0x102   :  { %6440 = vst [vmem:[#allocation58_spill] sm:$0xff] %v4723_v35  ;;  %6441 = vst [vmem:[#allocation59_spill] sm:$0xff] %v4725_v19  ;;  %v4727_v17 = vld [vmem:[#allocation4 + $0x20] ss:$16 sps:$4 sm:$0xff]   ;;  %v4729_v18 = vld [vmem:[#allocation4 + $0x48] ss:$16 sps:$4 sm:$0xff]  }
 0x103   :  { %592 = vmatpush1.bf16.msra.mxu0 %v4614_v11  ;;  %6442 = vst [vmem:[#allocation60_spill] sm:$0xff] %v4727_v17  ;;  %6443 = vst [vmem:[#allocation61_spill] sm:$0xff] %v4729_v18  ;;  %v4735_v16 = vld [vmem:[#allocation4 + $0x4] ss:$16 sps:$4 sm:$0xff]  }
 0x104   :  { %593 = vmatprep.subr.bf16.mxu0 %v4616_v14  ;;  %633 = vmatpush1.bf16.msra.mxu1 %v4632_v37  ;;  %6444 = vst [vmem:[#allocation62_spill] sm:$0xff] %v4735_v16 }
 0x105   :  { %634 = vmatprep.subr.bf16.mxu1 %v4635_v1 }
 0x107   :  { %594 = vmatpush1.bf16.msra.mxu0 %v4626_v29 }
 0x108   :  { %595 = vmatprep.subr.bf16.mxu0 %v4629_v34  ;;  %635 = vmatpush1.bf16.msra.mxu1 %v4640_v33 }
 0x109   :  { %636 = vmatprep.subr.bf16.mxu1 %v4642_v38 }
 0x10b   :  { %596 = vmatpush1.bf16.msra.mxu0 %v4637_v41 }
 0x10c   :  { %852 = vmatprep.subr.bf16.mxu0 %v4644_v30  ;;  %637 = vmatpush1.bf16.msra.mxu1 %v4651_v13 }
 0x10d   :  { %893 = vmatprep.subr.bf16.mxu1 %v4656_v12 }
 0x10e   :  { %614 = vmatmul.mubr.bf16.vlgmr.msra.gmra.mxu0 %v6430_v5 }
 0x10f   :  { %853 = vmatpush1.bf16.msra.mxu0 %v4649_v25  ;;  %884 = vmatprep.mubr.bf16.mxu0 %v6430_v5 }
 0x110   :  { %854 = vmatprep.subr.bf16.mxu0 %v4653_v20  ;;  %655 = vmatmul.mubr.bf16.vlgmr.msra.gmra.mxu1 %v6430_v5 }
 0x111   :  { %894 = vmatpush1.bf16.msra.mxu1 %v4664_v8  ;;  %925 = vmatprep.mubr.bf16.mxu1 %v6430_v5 }
 0x112   :  { %895 = vmatprep.subr.bf16.mxu1 %v4669_v0 }
 0x113   :  { %855 = vmatpush1.bf16.msra.mxu0 %v4661_v9 }
 0x114   :  { %856 = vmatprep.subr.bf16.mxu0 %v4666_v4 }
 0x115   :  { %896 = vmatpush1.bf16.msra.mxu1 %v4677_v63 }
 0x116   :  { %897 = vmatprep.subr.bf16.mxu1 %v4689_v56 }
 0x117   :  { %857 = vmatpush1.bf16.msra.mxu0 %v4675_v60 }
 0x118   :  { %858 = vmatprep.subr.bf16.mxu0 %v4687_v59 }
 0x119   :  { %898 = vmatpush1.bf16.msra.mxu1 %v4693_v55 }
 0x11a   :  { %899 = vmatprep.subr.bf16.mxu1 %v4701_v48 }
 0x11b   :  { %859 = vmatpush1.bf16.msra.mxu0 %v4691_v52 }
 0x11c   :  { %860 = vmatprep.subr.bf16.mxu0 %v4699_v51 }
 0x11d   :  { %900 = vmatpush1.bf16.msra.mxu1 %v4705_v47 }
 0x11e   :  { %901 = vmatprep.subr.bf16.mxu1 %v4713_v40  ;;  %v4829_v40 = vld [vmem:[#allocation3 + $0x2c] ss:$16 sps:$4 sm:$0xff]  }
 0x11f   :  { %861 = vmatpush1.bf16.msra.mxu0 %v4703_v44  ;;  %v4813_v44 = vld [vmem:[#allocation3 + $0x44] ss:$16 sps:$4 sm:$0xff]   ;;  %6475 = vst [vmem:[#allocation93_spill] sm:$0xff] %v4829_v40 }
 0x120   :  { %862 = vmatprep.subr.bf16.mxu0 %v4711_v43  ;;  %v4739_v43 = vld [vmem:[#allocation4] ss:$16 sps:$4 sm:$0xff]   ;;  %6470 = vst [vmem:[#allocation88_spill] sm:$0xff] %v4813_v44 }
 0x121   :  { %902 = vmatpush1.bf16.msra.mxu1 %v4717_v39  ;;  %6446 = vst [vmem:[#allocation64_spill] sm:$0xff] %v4739_v43  ;;  %v4741_v39 = vld [vmem:[#allocation4 + $0x28] ss:$16 sps:$4 sm:$0xff]  }
 0x122   :  { %903 = vmatprep.subr.bf16.mxu1 %v4725_v19  ;;  %6447 = vst [vmem:[#allocation65_spill] sm:$0xff] %v4741_v39  ;;  %v4775_v19 = vld [vmem:[#allocation3 + $0xc8] ss:$16 sps:$4 sm:$0xff]  }
 0x123   :  { %863 = vmatpush1.bf16.msra.mxu0 %v4715_v36  ;;  %v4737_v36 = vld [vmem:[#allocation4 + $0x2c] ss:$16 sps:$4 sm:$0xff]   ;;  %6457 = vst [vmem:[#allocation75_spill] sm:$0xff] %v4775_v19 }
 0x124   :  { %864 = vmatprep.subr.bf16.mxu0 %v4723_v35  ;;  %6445 = vst [vmem:[#allocation63_spill] sm:$0xff] %v4737_v36  ;;  %v4747_v35 = vld [vmem:[#allocation4 + $0xc] ss:$16 sps:$4 sm:$0xff]  }
 0x125   :  { %904 = vmatpush1.bf16.msra.mxu1 %v4729_v18  ;;  %6448 = vst [vmem:[#allocation66_spill] sm:$0xff] %v4747_v35  ;;  %v4755_v18 = vld [vmem:[#allocation3 + $0xe4] ss:$16 sps:$4 sm:$0xff]  }
 0x126   :  { %905 = vmatprep.subr.bf16.mxu1 %v4737_v36  ;;  %6450 = vst [vmem:[#allocation68_spill] sm:$0xff] %v4755_v18  ;;  %v4759_v36 = vld [vmem:[#allocation3 + $0xe0] ss:$16 sps:$4 sm:$0xff]  }
 0x127   :  { %865 = vmatpush1.bf16.msra.mxu0 %v4727_v17  ;;  %v4749_v17 = vld [vmem:[#allocation4 + $0x8] ss:$16 sps:$4 sm:$0xff]   ;;  %6452 = vst [vmem:[#allocation70_spill] sm:$0xff] %v4759_v36 }
 0x128   :  { %866 = vmatprep.subr.bf16.mxu0 %v4735_v16  ;;  %6449 = vst [vmem:[#allocation67_spill] sm:$0xff] %v4749_v17  ;;  %v4757_v16 = vld [vmem:[#allocation3 + $0xec] ss:$16 sps:$4 sm:$0xff]  }
 0x129   :  { %906 = vmatpush1.bf16.msra.mxu1 %v4741_v39  ;;  %6451 = vst [vmem:[#allocation69_spill] sm:$0xff] %v4757_v16  ;;  %v4773_v39 = vld [vmem:[#allocation3 + $0xc0] ss:$16 sps:$4 sm:$0xff]  }
 0x12a   :  { %907 = vmatprep.subr.bf16.mxu1 %v4747_v35  ;;  %v4770_v35 = vld [vmem:[#allocation3 + $0xcc] ss:$16 sps:$4 sm:$0xff]   ;;  %6456 = vst [vmem:[#allocation74_spill] sm:$0xff] %v4773_v39 }
 0x12b   :  { %867 = vmatpush1.bf16.msra.mxu0 %v4739_v43  ;;  %v4761_v43 = vld [vmem:[#allocation3 + $0xe8] ss:$16 sps:$4 sm:$0xff]   ;;  %6455 = vst [vmem:[#allocation73_spill] sm:$0xff] %v4770_v35 }
 0x12c   :  { %6453 = vst [vmem:[#allocation71_spill] sm:$0xff] %v4761_v43  ;;  %1094 = vmatprep.subr.bf16.mxu0 %v4755_v18  ;;  %v4787_v18 = vld [vmem:[#allocation3 + $0xa8] ss:$16 sps:$4 sm:$0xff]  }
 0x12d   :  { %908 = vmatpush1.bf16.msra.mxu1 %v4749_v17  ;;  %v4768_v17 = vld [vmem:[#allocation3 + $0xc4] ss:$16 sps:$4 sm:$0xff]   ;;  %6461 = vst [vmem:[#allocation79_spill] sm:$0xff] %v4787_v18 }
 0x12e   :  { %885 = vmatmul.mubr.bf16.vlgmr.msra.gmra.mxu0 %v6430_v5  ;;  %1135 = vmatprep.subr.bf16.mxu1 %v4757_v16  ;;  %6454 = vst [vmem:[#allocation72_spill] sm:$0xff] %v4768_v17  ;;  %v4785_v16 = vld [vmem:[#allocation3 + $0xa0] ss:$16 sps:$4 sm:$0xff]  }
 0x12f   :  { %1126 = vmatprep.mubr.bf16.mxu0 %v6430_v5  ;;  %1095 = vmatpush1.bf16.msra.mxu0 %v4759_v36  ;;  %v4781_v36 = vld [vmem:[#allocation3 + $0xa4] ss:$16 sps:$4 sm:$0xff]   ;;  %6460 = vst [vmem:[#allocation78_spill] sm:$0xff] %v4785_v16 }
 0x130   :  { %926 = vmatmul.mubr.bf16.vlgmr.msra.gmra.mxu1 %v6430_v5  ;;  %1096 = vmatprep.subr.bf16.mxu0 %v4768_v17  ;;  %6458 = vst [vmem:[#allocation76_spill] sm:$0xff] %v4781_v36  ;;  %v4799_v17 = vld [vmem:[#allocation3 + $0x88] ss:$16 sps:$4 sm:$0xff]  }
 0x131   :  { %1136 = vmatpush1.bf16.msra.mxu1 %v4761_v43  ;;  %1167 = vmatprep.mubr.bf16.mxu1 %v6430_v5  ;;  %v4783_v43 = vld [vmem:[#allocation3 + $0xac] ss:$16 sps:$4 sm:$0xff]   ;;  %6465 = vst [vmem:[#allocation83_spill] sm:$0xff] %v4799_v17 }
 0x132   :  { %1137 = vmatprep.subr.bf16.mxu1 %v4770_v35  ;;  %6459 = vst [vmem:[#allocation77_spill] sm:$0xff] %v4783_v43  ;;  %v4793_v35 = vld [vmem:[#allocation3 + $0x84] ss:$16 sps:$4 sm:$0xff]  }
 0x133   :  { %1097 = vmatpush1.bf16.msra.mxu0 %v4773_v39  ;;  %6462 = vst [vmem:[#allocation80_spill] sm:$0xff] %v4793_v35  ;;  %v4795_v39 = vld [vmem:[#allocation3 + $0x8c] ss:$16 sps:$4 sm:$0xff]  }
 0x134   :  { %1098 = vmatprep.subr.bf16.mxu0 %v4781_v36  ;;  %6463 = vst [vmem:[#allocation81_spill] sm:$0xff] %v4795_v39  ;;  %v4811_v36 = vld [vmem:[#allocation3 + $0x68] ss:$16 sps:$4 sm:$0xff]  }
 0x135   :  { %1138 = vmatpush1.bf16.msra.mxu1 %v4775_v19  ;;  %v4797_v19 = vld [vmem:[#allocation3 + $0x80] ss:$16 sps:$4 sm:$0xff]   ;;  %6469 = vst [vmem:[#allocation87_spill] sm:$0xff] %v4811_v36 }
 0x136   :  { %1139 = vmatprep.subr.bf16.mxu1 %v4783_v43  ;;  %6464 = vst [vmem:[#allocation82_spill] sm:$0xff] %v4797_v19  ;;  %v4805_v43 = vld [vmem:[#allocation3 + $0x64] ss:$16 sps:$4 sm:$0xff]  }
 0x137   :  { %1099 = vmatpush1.bf16.msra.mxu0 %v4785_v16  ;;  %6466 = vst [vmem:[#allocation84_spill] sm:$0xff] %v4805_v43  ;;  %v4807_v16 = vld [vmem:[#allocation3 + $0x6c] ss:$16 sps:$4 sm:$0xff]  }
 0x138   :  { %1100 = vmatprep.subr.bf16.mxu0 %v4793_v35  ;;  %6467 = vst [vmem:[#allocation85_spill] sm:$0xff] %v4807_v16  ;;  %v4817_v35 = vld [vmem:[#allocation3 + $0x4c] ss:$16 sps:$4 sm:$0xff]  }
 0x139   :  { %1140 = vmatpush1.bf16.msra.mxu1 %v4787_v18  ;;  %v4809_v18 = vld [vmem:[#allocation3 + $0x60] ss:$16 sps:$4 sm:$0xff]   ;;  %6471 = vst [vmem:[#allocation89_spill] sm:$0xff] %v4817_v35 }
 0x13a   :  { %1141 = vmatprep.subr.bf16.mxu1 %v4795_v39  ;;  %6468 = vst [vmem:[#allocation86_spill] sm:$0xff] %v4809_v18  ;;  %v4826_v39 = vld [vmem:[#allocation3 + $0x24] ss:$16 sps:$4 sm:$0xff]  }
 0x13b   :  { %1101 = vmatpush1.bf16.msra.mxu0 %v4797_v19  ;;  %v4820_v19 = vld [vmem:[#allocation3 + $0x40] ss:$16 sps:$4 sm:$0xff]   ;;  %6474 = vst [vmem:[#allocation92_spill] sm:$0xff] %v4826_v39 }
 0x13c   :  { %1102 = vmatprep.subr.bf16.mxu0 %v4805_v43  ;;  %6472 = vst [vmem:[#allocation90_spill] sm:$0xff] %v4820_v19 }
 0x13d   :  { %1142 = vmatpush1.bf16.msra.mxu1 %v4799_v17  ;;  %v4824_v17 = vld [vmem:[#allocation3 + $0x48] ss:$16 sps:$4 sm:$0xff]  }
 0x13e   :  { %1143 = vmatprep.subr.bf16.mxu1 %v4807_v16  ;;  %6473 = vst [vmem:[#allocation91_spill] sm:$0xff] %v4824_v17  ;;  %v4832_v16 = vld [vmem:[#allocation3 + $0x20] ss:$16 sps:$4 sm:$0xff]  }
 0x13f   :  { %1103 = vmatpush1.bf16.msra.mxu0 %v4809_v18  ;;  %6476 = vst [vmem:[#allocation94_spill] sm:$0xff] %v4832_v16  ;;  %v4836_v18 = vld [vmem:[#allocation3 + $0x28] ss:$16 sps:$4 sm:$0xff]  }
 0x140   :  { %1104 = vmatprep.subr.bf16.mxu0 %v4813_v44  ;;  %6477 = vst [vmem:[#allocation95_spill] sm:$0xff] %v4836_v18  ;;  %v4841_v44 = vld [vmem:[#allocation3 + $0xc] ss:$16 sps:$4 sm:$0xff]  }
 0x141   :  { %1144 = vmatpush1.bf16.msra.mxu1 %v4811_v36  ;;  %v4838_v36 = vld [vmem:[#allocation3 + $0x4] ss:$16 sps:$4 sm:$0xff]   ;;  %6479 = vst [vmem:[#allocation97_spill] sm:$0xff] %v4841_v44 }
 0x142   :  { %1145 = vmatprep.subr.bf16.mxu1 %v4817_v35  ;;  %6478 = vst [vmem:[#allocation96_spill] sm:$0xff] %v4838_v36  ;;  %v4844_v35 = vld [vmem:[#allocation3] ss:$16 sps:$4 sm:$0xff]  }
 0x143   :  { %1105 = vmatpush1.bf16.msra.mxu0 %v4820_v19  ;;  %6480 = vst [vmem:[#allocation98_spill] sm:$0xff] %v4844_v35  ;;  %v4848_v19 = vld [vmem:[#allocation3 + $0x8] ss:$16 sps:$4 sm:$0xff]  }
 0x144   :  { %1106 = vmatprep.subr.bf16.mxu0 %v4826_v39  ;;  %6481 = vst [vmem:[#allocation99_spill] sm:$0xff] %v4848_v19 }
 0x145   :  { %1146 = vmatpush1.bf16.msra.mxu1 %v4824_v17 }
 0x146   :  { %1147 = vmatprep.subr.bf16.mxu1 %v4829_v40 }
 0x147   :  { %1107 = vmatpush1.bf16.msra.mxu0 %v4832_v16 }
 0x148   :  { %1108 = vmatprep.subr.bf16.mxu0 %v4838_v36 }
 0x149   :  { %1148 = vmatpush1.bf16.msra.mxu1 %v4836_v18 }
 0x14a   :  { %1149 = vmatprep.subr.bf16.mxu1 %v4841_v44 }
 0x14b   :  { %1109 = vmatpush1.bf16.msra.mxu0 %v4844_v35 }
 0x14c   :  { %1204 = vmatprep.subr.bf16.mxu0 %v4557_v21 }
 0x14d   :  { %1150 = vmatpush1.bf16.msra.mxu1 %v4848_v19 }
 0x14e   :  { %1245 = vmatprep.subr.bf16.mxu1 %v4570_v45 }
 0x1ce   :  { %v615_v40 = vpop.f32.mrf.mxu0 }
 0x1cf   :  { %v663_v16 = vadd.f32 %v615_v40, %v4475_v27 }
 0x1d0   :  { %v617_v39 = vpop.f32.mrf.mxu0  ;;  %v656_v51 = vpop.f32.mrf.mxu1 }
 0x1d1   :  { %v3517_v17 = vmul.f32 -1.442695, %v663_v16  ;;  %v664_v18 = vadd.f32 %v617_v39, %v4480_v31  ;;  %v665_v19 = vadd.f32 %v656_v51, %v4477_v28 }
 0x1d2   :  { %v619_v36 = vpop.f32.mrf.mxu0  ;;  %v658_v35 = vpop.f32.mrf.mxu1 }
 0x1d3   :  { %3838 = vpow2.f32 %v3517_v17  ;;  %v3518_v43 = vmul.f32 -1.442695, %v664_v18  ;;  %v3519_v52 = vmul.f32 -1.442695, %v665_v19  ;;  %v666_v45 = vadd.f32 %v658_v35, %v4483_v32 }
 0x1d4   :  { %v620_v44 = vpop.f32.mrf.mxu0  ;;  %v660_v47 = vpop.f32.mrf.mxu1 }
 0x1d5   :  { %3840 = vpow2.f32 %v3518_v43 }
 0x1d6   :  { %v661_v21 = vpop.f32.mrf.mxu1  ;;  %3842 = vpow2.f32 %v3519_v52 }
 0x1d7   :  { %3844 = vtanh.f32 %v666_v45  ;;  %v6493_v21 = vld [vmem:[#allocation58_spill] sm:$0xff]  ;;  %v6494_v45 = vld [vmem:[#allocation63_spill] sm:$0xff] }
 0x1e0   :  { %v3839_v48 = vpop.eup %3838 }
 0x1e1   :  { %v676_v27 = vadd.f32 1.0, %v3839_v48 }
 0x1e2   :  { %v3841_v16 = vpop.eup %3840 }
 0x1e3   :  { %3846 = vrcp.f32 %v676_v27  ;;  %v677_v31 = vadd.f32 1.0, %v3841_v16  ;;  %v3843_v17 = vpop.eup %3842  ;;  %v6495_v27 = vld [vmem:[#allocation60_spill] sm:$0xff]  ;;  %v6496_v16 = vld [vmem:[#allocation65_spill] sm:$0xff] }
 0x1e4   :  { %v3845_v18 = vpop.eup %3844  ;;  %v678_v40 = vadd.f32 1.0, %v3843_v17  ;;  %v6498_v17 = vld [vmem:[#allocation66_spill] sm:$0xff] }
 0x1e5   :  { %3848 = vrcp.f32 %v677_v31  ;;  %v6497_v31 = vld [vmem:[#allocation62_spill] sm:$0xff] }
 0x1e6   :  { %3850 = vrcp.f32 %v678_v40  ;;  %v6502_v40 = vld [vmem:[#allocation69_spill] sm:$0xff] }
 0x1ee   :  { %v886_v48 = vpop.f32.mrf.mxu0 }
 0x1f0   :  { %v3847_v36 = vpop.eup %3846  ;;  %v888_v51 = vpop.f32.mrf.mxu0 }
 0x1f1   :  { %v687_v44 = vmul.f32 %v3847_v36, %v3845_v18  ;;  %v6499_v18 = vld [vmem:[#allocation64_spill] sm:$0xff]  ;;  %v6500_v36 = vld [vmem:[#allocation67_spill] sm:$0xff] }
 0x1f2   :  { %v3849_v39 = vpop.eup %3848  ;;  %v890_v52 = vpop.f32.mrf.mxu0 }
 0x1f3   :  { %v686_v43 = vmul.f32 0.0, %v3849_v39  ;;  %v3851_v19 = vpop.eup %3850  ;;  %v6501_v39 = vld [vmem:[#allocation68_spill] sm:$0xff] }
 0x1f5   :  { %v4859_v28 = vadd.f32 %v687_v44, %v686_v43 }
 0x1f7   :  { %3852 = vtanh.f32 %v4859_v28 }
 0x204   :  { %v3853_v32 = vpop.eup %3852 }
 0x205   :  { %v690_v35 = vmul.f32 %v3853_v32, %v3851_v19 }
 0x207   :  { %v691_v47 = vpack.c.bf16 %v690_v35, %v690_v35 }
 0x209   :  { %1127 = vmatmul.mubr.bf16.vlgmr.msra.gmra.mxu0 %v691_v47  ;;  %1168 = vmatmul.mubr.bf16.vlgmr.msra.gmra.mxu1 %v691_v47 }
 0x20a   :  { %1205 = vmatpush1.bf16.msra.mxu0 %v4559_v22  ;;  %1246 = vmatpush1.bf16.msra.mxu1 %v4572_v46  ;;  %v927_v22 = vpop.f32.mrf.mxu1 }
 0x20b   :  { %1206 = vmatprep.subr.bf16.mxu0 %v4562_v23  ;;  %1247 = vmatprep.subr.bf16.mxu1 %v4582_v53  ;;  %v891_v23 = vpop.f32.mrf.mxu0  ;;  %v6484_v53 = vld [vmem:[#allocation53_spill] sm:$0xff] }
 0x20c   :  { %1236 = vmatprep.mubr.bf16.mxu0 %v6430_v5  ;;  %1277 = vmatprep.mubr.bf16.mxu1 %v6430_v5 }
 0x20e   :  { %1207 = vmatpush1.bf16.msra.mxu0 %v4565_v24  ;;  %1248 = vmatpush1.bf16.msra.mxu1 %v4584_v54  ;;  %v929_v24 = vpop.f32.mrf.mxu1  ;;  %v6485_v54 = vld [vmem:[#allocation50_spill] sm:$0xff] }
 0x20f   :  { %1208 = vmatprep.subr.bf16.mxu0 %v4568_v42  ;;  %1249 = vmatprep.subr.bf16.mxu1 %v4592_v61  ;;  %v6488_v61 = vld [vmem:[#allocation57_spill] sm:$0xff] }
 0x210   :  { %v931_v42 = vpop.f32.mrf.mxu1 }
 0x212   :  { %1209 = vmatpush1.bf16.msra.mxu0 %v4575_v49  ;;  %1250 = vmatpush1.bf16.msra.mxu1 %v4596_v62  ;;  %v932_v46 = vpop.f32.mrf.mxu1  ;;  %v6482_v49 = vld [vmem:[#allocation51_spill] sm:$0xff]  ;;  %v6489_v62 = vld [vmem:[#allocation54_spill] sm:$0xff] }
 0x213   :  { %1210 = vmatprep.subr.bf16.mxu0 %v4579_v50  ;;  %1251 = vmatprep.subr.bf16.mxu1 %v4599_v2  ;;  %v6483_v50 = vld [vmem:[#allocation49_spill] sm:$0xff]  ;;  %v6490_v2 = vld [vmem:[#allocation59_spill] sm:$0xff] }
 0x216   :  { %1211 = vmatpush1.bf16.msra.mxu0 %v4588_v57  ;;  %1252 = vmatpush1.bf16.msra.mxu1 %v4608_v7  ;;  %v6486_v57 = vld [vmem:[#allocation55_spill] sm:$0xff] }
 0x217   :  { %1212 = vmatprep.subr.bf16.mxu0 %v4590_v58  ;;  %1253 = vmatprep.subr.bf16.mxu1 %v4611_v10  ;;  %v6487_v58 = vld [vmem:[#allocation52_spill] sm:$0xff] }
 0x21a   :  { %1213 = vmatpush1.bf16.msra.mxu0 %v4602_v3  ;;  %1254 = vmatpush1.bf16.msra.mxu1 %v4620_v15  ;;  %v6491_v3 = vld [vmem:[#allocation56_spill] sm:$0xff] }
 0x21b   :  { %1214 = vmatprep.subr.bf16.mxu0 %v4605_v6  ;;  %1255 = vmatprep.subr.bf16.mxu1 %v4623_v26  ;;  %v6492_v6 = vld [vmem:[#allocation61_spill] sm:$0xff] }
 0x21e   :  { %1215 = vmatpush1.bf16.msra.mxu0 %v4614_v11  ;;  %1256 = vmatpush1.bf16.msra.mxu1 %v4632_v37 }
 0x21f   :  { %1216 = vmatprep.subr.bf16.mxu0 %v4616_v14  ;;  %1257 = vmatprep.subr.bf16.mxu1 %v4635_v1 }
 0x222   :  { %1217 = vmatpush1.bf16.msra.mxu0 %v4626_v29  ;;  %1258 = vmatpush1.bf16.msra.mxu1 %v4640_v33 }
 0x223   :  { %1218 = vmatprep.subr.bf16.mxu0 %v4629_v34  ;;  %1259 = vmatprep.subr.bf16.mxu1 %v4642_v38 }
 0x226   :  { %1219 = vmatpush1.bf16.msra.mxu0 %v4637_v41  ;;  %1260 = vmatpush1.bf16.msra.mxu1 %v4651_v13 }
 0x227   :  { %1316 = vmatprep.subr.bf16.mxu0 %v4644_v30  ;;  %1357 = vmatprep.subr.bf16.mxu1 %v4656_v12 }
 0x229   :  { %1237 = vmatmul.mubr.bf16.vlgmr.msra.gmra.mxu0 %v691_v47  ;;  %1278 = vmatmul.mubr.bf16.vlgmr.msra.gmra.mxu1 %v691_v47  ;;  %v6503_v47 = vld [vmem:[#allocation17_spill] sm:$0xff] }
 0x22a   :  { %1317 = vmatpush1.bf16.msra.mxu0 %v4649_v25  ;;  %1358 = vmatpush1.bf16.msra.mxu1 %v4664_v8 }
 0x22b   :  { %1318 = vmatprep.subr.bf16.mxu0 %v4653_v20  ;;  %1359 = vmatprep.subr.bf16.mxu1 %v4669_v0 }
 0x22c   :  { %1348 = vmatprep.mubr.bf16.mxu0 %v6430_v5  ;;  %1389 = vmatprep.mubr.bf16.mxu1 %v6430_v5 }
 0x22e   :  { %1319 = vmatpush1.bf16.msra.mxu0 %v4661_v9  ;;  %1360 = vmatpush1.bf16.msra.mxu1 %v4677_v63 }
 0x22f   :  { %1320 = vmatprep.subr.bf16.mxu0 %v4666_v4  ;;  %1361 = vmatprep.subr.bf16.mxu1 %v4689_v56 }
 0x232   :  { %1321 = vmatpush1.bf16.msra.mxu0 %v4675_v60  ;;  %1362 = vmatpush1.bf16.msra.mxu1 %v4693_v55 }
 0x233   :  { %1322 = vmatprep.subr.bf16.mxu0 %v4687_v59  ;;  %1363 = vmatprep.subr.bf16.mxu1 %v6482_v49 }
 0x236   :  { %1323 = vmatpush1.bf16.msra.mxu0 %v6483_v50  ;;  %1364 = vmatpush1.bf16.msra.mxu1 %v6484_v53 }
 0x237   :  { %1324 = vmatprep.subr.bf16.mxu0 %v6485_v54  ;;  %1365 = vmatprep.subr.bf16.mxu1 %v6486_v57 }
 0x23a   :  { %1325 = vmatpush1.bf16.msra.mxu0 %v6487_v58  ;;  %1366 = vmatpush1.bf16.msra.mxu1 %v6488_v61 }
 0x23b   :  { %1326 = vmatprep.subr.bf16.mxu0 %v6489_v62  ;;  %1367 = vmatprep.subr.bf16.mxu1 %v6490_v2 }
 0x23e   :  { %1327 = vmatpush1.bf16.msra.mxu0 %v6491_v3  ;;  %1368 = vmatpush1.bf16.msra.mxu1 %v6492_v6  ;;  %v6506_v6 = vld [vmem:[#allocation20_spill] sm:$0xff] }
 0x23f   :  { %1328 = vmatprep.subr.bf16.mxu0 %v6493_v21  ;;  %1369 = vmatprep.subr.bf16.mxu1 %v6494_v45 }
 0x242   :  { %1329 = vmatpush1.bf16.msra.mxu0 %v6495_v27  ;;  %1370 = vmatpush1.bf16.msra.mxu1 %v6496_v16 }
 0x243   :  { %1330 = vmatprep.subr.bf16.mxu0 %v6497_v31  ;;  %1371 = vmatprep.subr.bf16.mxu1 %v6498_v17  ;;  %v6504_v17 = vld [vmem:[#allocation19_spill] sm:$0xff] }
 0x246   :  { %1331 = vmatpush1.bf16.msra.mxu0 %v6499_v18  ;;  %1372 = vmatpush1.bf16.msra.mxu1 %v6500_v36 }
 0x247   :  { %1398 = vmatprep.subr.bf16.mxu0 %v6501_v39  ;;  %1439 = vmatprep.subr.bf16.mxu1 %v6502_v40  ;;  %v6505_v40 = vld [vmem:[#allocation18_spill] sm:$0xff] }
 0x2c9   :  { %v1128_v43 = vpop.f32.mrf.mxu0  ;;  %v1169_v44 = vpop.f32.mrf.mxu1 }
 0x2ca   :  { %v1129_v19 = vadd.f32 %v1128_v43, %v886_v48  ;;  %v1170_v39 = vadd.f32 %v1169_v44, %v927_v22 }
 0x2cb   :  { %v1130_v32 = vpop.f32.mrf.mxu0  ;;  %v1171_v35 = vpop.f32.mrf.mxu1 }
 0x2cc   :  { %v1176_v52 = vadd.f32 %v1129_v19, %v6503_v47  ;;  %v1131_v23 = vadd.f32 %v1130_v32, %v888_v51  ;;  %v1178_v45 = vadd.f32 %v1170_v39, %v6505_v40  ;;  %v1172_v21 = vadd.f32 %v1171_v35, %v929_v24  ;;  %v6508_v24 = vld [vmem:[#allocation23_spill] sm:$0xff] }
 0x2cd   :  { %v1132_v42 = vpop.f32.mrf.mxu0  ;;  %v1173_v46 = vpop.f32.mrf.mxu1 }
 0x2ce   :  { %v3584_v31 = vmul.f32 -1.442695, %v1176_v52  ;;  %v1177_v16 = vadd.f32 %v1131_v23, %v6504_v17  ;;  %v3586_v48 = vmul.f32 -1.442695, %v1178_v45  ;;  %v1179_v3 = vadd.f32 %v1172_v21, %v6506_v6 }
 0x2cf   :  { %v1133_v18 = vpop.f32.mrf.mxu0  ;;  %v1174_v27 = vpop.f32.mrf.mxu1 }
 0x2d0   :  { %3854 = vpow2.f32 %v3584_v31  ;;  %v3585_v36 = vmul.f32 -1.442695, %v1177_v16  ;;  %v6507_v31 = vld [vmem:[#allocation21_spill] sm:$0xff] }
 0x2d2   :  { %3856 = vpow2.f32 %v3585_v36 }
 0x2d3   :  { %3858 = vpow2.f32 %v3586_v48 }
 0x2dd   :  { %v3855_v43 = vpop.eup %3854 }
 0x2de   :  { %v1189_v19 = vadd.f32 1.0, %v3855_v43 }
 0x2df   :  { %v3857_v51 = vpop.eup %3856 }
 0x2e0   :  { %3860 = vrcp.f32 %v1189_v19  ;;  %v1190_v32 = vadd.f32 1.0, %v3857_v51  ;;  %v3859_v44 = vpop.eup %3858 }
 0x2e1   :  { %3862 = vtanh.f32 %v1179_v3  ;;  %v1191_v48 = vadd.f32 1.0, %v3859_v44 }
 0x2e2   :  { %3864 = vrcp.f32 %v1190_v32 }
 0x2e9   :  { %v1238_v18 = vpop.f32.mrf.mxu0  ;;  %v1279_v27 = vpop.f32.mrf.mxu1 }
 0x2ea   :  { %v1286_v16 = vadd.f32 %v1238_v18, %v6507_v31  ;;  %v6509_v18 = vld [vmem:[#allocation22_spill] sm:$0xff] }
 0x2eb   :  { %v1240_v36 = vpop.f32.mrf.mxu0  ;;  %v1281_v22 = vpop.f32.mrf.mxu1  ;;  %v1288_v31 = vadd.f32 %v1279_v27, %v6509_v18  ;;  %v6512_v27 = vld [vmem:[#allocation71_spill] sm:$0xff] }
 0x2ec   :  { %v3587_v39 = vmul.f32 -1.442695, %v1286_v16  ;;  %v1287_v45 = vadd.f32 %v1240_v36, %v6508_v24  ;;  %v6510_v24 = vld [vmem:[#allocation24_spill] sm:$0xff] }
 0x2ed   :  { %v3861_v35 = vpop.eup %3860  ;;  %v1242_v52 = vpop.f32.mrf.mxu0  ;;  %v3589_v16 = vmul.f32 -1.442695, %v1288_v31  ;;  %v6517_v31 = vld [vmem:[#allocation76_spill] sm:$0xff] }
 0x2ee   :  { %v1283_v21 = vpop.f32.mrf.mxu1  ;;  %v3863_v23 = vpop.eup %3862  ;;  %3866 = vpow2.f32 %v3587_v39  ;;  %v3588_v42 = vmul.f32 -1.442695, %v1287_v45  ;;  %v1289_v52 = vadd.f32 %v1281_v22, %v6510_v24  ;;  %v6514_v22 = vld [vmem:[#allocation73_spill] sm:$0xff] }
 0x2ef   :  { %v3865_v46 = vpop.eup %3864  ;;  %v1243_v3 = vpop.f32.mrf.mxu0  ;;  %v1200_v51 = vmul.f32 %v3863_v23, %v3861_v35 }
 0x2f0   :  { %v1284_v43 = vpop.f32.mrf.mxu1  ;;  %v1199_v19 = vmul.f32 0.0, %v3865_v46  ;;  %3868 = vpow2.f32 %v3588_v42  ;;  %v6511_v46 = vld [vmem:[#allocation70_spill] sm:$0xff] }
 0x2f1   :  { %3870 = vrcp.f32 %v1191_v48  ;;  %v6513_v48 = vld [vmem:[#allocation72_spill] sm:$0xff] }
 0x2f2   :  { %v4936_v32 = vadd.f32 %v1200_v51, %v1199_v19  ;;  %v6515_v19 = vld [vmem:[#allocation74_spill] sm:$0xff]  ;;  %v6516_v51 = vld [vmem:[#allocation75_spill] sm:$0xff] }
 0x2f4   :  { %3872 = vtanh.f32 %v4936_v32 }
 0x2f5   :  { %3874 = vpow2.f32 %v3589_v16  ;;  %v6518_v16 = vld [vmem:[#allocation77_spill] sm:$0xff] }
 0x2fb   :  { %v3867_v36 = vpop.eup %3866 }
 0x2fc   :  { %v1299_v39 = vadd.f32 1.0, %v3867_v36 }
 0x2fd   :  { %v3869_v45 = vpop.eup %3868 }
 0x2fe   :  { %3876 = vrcp.f32 %v1299_v39  ;;  %v1300_v44 = vadd.f32 1.0, %v3869_v45  ;;  %v3871_v21 = vpop.eup %3870  ;;  %v6519_v45 = vld [vmem:[#allocation78_spill] sm:$0xff] }
 0x2ff   :  { %3878 = vtanh.f32 %v1289_v52 }
 0x300   :  { %3880 = vrcp.f32 %v1300_v44  ;;  %v6520_v44 = vld [vmem:[#allocation79_spill] sm:$0xff] }
 0x301   :  { %v3873_v35 = vpop.eup %3872 }
 0x302   :  { %v1203_v23 = vmul.f32 %v3873_v35, %v3871_v21  ;;  %v3875_v3 = vpop.eup %3874  ;;  %v6521_v35 = vld [vmem:[#allocation80_spill] sm:$0xff] }
 0x303   :  { %v1301_v24 = vadd.f32 1.0, %v3875_v3  ;;  %v6525_v3 = vld [vmem:[#allocation84_spill] sm:$0xff] }
 0x304   :  { %v1315_v42 = vpack.c.bf16 %v1203_v23, %v1203_v23  ;;  %v6522_v23 = vld [vmem:[#allocation81_spill] sm:$0xff] }
 0x305   :  { %3882 = vrcp.f32 %v1301_v24  ;;  %v6532_v24 = vld [vmem:[#allocation91_spill] sm:$0xff] }
 0x306   :  { %1349 = vmatmul.mubr.bf16.vlgmr.msra.gmra.mxu0 %v1315_v42  ;;  %1390 = vmatmul.mubr.bf16.vlgmr.msra.gmra.mxu1 %v1315_v42  ;;  %v6523_v42 = vld [vmem:[#allocation82_spill] sm:$0xff] }
 0x307   :  { %1399 = vmatpush1.bf16.msra.mxu0 %v6511_v46  ;;  %1440 = vmatpush1.bf16.msra.mxu1 %v6512_v27 }
 0x308   :  { %1400 = vmatprep.subr.bf16.mxu0 %v6513_v48  ;;  %1441 = vmatprep.subr.bf16.mxu1 %v6514_v22 }
 0x309   :  { %1430 = vmatprep.mubr.bf16.mxu0 %v6430_v5  ;;  %1471 = vmatprep.mubr.bf16.mxu1 %v6430_v5 }
 0x30b   :  { %v3877_v43 = vpop.eup %3876  ;;  %1401 = vmatpush1.bf16.msra.mxu0 %v6515_v19  ;;  %1442 = vmatpush1.bf16.msra.mxu1 %v6516_v51 }
 0x30c   :  { %v3879_v18 = vpop.eup %3878  ;;  %1402 = vmatprep.subr.bf16.mxu0 %v6517_v31  ;;  %1443 = vmatprep.subr.bf16.mxu1 %v6518_v16  ;;  %v6524_v16 = vld [vmem:[#allocation83_spill] sm:$0xff] }
 0x30d   :  { %v3881_v36 = vpop.eup %3880  ;;  %v1310_v39 = vmul.f32 %v3879_v18, %v3877_v43  ;;  %v6527_v43 = vld [vmem:[#allocation86_spill] sm:$0xff]  ;;  %v6528_v18 = vld [vmem:[#allocation87_spill] sm:$0xff] }
 0x30e   :  { %v1309_v52 = vmul.f32 %v3881_v36, %v4859_v28  ;;  %v6526_v28 = vld [vmem:[#allocation85_spill] sm:$0xff]  ;;  %v6529_v36 = vld [vmem:[#allocation88_spill] sm:$0xff] }
 0x30f   :  { %1403 = vmatpush1.bf16.msra.mxu0 %v6519_v45  ;;  %1444 = vmatpush1.bf16.msra.mxu1 %v6520_v44  ;;  %v4977_v44 = vld [vmem:[#allocation2 + $0xe4] ss:$16 sps:$4 sm:$0xff]  }
 0x310   :  { %v4954_v21 = vadd.f32 %v1310_v39, %v1309_v52  ;;  %1404 = vmatprep.subr.bf16.mxu0 %v6521_v35  ;;  %1445 = vmatprep.subr.bf16.mxu1 %v6522_v23  ;;  %v6530_v52 = vld [vmem:[#allocation89_spill] sm:$0xff]  ;;  %v6531_v39 = vld [vmem:[#allocation90_spill] sm:$0xff]  ;;  %v6533_v23 = vld [vmem:[#allocation92_spill] sm:$0xff]  ;;  %6541 = vst [vmem:[#allocation51_spill] sm:$0xff] %v4977_v44 }
 0x311   :  { %v6535_v35 = vld [vmem:[#allocation94_spill] sm:$0xff] }
 0x312   :  { %3884 = vtanh.f32 %v4954_v21 }
 0x313   :  { %1405 = vmatpush1.bf16.msra.mxu0 %v6523_v42  ;;  %1446 = vmatpush1.bf16.msra.mxu1 %v6524_v16  ;;  %v6534_v42 = vld [vmem:[#allocation93_spill] sm:$0xff]  ;;  %v3883_v16 = vpop.eup %3882 }
 0x314   :  { %1406 = vmatprep.subr.bf16.mxu0 %v6525_v3  ;;  %1447 = vmatprep.subr.bf16.mxu1 %v6526_v28  ;;  %v6536_v28 = vld [vmem:[#allocation95_spill] sm:$0xff] }
 0x317   :  { %1407 = vmatpush1.bf16.msra.mxu0 %v6527_v43  ;;  %1448 = vmatpush1.bf16.msra.mxu1 %v6528_v18  ;;  %v6537_v43 = vld [vmem:[#allocation96_spill] sm:$0xff]  ;;  %v6538_v18 = vld [vmem:[#allocation97_spill] sm:$0xff] }
 0x318   :  { %1408 = vmatprep.subr.bf16.mxu0 %v6529_v36  ;;  %1449 = vmatprep.subr.bf16.mxu1 %v6530_v52  ;;  %v6539_v52 = vld [vmem:[#allocation98_spill] sm:$0xff] }
 0x31b   :  { %1409 = vmatpush1.bf16.msra.mxu0 %v6531_v39  ;;  %1450 = vmatpush1.bf16.msra.mxu1 %v6532_v24  ;;  %v6540_v39 = vld [vmem:[#allocation99_spill] sm:$0xff] }
 0x31c   :  { %1410 = vmatprep.subr.bf16.mxu0 %v6533_v23  ;;  %1451 = vmatprep.subr.bf16.mxu1 %v6534_v42  ;;  %v4980_v42 = vld [vmem:[#allocation2 + $0xec] ss:$16 sps:$4 sm:$0xff]  }
 0x31d   :  { %6542 = vst [vmem:[#allocation49_spill] sm:$0xff] %v4980_v42 }
 0x31f   :  { %v3885_v3 = vpop.eup %3884  ;;  %1411 = vmatpush1.bf16.msra.mxu0 %v6535_v35  ;;  %1452 = vmatpush1.bf16.msra.mxu1 %v6536_v28  ;;  %v4983_v28 = vld [vmem:[#allocation2 + $0xe0] ss:$16 sps:$4 sm:$0xff]  }
 0x320   :  { %1412 = vmatprep.subr.bf16.mxu0 %v6537_v43  ;;  %1453 = vmatprep.subr.bf16.mxu1 %v6538_v18  ;;  %v1313_v36 = vmul.f32 %v3885_v3, %v3883_v16  ;;  %6543 = vst [vmem:[#allocation53_spill] sm:$0xff] %v4983_v28  ;;  %v4986_v16 = vld [vmem:[#allocation2 + $0xe8] ss:$16 sps:$4 sm:$0xff]   ;;  %v4989_v3 = vld [vmem:[#allocation2 + $0xc4] ss:$16 sps:$4 sm:$0xff]  }
 0x321   :  { %6544 = vst [vmem:[#allocation50_spill] sm:$0xff] %v4986_v16  ;;  %6545 = vst [vmem:[#allocation55_spill] sm:$0xff] %v4989_v3 }
 0x322   :  { %v1314_v24 = vpack.c.bf16 %v1313_v36, %v1313_v36  ;;  %v4992_v36 = vld [vmem:[#allocation2 + $0xcc] ss:$16 sps:$4 sm:$0xff]  }
 0x323   :  { %1413 = vmatpush1.bf16.msra.mxu0 %v6539_v52  ;;  %1454 = vmatpush1.bf16.msra.mxu1 %v6540_v39  ;;  %6546 = vst [vmem:[#allocation52_spill] sm:$0xff] %v4992_v36 }
 0x324   :  { %1508 = vmatprep.subr.bf16.mxu0 %v4977_v44  ;;  %1549 = vmatprep.subr.bf16.mxu1 %v4980_v42  ;;  %v4997_v42 = vld [vmem:[#allocation2 + $0xc0] ss:$16 sps:$4 sm:$0xff]   ;;  %v5012_v44 = vld [vmem:[#allocation2 + $0xa8] ss:$16 sps:$4 sm:$0xff]  }
 0x325   :  { %6547 = vst [vmem:[#allocation57_spill] sm:$0xff] %v4997_v42  ;;  %6551 = vst [vmem:[#allocation19_spill] sm:$0xff] %v5012_v44 }
 0x326   :  { %1431 = vmatmul.mubr.bf16.vlgmr.msra.gmra.mxu0 %v1314_v24  ;;  %1472 = vmatmul.mubr.bf16.vlgmr.msra.gmra.mxu1 %v1314_v24 }
 0x327   :  { %1509 = vmatpush1.bf16.msra.mxu0 %v4983_v28  ;;  %1550 = vmatpush1.bf16.msra.mxu1 %v4986_v16  ;;  %v5000_v28 = vld [vmem:[#allocation2 + $0xc8] ss:$16 sps:$4 sm:$0xff]   ;;  %v5003_v16 = vld [vmem:[#allocation2 + $0xa4] ss:$16 sps:$4 sm:$0xff]  }
 0x328   :  { %1510 = vmatprep.subr.bf16.mxu0 %v4989_v3  ;;  %1551 = vmatprep.subr.bf16.mxu1 %v4992_v36  ;;  %6548 = vst [vmem:[#allocation54_spill] sm:$0xff] %v5000_v28  ;;  %6549 = vst [vmem:[#allocation59_spill] sm:$0xff] %v5003_v16  ;;  %v5006_v3 = vld [vmem:[#allocation2 + $0xac] ss:$16 sps:$4 sm:$0xff]   ;;  %v5009_v36 = vld [vmem:[#allocation2 + $0xa0] ss:$16 sps:$4 sm:$0xff]  }
 0x329   :  { %1540 = vmatprep.mubr.bf16.mxu0 %v6430_v5  ;;  %1581 = vmatprep.mubr.bf16.mxu1 %v6430_v5  ;;  %6550 = vst [vmem:[#allocation17_spill] sm:$0xff] %v5006_v3 }
 0x32b   :  { %1511 = vmatpush1.bf16.msra.mxu0 %v4997_v42  ;;  %1552 = vmatpush1.bf16.msra.mxu1 %v5000_v28  ;;  %v5015_v42 = vld [vmem:[#allocation2 + $0x84] ss:$16 sps:$4 sm:$0xff]   ;;  %v5018_v28 = vld [vmem:[#allocation2 + $0x8c] ss:$16 sps:$4 sm:$0xff]  }
 0x32c   :  { %1512 = vmatprep.subr.bf16.mxu0 %v5003_v16  ;;  %1553 = vmatprep.subr.bf16.mxu1 %v5006_v3  ;;  %6552 = vst [vmem:[#allocation18_spill] sm:$0xff] %v5015_v42  ;;  %v5021_v16 = vld [vmem:[#allocation2 + $0x80] ss:$16 sps:$4 sm:$0xff]   ;;  %v5025_v3 = vld [vmem:[#allocation2 + $0x64] ss:$16 sps:$4 sm:$0xff]  }
 0x32f   :  { %1513 = vmatpush1.bf16.msra.mxu0 %v5009_v36  ;;  %1554 = vmatpush1.bf16.msra.mxu1 %v5012_v44  ;;  %v5029_v44 = vld [vmem:[#allocation2 + $0x60] ss:$16 sps:$4 sm:$0xff]  }
 0x330   :  { %1514 = vmatprep.subr.bf16.mxu0 %v5015_v42  ;;  %1555 = vmatprep.subr.bf16.mxu1 %v5018_v28  ;;  %v5033_v42 = vld [vmem:[#allocation2 + $0x44] ss:$16 sps:$4 sm:$0xff]  }
 0x333   :  { %1515 = vmatpush1.bf16.msra.mxu0 %v5021_v16  ;;  %1556 = vmatpush1.bf16.msra.mxu1 %v4608_v7 }
 0x334   :  { %1516 = vmatprep.subr.bf16.mxu0 %v5025_v3  ;;  %1557 = vmatprep.subr.bf16.mxu1 %v4611_v10 }
 0x337   :  { %1517 = vmatpush1.bf16.msra.mxu0 %v5029_v44  ;;  %1558 = vmatpush1.bf16.msra.mxu1 %v4620_v15 }
 0x338   :  { %1518 = vmatprep.subr.bf16.mxu0 %v5033_v42  ;;  %1559 = vmatprep.subr.bf16.mxu1 %v4623_v26 }
 0x33b   :  { %1519 = vmatpush1.bf16.msra.mxu0 %v4614_v11  ;;  %1560 = vmatpush1.bf16.msra.mxu1 %v4632_v37 }
 0x33c   :  { %1520 = vmatprep.subr.bf16.mxu0 %v4616_v14  ;;  %1561 = vmatprep.subr.bf16.mxu1 %v4635_v1  ;;  %v6553_v1 = vld [vmem:[#allocation56_spill] sm:$0xff] }
 0x33f   :  { %1521 = vmatpush1.bf16.msra.mxu0 %v4626_v29  ;;  %1562 = vmatpush1.bf16.msra.mxu1 %v4640_v33 }
 0x340   :  { %1522 = vmatprep.subr.bf16.mxu0 %v4629_v34  ;;  %1563 = vmatprep.subr.bf16.mxu1 %v4642_v38 }
 0x343   :  { %1523 = vmatpush1.bf16.msra.mxu0 %v4637_v41  ;;  %1564 = vmatpush1.bf16.msra.mxu1 %v4651_v13  ;;  %v6564_v13 = vld [vmem:[#allocation69_spill] sm:$0xff] }
 0x344   :  { %1620 = vmatprep.subr.bf16.mxu0 %v4644_v30  ;;  %1661 = vmatprep.subr.bf16.mxu1 %v4656_v12  ;;  %v6563_v12 = vld [vmem:[#allocation68_spill] sm:$0xff] }
 0x346   :  { %1541 = vmatmul.mubr.bf16.vlgmr.msra.gmra.mxu0 %v1314_v24  ;;  %1582 = vmatmul.mubr.bf16.vlgmr.msra.gmra.mxu1 %v1314_v24 }
 0x347   :  { %1621 = vmatpush1.bf16.msra.mxu0 %v4649_v25  ;;  %1662 = vmatpush1.bf16.msra.mxu1 %v4664_v8  ;;  %v6561_v8 = vld [vmem:[#allocation64_spill] sm:$0xff] }
 0x348   :  { %1622 = vmatprep.subr.bf16.mxu0 %v4653_v20  ;;  %1663 = vmatprep.subr.bf16.mxu1 %v4669_v0  ;;  %v6559_v0 = vld [vmem:[#allocation62_spill] sm:$0xff] }
 0x349   :  { %1652 = vmatprep.mubr.bf16.mxu0 %v6430_v5  ;;  %1693 = vmatprep.mubr.bf16.mxu1 %v6430_v5 }
 0x34b   :  { %1623 = vmatpush1.bf16.msra.mxu0 %v4661_v9  ;;  %1664 = vmatpush1.bf16.msra.mxu1 %v4677_v63  ;;  %v6558_v63 = vld [vmem:[#allocation65_spill] sm:$0xff]  ;;  %v6562_v9 = vld [vmem:[#allocation67_spill] sm:$0xff] }
 0x34c   :  { %1624 = vmatprep.subr.bf16.mxu0 %v4666_v4  ;;  %1665 = vmatprep.subr.bf16.mxu1 %v4689_v56  ;;  %v6555_v56 = vld [vmem:[#allocation58_spill] sm:$0xff] }
 0x34d   :  { %v6560_v4 = vld [vmem:[#allocation66_spill] sm:$0xff] }
 0x34f   :  { %1625 = vmatpush1.bf16.msra.mxu0 %v4675_v60  ;;  %1666 = vmatpush1.bf16.msra.mxu1 %v4693_v55  ;;  %v6554_v55 = vld [vmem:[#allocation61_spill] sm:$0xff]  ;;  %v6557_v60 = vld [vmem:[#allocation60_spill] sm:$0xff] }
 0x350   :  { %1626 = vmatprep.subr.bf16.mxu0 %v4687_v59  ;;  %1667 = vmatprep.subr.bf16.mxu1 %v6482_v49  ;;  %v6556_v59 = vld [vmem:[#allocation63_spill] sm:$0xff] }
 0x353   :  { %1627 = vmatpush1.bf16.msra.mxu0 %v6483_v50  ;;  %1668 = vmatpush1.bf16.msra.mxu1 %v6484_v53 }
 0x354   :  { %1628 = vmatprep.subr.bf16.mxu0 %v6485_v54  ;;  %1669 = vmatprep.subr.bf16.mxu1 %v6486_v57 }
 0x357   :  { %1629 = vmatpush1.bf16.msra.mxu0 %v6487_v58  ;;  %1670 = vmatpush1.bf16.msra.mxu1 %v6488_v61 }
 0x358   :  { %1630 = vmatprep.subr.bf16.mxu0 %v6489_v62  ;;  %1671 = vmatprep.subr.bf16.mxu1 %v6490_v2 }
 0x35b   :  { %1631 = vmatpush1.bf16.msra.mxu0 %v6553_v1  ;;  %1672 = vmatpush1.bf16.msra.mxu1 %v6554_v55 }
 0x35c   :  { %1632 = vmatprep.subr.bf16.mxu0 %v6555_v56  ;;  %1673 = vmatprep.subr.bf16.mxu1 %v6556_v59 }
 0x35f   :  { %1633 = vmatpush1.bf16.msra.mxu0 %v6557_v60  ;;  %1674 = vmatpush1.bf16.msra.mxu1 %v6558_v63 }
 0x360   :  { %1634 = vmatprep.subr.bf16.mxu0 %v6559_v0  ;;  %1675 = vmatprep.subr.bf16.mxu1 %v6560_v4 }
 0x363   :  { %1635 = vmatpush1.bf16.msra.mxu0 %v6561_v8  ;;  %1676 = vmatpush1.bf16.msra.mxu1 %v6562_v9  ;;  %v6565_v8 = vld [vmem:[#allocation25_spill] sm:$0xff] }
 0x364   :  { %1702 = vmatprep.subr.bf16.mxu0 %v6563_v12  ;;  %1743 = vmatprep.subr.bf16.mxu1 %v6564_v13 }
 0x3c6   :  { %v1350_v20 = vpop.f32.mrf.mxu0  ;;  %v1391_v25 = vpop.f32.mrf.mxu1 }
 0x3c8   :  { %v1352_v30 = vpop.f32.mrf.mxu0  ;;  %v1393_v33 = vpop.f32.mrf.mxu1 }
 0x3ca   :  { %v1354_v38 = vpop.f32.mrf.mxu0  ;;  %v1395_v41 = vpop.f32.mrf.mxu1 }
 0x3cc   :  { %v1355_v7 = vpop.f32.mrf.mxu0  ;;  %v1396_v10 = vpop.f32.mrf.mxu1 }
 0x3e6   :  { %v1432_v11 = vpop.f32.mrf.mxu0  ;;  %v1473_v14 = vpop.f32.mrf.mxu1 }
 0x3e7   :  { %v1433_v15 = vadd.f32 %v1432_v11, %v1350_v20  ;;  %v1474_v62 = vadd.f32 %v1473_v14, %v1391_v25 }
 0x3e8   :  { %v1434_v26 = vpop.f32.mrf.mxu0  ;;  %v1475_v29 = vpop.f32.mrf.mxu1 }
 0x3e9   :  { %v1480_v34 = vadd.f32 %v1433_v15, %v6503_v47  ;;  %v1435_v37 = vadd.f32 %v1434_v26, %v1352_v30  ;;  %v1482_v2 = vadd.f32 %v1474_v62, %v6505_v40  ;;  %v1476_v24 = vadd.f32 %v1475_v29, %v1393_v33  ;;  %v6566_v30 = vld [vmem:[#allocation27_spill] sm:$0xff] }
 0x3ea   :  { %v1436_v49 = vpop.f32.mrf.mxu0  ;;  %v1477_v50 = vpop.f32.mrf.mxu1 }
 0x3eb   :  { %v3590_v53 = vmul.f32 -1.442695, %v1480_v34  ;;  %v1481_v54 = vadd.f32 %v1435_v37, %v6504_v17  ;;  %v3592_v1 = vmul.f32 -1.442695, %v1482_v2  ;;  %v1483_v56 = vadd.f32 %v1476_v24, %v6506_v6  ;;  %v6567_v50 = vld [vmem:[#allocation26_spill] sm:$0xff] }
 0x3ec   :  { %v1437_v57 = vpop.f32.mrf.mxu0  ;;  %v1478_v58 = vpop.f32.mrf.mxu1 }
 0x3ed   :  { %3886 = vpow2.f32 %v3590_v53  ;;  %v3591_v61 = vmul.f32 -1.442695, %v1481_v54  ;;  %v6568_v58 = vld [vmem:[#allocation28_spill] sm:$0xff] }
 0x3ef   :  { %3888 = vpow2.f32 %v3591_v61 }
 0x3f0   :  { %3890 = vpow2.f32 %v3592_v1 }
 0x3fa   :  { %v3887_v55 = vpop.eup %3886 }
 0x3fb   :  { %v1493_v59 = vadd.f32 1.0, %v3887_v55 }
 0x3fc   :  { %v3889_v60 = vpop.eup %3888 }
 0x3fd   :  { %3892 = vrcp.f32 %v1493_v59  ;;  %v1494_v63 = vadd.f32 1.0, %v3889_v60  ;;  %v3891_v20 = vpop.eup %3890 }
 0x3fe   :  { %3894 = vtanh.f32 %v1483_v56  ;;  %v1495_v15 = vadd.f32 1.0, %v3891_v20  ;;  %v6579_v20 = vld [vmem:[#allocation88_spill] sm:$0xff] }
 0x3ff   :  { %3896 = vrcp.f32 %v1494_v63 }
 0x406   :  { %v1542_v0 = vpop.f32.mrf.mxu0  ;;  %v1583_v4 = vpop.f32.mrf.mxu1 }
 0x407   :  { %v1590_v9 = vadd.f32 %v1542_v0, %v6565_v8  ;;  %v1592_v53 = vadd.f32 %v1583_v4, %v6567_v50  ;;  %v6570_v4 = vld [vmem:[#allocation79_spill] sm:$0xff]  ;;  %v6596_v50 = vld [vmem:[#allocation18_spill] sm:$0xff] }
 0x408   :  { %v1544_v12 = vpop.f32.mrf.mxu0  ;;  %v1585_v13 = vpop.f32.mrf.mxu1 }
 0x409   :  { %v3593_v25 = vmul.f32 -1.442695, %v1590_v9  ;;  %v1591_v33 = vadd.f32 %v1544_v12, %v6566_v30  ;;  %v3595_v54 = vmul.f32 -1.442695, %v1592_v53  ;;  %v1593_v61 = vadd.f32 %v1585_v13, %v6568_v58  ;;  %v6571_v9 = vld [vmem:[#allocation80_spill] sm:$0xff]  ;;  %v6578_v13 = vld [vmem:[#allocation87_spill] sm:$0xff] }
 0x40a   :  { %v3893_v38 = vpop.eup %3892  ;;  %v1546_v41 = vpop.f32.mrf.mxu0  ;;  %v6575_v12 = vld [vmem:[#allocation84_spill] sm:$0xff]  ;;  %v6581_v30 = vld [vmem:[#allocation90_spill] sm:$0xff] }
 0x40b   :  { %v1587_v7 = vpop.f32.mrf.mxu1  ;;  %v3895_v10 = vpop.eup %3894  ;;  %3898 = vpow2.f32 %v3593_v25  ;;  %v3594_v11 = vmul.f32 -1.442695, %v1591_v33  ;;  %v6580_v25 = vld [vmem:[#allocation89_spill] sm:$0xff]  ;;  %v6582_v33 = vld [vmem:[#allocation91_spill] sm:$0xff]  ;;  %v5148_v53 = vld [vmem:[#allocation2 + $0x88] ss:$16 sps:$4 sm:$0xff]  }
 0x40c   :  { %v3897_v14 = vpop.eup %3896  ;;  %v1547_v26 = vpop.f32.mrf.mxu0  ;;  %v1504_v37 = vmul.f32 %v3895_v10, %v3893_v38  ;;  %v6583_v38 = vld [vmem:[#allocation93_spill] sm:$0xff]  ;;  %v6584_v10 = vld [vmem:[#allocation95_spill] sm:$0xff]  ;;  %v5160_v58 = vld [vmem:[#allocation2 + $0x4c] ss:$16 sps:$4 sm:$0xff]  }
 0x40d   :  { %v1588_v29 = vpop.f32.mrf.mxu1  ;;  %v1503_v34 = vmul.f32 %v3897_v14, %v4936_v32  ;;  %3900 = vpow2.f32 %v3594_v11  ;;  %v6587_v26 = vld [vmem:[#allocation53_spill] sm:$0xff] }
 0x40e   :  { %3902 = vrcp.f32 %v1495_v15  ;;  %v6585_v15 = vld [vmem:[#allocation51_spill] sm:$0xff] }
 0x40f   :  { %v5090_v49 = vadd.f32 %v1504_v37, %v1503_v34  ;;  %v6589_v29 = vld [vmem:[#allocation55_spill] sm:$0xff]  ;;  %v6594_v34 = vld [vmem:[#allocation17_spill] sm:$0xff] }
 0x410   :  { %v6595_v37 = vld [vmem:[#allocation19_spill] sm:$0xff] }
 0x411   :  { %3904 = vtanh.f32 %v5090_v49 }
 0x412   :  { %3906 = vpow2.f32 %v3595_v54  ;;  %v5152_v54 = vld [vmem:[#allocation2 + $0x6c] ss:$16 sps:$4 sm:$0xff]  }
 0x418   :  { %v3899_v57 = vpop.eup %3898 }
 0x419   :  { %v1603_v62 = vadd.f32 1.0, %v3899_v57  ;;  %v5156_v57 = vld [vmem:[#allocation2 + $0x68] ss:$16 sps:$4 sm:$0xff]  }
 0x41a   :  { %v3901_v2 = vpop.eup %3900 }
 0x41b   :  { %3908 = vrcp.f32 %v1603_v62  ;;  %v1604_v24 = vadd.f32 1.0, %v3901_v2  ;;  %v3903_v32 = vpop.eup %3902  ;;  %v5166_v62 = vld [vmem:[#allocation2 + $0x48] ss:$16 sps:$4 sm:$0xff]   ;;  %v5169_v2 = vld [vmem:[#allocation2 + $0x24] ss:$16 sps:$4 sm:$0xff]  }
 0x41c   :  { %3910 = vtanh.f32 %v1593_v61  ;;  %v5163_v61 = vld [vmem:[#allocation2 + $0x40] ss:$16 sps:$4 sm:$0xff]  }
 0x41d   :  { %3912 = vrcp.f32 %v1604_v24  ;;  %v5172_v24 = vld [vmem:[#allocation2 + $0x2c] ss:$16 sps:$4 sm:$0xff]  }
 0x41e   :  { %v3905_v1 = vpop.eup %3904 }
 0x41f   :  { %v1507_v55 = vmul.f32 %v3905_v1, %v3903_v32  ;;  %v3907_v59 = vpop.eup %3906  ;;  %v5175_v32 = vld [vmem:[#allocation2 + $0x20] ss:$16 sps:$4 sm:$0xff]   ;;  %v5178_v1 = vld [vmem:[#allocation2 + $0x28] ss:$16 sps:$4 sm:$0xff]  }
 0x420   :  { %v1605_v0 = vadd.f32 1.0, %v3907_v59  ;;  %v5187_v59 = vld [vmem:[#allocation2] ss:$16 sps:$4 sm:$0xff]  }
 0x421   :  { %v1619_v56 = vpack.c.bf16 %v1507_v55, %v1507_v55  ;;  %v5181_v55 = vld [vmem:[#allocation2 + $0x4] ss:$16 sps:$4 sm:$0xff]  }
 0x422   :  { %3914 = vrcp.f32 %v1605_v0  ;;  %v5202_v0 = vld [vmem:[#allocation4 + $0xe8] ss:$16 sps:$4 sm:$0xff]  }
 0x423   :  { %1653 = vmatmul.mubr.bf16.vlgmr.msra.gmra.mxu0 %v1619_v56  ;;  %1694 = vmatmul.mubr.bf16.vlgmr.msra.gmra.mxu1 %v1619_v56  ;;  %v5184_v56 = vld [vmem:[#allocation2 + $0xc] ss:$16 sps:$4 sm:$0xff]   ;;  %6597 = vst [vmem:[#allocation20_spill] sm:$0xff] %v5202_v0 }
 0x424   :  { %1703 = vmatpush1.bf16.msra.mxu0 %v6511_v46  ;;  %1744 = vmatpush1.bf16.msra.mxu1 %v6512_v27  ;;  %v6569_v46 = vld [vmem:[#allocation77_spill] sm:$0xff] }
 0x425   :  { %1704 = vmatprep.subr.bf16.mxu0 %v6513_v48  ;;  %1745 = vmatprep.subr.bf16.mxu1 %v6514_v22 }
 0x426   :  { %1734 = vmatprep.mubr.bf16.mxu0 %v6430_v5  ;;  %1775 = vmatprep.mubr.bf16.mxu1 %v6430_v5 }
 0x428   :  { %v3909_v60 = vpop.eup %3908  ;;  %1705 = vmatpush1.bf16.msra.mxu0 %v6515_v19  ;;  %1746 = vmatpush1.bf16.msra.mxu1 %v6516_v51  ;;  %v6572_v19 = vld [vmem:[#allocation81_spill] sm:$0xff]  ;;  %v6573_v51 = vld [vmem:[#allocation82_spill] sm:$0xff] }
 0x429   :  { %v3911_v63 = vpop.eup %3910  ;;  %1706 = vmatprep.subr.bf16.mxu0 %v6517_v31  ;;  %1747 = vmatprep.subr.bf16.mxu1 %v6569_v46  ;;  %v6574_v31 = vld [vmem:[#allocation83_spill] sm:$0xff]  ;;  %v5196_v46 = vld [vmem:[#allocation4 + $0xec] ss:$16 sps:$4 sm:$0xff]  }
 0x42a   :  { %v3913_v27 = vpop.eup %3912  ;;  %v1614_v22 = vmul.f32 %v3911_v63, %v3909_v60  ;;  %v5190_v60 = vld [vmem:[#allocation2 + $0x8] ss:$16 sps:$4 sm:$0xff]   ;;  %v5193_v63 = vld [vmem:[#allocation4 + $0xe4] ss:$16 sps:$4 sm:$0xff]  }
 0x42b   :  { %v1613_v48 = vmul.f32 %v3913_v27, %v4954_v21  ;;  %v6576_v21 = vld [vmem:[#allocation85_spill] sm:$0xff] }
 0x42c   :  { %1707 = vmatpush1.bf16.msra.mxu0 %v6519_v45  ;;  %1748 = vmatpush1.bf16.msra.mxu1 %v6570_v4  ;;  %v6577_v45 = vld [vmem:[#allocation86_spill] sm:$0xff]  ;;  %v5199_v27 = vld [vmem:[#allocation4 + $0xe0] ss:$16 sps:$4 sm:$0xff]  }
 0x42d   :  { %v5108_v8 = vadd.f32 %v1614_v22, %v1613_v48  ;;  %1708 = vmatprep.subr.bf16.mxu0 %v6571_v9  ;;  %1749 = vmatprep.subr.bf16.mxu1 %v6572_v19  ;;  %v5205_v48 = vld [vmem:[#allocation4 + $0xc4] ss:$16 sps:$4 sm:$0xff]   ;;  %v5208_v22 = vld [vmem:[#allocation4 + $0xcc] ss:$16 sps:$4 sm:$0xff]   ;;  %v5213_v4 = vld [vmem:[#allocation4 + $0xc0] ss:$16 sps:$4 sm:$0xff]  }
 0x42e   :  { %6598 = vst [vmem:[#allocation21_spill] sm:$0xff] %v5205_v48  ;;  %6599 = vst [vmem:[#allocation23_spill] sm:$0xff] %v5208_v22  ;;  %v5216_v9 = vld [vmem:[#allocation4 + $0xc8] ss:$16 sps:$4 sm:$0xff]   ;;  %v5219_v19 = vld [vmem:[#allocation4 + $0xa4] ss:$16 sps:$4 sm:$0xff]  }
 0x42f   :  { %3916 = vtanh.f32 %v5108_v8  ;;  %v3915_v41 = vpop.eup %3914  ;;  %6600 = vst [vmem:[#allocation22_spill] sm:$0xff] %v5213_v4  ;;  %6601 = vst [vmem:[#allocation24_spill] sm:$0xff] %v5216_v9 }
 0x430   :  { %1709 = vmatpush1.bf16.msra.mxu0 %v6573_v51  ;;  %1750 = vmatpush1.bf16.msra.mxu1 %v6574_v31  ;;  %6602 = vst [vmem:[#allocation70_spill] sm:$0xff] %v5219_v19  ;;  %v5222_v51 = vld [vmem:[#allocation4 + $0xac] ss:$16 sps:$4 sm:$0xff]   ;;  %v5225_v31 = vld [vmem:[#allocation4 + $0xa0] ss:$16 sps:$4 sm:$0xff]  }
 0x431   :  { %1710 = vmatprep.subr.bf16.mxu0 %v6575_v12  ;;  %1751 = vmatprep.subr.bf16.mxu1 %v6576_v21  ;;  %6603 = vst [vmem:[#allocation71_spill] sm:$0xff] %v5222_v51  ;;  %6604 = vst [vmem:[#allocation72_spill] sm:$0xff] %v5225_v31  ;;  %v5228_v12 = vld [vmem:[#allocation4 + $0xa8] ss:$16 sps:$4 sm:$0xff]   ;;  %v5231_v21 = vld [vmem:[#allocation4 + $0x84] ss:$16 sps:$4 sm:$0xff]  }
 0x432   :  { %6605 = vst [vmem:[#allocation73_spill] sm:$0xff] %v5228_v12  ;;  %6606 = vst [vmem:[#allocation74_spill] sm:$0xff] %v5231_v21 }
 0x434   :  { %1711 = vmatpush1.bf16.msra.mxu0 %v6577_v45  ;;  %1752 = vmatpush1.bf16.msra.mxu1 %v6578_v13  ;;  %v5234_v45 = vld [vmem:[#allocation4 + $0x8c] ss:$16 sps:$4 sm:$0xff]   ;;  %v5237_v13 = vld [vmem:[#allocation4 + $0x80] ss:$16 sps:$4 sm:$0xff]  }
 0x435   :  { %1712 = vmatprep.subr.bf16.mxu0 %v6579_v20  ;;  %1753 = vmatprep.subr.bf16.mxu1 %v6580_v25  ;;  %6607 = vst [vmem:[#allocation75_spill] sm:$0xff] %v5234_v45  ;;  %6608 = vst [vmem:[#allocation76_spill] sm:$0xff] %v5237_v13  ;;  %v5240_v20 = vld [vmem:[#allocation4 + $0x88] ss:$16 sps:$4 sm:$0xff]   ;;  %v5243_v25 = vld [vmem:[#allocation4 + $0x64] ss:$16 sps:$4 sm:$0xff]  }
 0x436   :  { %6609 = vst [vmem:[#allocation78_spill] sm:$0xff] %v5240_v20  ;;  %6610 = vst [vmem:[#allocation92_spill] sm:$0xff] %v5243_v25 }
 0x438   :  { %1713 = vmatpush1.bf16.msra.mxu0 %v6581_v30  ;;  %1754 = vmatpush1.bf16.msra.mxu1 %v6582_v33  ;;  %v5246_v30 = vld [vmem:[#allocation4 + $0x6c] ss:$16 sps:$4 sm:$0xff]   ;;  %v5249_v33 = vld [vmem:[#allocation4 + $0x60] ss:$16 sps:$4 sm:$0xff]  }
 0x439   :  { %1714 = vmatprep.subr.bf16.mxu0 %v6533_v23  ;;  %1755 = vmatprep.subr.bf16.mxu1 %v6583_v38  ;;  %v6586_v23 = vld [vmem:[#allocation49_spill] sm:$0xff]  ;;  %6611 = vst [vmem:[#allocation94_spill] sm:$0xff] %v5246_v30  ;;  %6612 = vst [vmem:[#allocation96_spill] sm:$0xff] %v5249_v33  ;;  %v5252_v38 = vld [vmem:[#allocation4 + $0x68] ss:$16 sps:$4 sm:$0xff]  }
 0x43a   :  { %6613 = vst [vmem:[#allocation97_spill] sm:$0xff] %v5252_v38 }
 0x43c   :  { %v3917_v7 = vpop.eup %3916  ;;  %1715 = vmatpush1.bf16.msra.mxu0 %v6535_v35  ;;  %1756 = vmatpush1.bf16.msra.mxu1 %v6584_v10  ;;  %v6588_v35 = vld [vmem:[#allocation50_spill] sm:$0xff]  ;;  %v5261_v10 = vld [vmem:[#allocation4 + $0x40] ss:$16 sps:$4 sm:$0xff]  }
 0x43d   :  { %1716 = vmatprep.subr.bf16.mxu0 %v6537_v43  ;;  %1757 = vmatprep.subr.bf16.mxu1 %v6538_v18  ;;  %v1617_v11 = vmul.f32 %v3917_v7, %v3915_v41  ;;  %v6590_v43 = vld [vmem:[#allocation52_spill] sm:$0xff]  ;;  %v6591_v18 = vld [vmem:[#allocation57_spill] sm:$0xff]  ;;  %6616 = vst [vmem:[#allocation56_spill] sm:$0xff] %v5261_v10 }
 0x43e   :  { %v5255_v41 = vld [vmem:[#allocation4 + $0x44] ss:$16 sps:$4 sm:$0xff]   ;;  %v5258_v7 = vld [vmem:[#allocation4 + $0x4c] ss:$16 sps:$4 sm:$0xff]  }
 0x43f   :  { %v1618_v14 = vpack.c.bf16 %v1617_v11, %v1617_v11  ;;  %6614 = vst [vmem:[#allocation98_spill] sm:$0xff] %v5255_v41  ;;  %6615 = vst [vmem:[#allocation99_spill] sm:$0xff] %v5258_v7  ;;  %v5264_v11 = vld [vmem:[#allocation4 + $0x48] ss:$16 sps:$4 sm:$0xff]  }
 0x440   :  { %1717 = vmatpush1.bf16.msra.mxu0 %v6539_v52  ;;  %1758 = vmatpush1.bf16.msra.mxu1 %v6540_v39  ;;  %v6592_v52 = vld [vmem:[#allocation54_spill] sm:$0xff]  ;;  %v6593_v39 = vld [vmem:[#allocation59_spill] sm:$0xff]  ;;  %6617 = vst [vmem:[#allocation61_spill] sm:$0xff] %v5264_v11 }
 0x441   :  { %1812 = vmatprep.subr.bf16.mxu0 %v6585_v15  ;;  %1853 = vmatprep.subr.bf16.mxu1 %v6586_v23 }
 0x443   :  { %1735 = vmatmul.mubr.bf16.vlgmr.msra.gmra.mxu0 %v1618_v14  ;;  %1776 = vmatmul.mubr.bf16.vlgmr.msra.gmra.mxu1 %v1618_v14 }
 0x444   :  { %1813 = vmatpush1.bf16.msra.mxu0 %v6587_v26  ;;  %1854 = vmatpush1.bf16.msra.mxu1 %v6588_v35 }
 0x445   :  { %1814 = vmatprep.subr.bf16.mxu0 %v6589_v29  ;;  %1855 = vmatprep.subr.bf16.mxu1 %v6590_v43 }
 0x446   :  { %1844 = vmatprep.mubr.bf16.mxu0 %v6430_v5  ;;  %1885 = vmatprep.mubr.bf16.mxu1 %v6430_v5 }
 0x448   :  { %1815 = vmatpush1.bf16.msra.mxu0 %v6591_v18  ;;  %1856 = vmatpush1.bf16.msra.mxu1 %v6592_v52 }
 0x449   :  { %1816 = vmatprep.subr.bf16.mxu0 %v6593_v39  ;;  %1857 = vmatprep.subr.bf16.mxu1 %v6594_v34 }
 0x44c   :  { %1817 = vmatpush1.bf16.msra.mxu0 %v5009_v36  ;;  %1858 = vmatpush1.bf16.msra.mxu1 %v6595_v37 }
 0x44d   :  { %1818 = vmatprep.subr.bf16.mxu0 %v6596_v50  ;;  %1859 = vmatprep.subr.bf16.mxu1 %v5018_v28 }
 0x450   :  { %1819 = vmatpush1.bf16.msra.mxu0 %v5021_v16  ;;  %1860 = vmatpush1.bf16.msra.mxu1 %v5148_v53 }
 0x451   :  { %1820 = vmatprep.subr.bf16.mxu0 %v5025_v3  ;;  %1861 = vmatprep.subr.bf16.mxu1 %v5152_v54 }
 0x454   :  { %1821 = vmatpush1.bf16.msra.mxu0 %v5029_v44  ;;  %1862 = vmatpush1.bf16.msra.mxu1 %v5156_v57 }
 0x455   :  { %1822 = vmatprep.subr.bf16.mxu0 %v5033_v42  ;;  %1863 = vmatprep.subr.bf16.mxu1 %v5160_v58 }
 0x458   :  { %1823 = vmatpush1.bf16.msra.mxu0 %v5163_v61  ;;  %1864 = vmatpush1.bf16.msra.mxu1 %v5166_v62 }
 0x459   :  { %1824 = vmatprep.subr.bf16.mxu0 %v5169_v2  ;;  %1865 = vmatprep.subr.bf16.mxu1 %v5172_v24 }
 0x45c   :  { %1825 = vmatpush1.bf16.msra.mxu0 %v5175_v32  ;;  %1866 = vmatpush1.bf16.msra.mxu1 %v5178_v1 }
 0x45d   :  { %1826 = vmatprep.subr.bf16.mxu0 %v5181_v55  ;;  %1867 = vmatprep.subr.bf16.mxu1 %v5184_v56 }
 0x460   :  { %1827 = vmatpush1.bf16.msra.mxu0 %v5187_v59  ;;  %1868 = vmatpush1.bf16.msra.mxu1 %v5190_v60 }
 0x461   :  { %1924 = vmatprep.subr.bf16.mxu0 %v5193_v63  ;;  %1965 = vmatprep.subr.bf16.mxu1 %v5196_v46 }
 0x463   :  { %1845 = vmatmul.mubr.bf16.vlgmr.msra.gmra.mxu0 %v1618_v14  ;;  %1886 = vmatmul.mubr.bf16.vlgmr.msra.gmra.mxu1 %v1618_v14  ;;  %v5267_v14 = vld [vmem:[#allocation4 + $0x24] ss:$16 sps:$4 sm:$0xff]  }
 0x464   :  { %1925 = vmatpush1.bf16.msra.mxu0 %v5199_v27  ;;  %1966 = vmatpush1.bf16.msra.mxu1 %v5202_v0  ;;  %6618 = vst [vmem:[#allocation58_spill] sm:$0xff] %v5267_v14 }
 0x465   :  { %1926 = vmatprep.subr.bf16.mxu0 %v5205_v48  ;;  %1967 = vmatprep.subr.bf16.mxu1 %v5208_v22 }
 0x466   :  { %1956 = vmatprep.mubr.bf16.mxu0 %v6430_v5  ;;  %1997 = vmatprep.mubr.bf16.mxu1 %v6430_v5 }
 0x468   :  { %1927 = vmatpush1.bf16.msra.mxu0 %v5213_v4  ;;  %1968 = vmatpush1.bf16.msra.mxu1 %v5216_v9 }
 0x469   :  { %1928 = vmatprep.subr.bf16.mxu0 %v5219_v19  ;;  %1969 = vmatprep.subr.bf16.mxu1 %v5222_v51 }
 0x46c   :  { %1929 = vmatpush1.bf16.msra.mxu0 %v5225_v31  ;;  %1970 = vmatpush1.bf16.msra.mxu1 %v5228_v12 }
 0x46d   :  { %1930 = vmatprep.subr.bf16.mxu0 %v5231_v21  ;;  %1971 = vmatprep.subr.bf16.mxu1 %v5234_v45 }
 0x470   :  { %1931 = vmatpush1.bf16.msra.mxu0 %v5237_v13  ;;  %1972 = vmatpush1.bf16.msra.mxu1 %v5240_v20 }
 0x471   :  { %1932 = vmatprep.subr.bf16.mxu0 %v5243_v25  ;;  %1973 = vmatprep.subr.bf16.mxu1 %v5246_v30 }
 0x474   :  { %1933 = vmatpush1.bf16.msra.mxu0 %v5249_v33  ;;  %1974 = vmatpush1.bf16.msra.mxu1 %v5252_v38  ;;  %v5270_v38 = vld [vmem:[#allocation4 + $0x2c] ss:$16 sps:$4 sm:$0xff]  }
 0x475   :  { %1934 = vmatprep.subr.bf16.mxu0 %v5255_v41  ;;  %1975 = vmatprep.subr.bf16.mxu1 %v5258_v7  ;;  %6619 = vst [vmem:[#allocation63_spill] sm:$0xff] %v5270_v38  ;;  %v5273_v41 = vld [vmem:[#allocation4 + $0x20] ss:$16 sps:$4 sm:$0xff]   ;;  %v5276_v7 = vld [vmem:[#allocation4 + $0x28] ss:$16 sps:$4 sm:$0xff]  }
 0x476   :  { %6620 = vst [vmem:[#allocation60_spill] sm:$0xff] %v5273_v41  ;;  %6621 = vst [vmem:[#allocation65_spill] sm:$0xff] %v5276_v7 }
 0x478   :  { %1935 = vmatpush1.bf16.msra.mxu0 %v5261_v10  ;;  %1976 = vmatpush1.bf16.msra.mxu1 %v5264_v11  ;;  %v5279_v10 = vld [vmem:[#allocation4 + $0x4] ss:$16 sps:$4 sm:$0xff]   ;;  %v5282_v11 = vld [vmem:[#allocation4 + $0xc] ss:$16 sps:$4 sm:$0xff]  }
 0x479   :  { %1936 = vmatprep.subr.bf16.mxu0 %v5267_v14  ;;  %1977 = vmatprep.subr.bf16.mxu1 %v5270_v38  ;;  %6622 = vst [vmem:[#allocation62_spill] sm:$0xff] %v5279_v10  ;;  %6623 = vst [vmem:[#allocation66_spill] sm:$0xff] %v5282_v11  ;;  %v5285_v14 = vld [vmem:[#allocation4] ss:$16 sps:$4 sm:$0xff]   ;;  %v5288_v38 = vld [vmem:[#allocation4 + $0x8] ss:$16 sps:$4 sm:$0xff]  }
 0x47a   :  { %6624 = vst [vmem:[#allocation64_spill] sm:$0xff] %v5285_v14  ;;  %6625 = vst [vmem:[#allocation67_spill] sm:$0xff] %v5288_v38 }
 0x47c   :  { %1937 = vmatpush1.bf16.msra.mxu0 %v5273_v41  ;;  %1978 = vmatpush1.bf16.msra.mxu1 %v5276_v7  ;;  %v5291_v41 = vld [vmem:[#allocation3 + $0xe4] ss:$16 sps:$4 sm:$0xff]   ;;  %v5294_v7 = vld [vmem:[#allocation3 + $0xec] ss:$16 sps:$4 sm:$0xff]  }
 0x47d   :  { %1938 = vmatprep.subr.bf16.mxu0 %v5279_v10  ;;  %1979 = vmatprep.subr.bf16.mxu1 %v5282_v11  ;;  %6626 = vst [vmem:[#allocation68_spill] sm:$0xff] %v5291_v41  ;;  %6627 = vst [vmem:[#allocation69_spill] sm:$0xff] %v5294_v7 }
 0x480   :  { %1939 = vmatpush1.bf16.msra.mxu0 %v5285_v14  ;;  %1980 = vmatpush1.bf16.msra.mxu1 %v5288_v38 }
 0x481   :  { %2006 = vmatprep.subr.bf16.mxu0 %v5291_v41  ;;  %2047 = vmatprep.subr.bf16.mxu1 %v5294_v7 }
 0x4e3   :  { %v1654_v10 = vpop.f32.mrf.mxu0  ;;  %v1695_v33 = vpop.f32.mrf.mxu1 }
 0x4e5   :  { %v1656_v30 = vpop.f32.mrf.mxu0  ;;  %v1697_v11 = vpop.f32.mrf.mxu1 }
 0x4e7   :  { %v1658_v25 = vpop.f32.mrf.mxu0  ;;  %v1699_v20 = vpop.f32.mrf.mxu1 }
 0x4e9   :  { %v1659_v13 = vpop.f32.mrf.mxu0  ;;  %v1700_v14 = vpop.f32.mrf.mxu1 }
 0x503   :  { %v1736_v45 = vpop.f32.mrf.mxu0  ;;  %v1777_v21 = vpop.f32.mrf.mxu1 }
 0x504   :  { %v1737_v12 = vadd.f32 %v1736_v45, %v1654_v10  ;;  %v1778_v13 = vadd.f32 %v1777_v21, %v1695_v33 }
 0x505   :  { %v1738_v38 = vpop.f32.mrf.mxu0  ;;  %v1779_v31 = vpop.f32.mrf.mxu1 }
 0x506   :  { %v1784_v51 = vadd.f32 %v1737_v12, %v6503_v47  ;;  %v1739_v41 = vadd.f32 %v1738_v38, %v1656_v30  ;;  %v1786_v20 = vadd.f32 %v1778_v13, %v6505_v40  ;;  %v1780_v14 = vadd.f32 %v1779_v31, %v1697_v11  ;;  %v6629_v31 = vld [vmem:[#allocation31_spill] sm:$0xff] }
 0x507   :  { %v1740_v19 = vpop.f32.mrf.mxu0  ;;  %v1781_v9 = vpop.f32.mrf.mxu1 }
 0x508   :  { %v3596_v4 = vmul.f32 -1.442695, %v1784_v51  ;;  %v1785_v7 = vadd.f32 %v1739_v41, %v6504_v17  ;;  %v3598_v45 = vmul.f32 -1.442695, %v1786_v20  ;;  %v1787_v0 = vadd.f32 %v1780_v14, %v6506_v6 }
 0x509   :  { %v1741_v22 = vpop.f32.mrf.mxu0  ;;  %v1782_v48 = vpop.f32.mrf.mxu1 }
 0x50a   :  { %3918 = vpow2.f32 %v3596_v4  ;;  %v3597_v25 = vmul.f32 -1.442695, %v1785_v7  ;;  %v6628_v4 = vld [vmem:[#allocation29_spill] sm:$0xff] }
 0x50c   :  { %3920 = vpow2.f32 %v3597_v25 }
 0x50d   :  { %3922 = vpow2.f32 %v3598_v45 }
 0x517   :  { %v3919_v10 = vpop.eup %3918 }
 0x518   :  { %v1797_v12 = vadd.f32 1.0, %v3919_v10 }
 0x519   :  { %v3921_v30 = vpop.eup %3920 }
 0x51a   :  { %3924 = vrcp.f32 %v1797_v12  ;;  %v1798_v9 = vadd.f32 1.0, %v3921_v30  ;;  %v3923_v33 = vpop.eup %3922 }
 0x51b   :  { %3926 = vtanh.f32 %v1787_v0  ;;  %v1799_v45 = vadd.f32 1.0, %v3923_v33 }
 0x51c   :  { %3928 = vrcp.f32 %v1798_v9 }
 0x523   :  { %v1846_v22 = vpop.f32.mrf.mxu0  ;;  %v1887_v48 = vpop.f32.mrf.mxu1 }
 0x524   :  { %v1894_v19 = vadd.f32 %v1846_v22, %v6628_v4  ;;  %v6630_v22 = vld [vmem:[#allocation30_spill] sm:$0xff] }
 0x525   :  { %v1848_v51 = vpop.f32.mrf.mxu0  ;;  %v1889_v21 = vpop.f32.mrf.mxu1  ;;  %v1896_v4 = vadd.f32 %v1887_v48, %v6630_v22  ;;  %v5312_v48 = vld [vmem:[#allocation3 + $0xe8] ss:$16 sps:$4 sm:$0xff]   ;;  %v5329_v22 = vld [vmem:[#allocation3 + $0xa4] ss:$16 sps:$4 sm:$0xff]  }
 0x526   :  { %v3599_v38 = vmul.f32 -1.442695, %v1894_v19  ;;  %v1895_v41 = vadd.f32 %v1848_v51, %v6629_v31  ;;  %v6631_v31 = vld [vmem:[#allocation32_spill] sm:$0xff] }
 0x527   :  { %v3925_v7 = vpop.eup %3924  ;;  %v1850_v11 = vpop.f32.mrf.mxu0  ;;  %v3601_v19 = vmul.f32 -1.442695, %v1896_v4  ;;  %v5332_v4 = vld [vmem:[#allocation3 + $0xac] ss:$16 sps:$4 sm:$0xff]  }
 0x528   :  { %v1891_v25 = vpop.f32.mrf.mxu1  ;;  %v3927_v13 = vpop.eup %3926  ;;  %3930 = vpow2.f32 %v3599_v38  ;;  %v3600_v20 = vmul.f32 -1.442695, %v1895_v41  ;;  %v1897_v38 = vadd.f32 %v1889_v21, %v6631_v31  ;;  %v5315_v21 = vld [vmem:[#allocation3 + $0xc4] ss:$16 sps:$4 sm:$0xff]  }
 0x529   :  { %v3929_v14 = vpop.eup %3928  ;;  %v1851_v0 = vpop.f32.mrf.mxu0  ;;  %v1808_v30 = vmul.f32 %v3927_v13, %v3925_v7 }
 0x52a   :  { %v1892_v10 = vpop.f32.mrf.mxu1  ;;  %v1807_v12 = vmul.f32 %v3929_v14, %v5090_v49  ;;  %3932 = vpow2.f32 %v3600_v20  ;;  %v5309_v20 = vld [vmem:[#allocation3 + $0xe0] ss:$16 sps:$4 sm:$0xff]   ;;  %v5318_v14 = vld [vmem:[#allocation3 + $0xcc] ss:$16 sps:$4 sm:$0xff]  }
 0x52b   :  { %3934 = vrcp.f32 %v1799_v45  ;;  %v5323_v10 = vld [vmem:[#allocation3 + $0xc0] ss:$16 sps:$4 sm:$0xff]  }
 0x52c   :  { %v5304_v9 = vadd.f32 %v1808_v30, %v1807_v12  ;;  %v5326_v12 = vld [vmem:[#allocation3 + $0xc8] ss:$16 sps:$4 sm:$0xff]  }
 0x52e   :  { %3936 = vtanh.f32 %v5304_v9 }
 0x52f   :  { %3938 = vpow2.f32 %v3601_v19 }
 0x535   :  { %v3931_v51 = vpop.eup %3930 }
 0x536   :  { %v1907_v41 = vadd.f32 1.0, %v3931_v51 }
 0x537   :  { %v3933_v11 = vpop.eup %3932 }
 0x538   :  { %3940 = vrcp.f32 %v1907_v41  ;;  %v1908_v33 = vadd.f32 1.0, %v3933_v11  ;;  %v3935_v49 = vpop.eup %3934  ;;  %v5336_v41 = vld [vmem:[#allocation3 + $0xa0] ss:$16 sps:$4 sm:$0xff]   ;;  %v5339_v11 = vld [vmem:[#allocation3 + $0xa8] ss:$16 sps:$4 sm:$0xff]  }
 0x539   :  { %3942 = vtanh.f32 %v1897_v38 }
 0x53a   :  { %3944 = vrcp.f32 %v1908_v33 }
 0x53b   :  { %v3937_v7 = vpop.eup %3936 }
 0x53c   :  { %v1811_v25 = vmul.f32 %v3937_v7, %v3935_v49  ;;  %v3939_v45 = vpop.eup %3938  ;;  %v5344_v49 = vld [vmem:[#allocation3 + $0x84] ss:$16 sps:$4 sm:$0xff]   ;;  %v5347_v7 = vld [vmem:[#allocation3 + $0x8c] ss:$16 sps:$4 sm:$0xff]  }
 0x53d   :  { %v1909_v51 = vadd.f32 1.0, %v3939_v45  ;;  %v5360_v45 = vld [vmem:[#allocation3 + $0x6c] ss:$16 sps:$4 sm:$0xff]  }
 0x53e   :  { %v1923_v13 = vpack.c.bf16 %v1811_v25, %v1811_v25  ;;  %v5354_v25 = vld [vmem:[#allocation3 + $0x88] ss:$16 sps:$4 sm:$0xff]   ;;  %6635 = vst [vmem:[#allocation28_spill] sm:$0xff] %v5360_v45 }
 0x53f   :  { %3946 = vrcp.f32 %v1909_v51  ;;  %6633 = vst [vmem:[#allocation27_spill] sm:$0xff] %v5354_v25  ;;  %v5372_v51 = vld [vmem:[#allocation3 + $0x4c] ss:$16 sps:$4 sm:$0xff]  }
 0x540   :  { %1957 = vmatmul.mubr.bf16.vlgmr.msra.gmra.mxu0 %v1923_v13  ;;  %1998 = vmatmul.mubr.bf16.vlgmr.msra.gmra.mxu1 %v1923_v13  ;;  %v5357_v13 = vld [vmem:[#allocation3 + $0x64] ss:$16 sps:$4 sm:$0xff]   ;;  %6639 = vst [vmem:[#allocation81_spill] sm:$0xff] %v5372_v51 }
 0x541   :  { %2007 = vmatpush1.bf16.msra.mxu0 %v5309_v20  ;;  %2048 = vmatpush1.bf16.msra.mxu1 %v5312_v48  ;;  %6634 = vst [vmem:[#allocation26_spill] sm:$0xff] %v5357_v13 }
 0x542   :  { %2008 = vmatprep.subr.bf16.mxu0 %v5315_v21  ;;  %2049 = vmatprep.subr.bf16.mxu1 %v5318_v14 }
 0x543   :  { %2038 = vmatprep.mubr.bf16.mxu0 %v6430_v5  ;;  %2079 = vmatprep.mubr.bf16.mxu1 %v6430_v5 }
 0x545   :  { %v3941_v0 = vpop.eup %3940  ;;  %2009 = vmatpush1.bf16.msra.mxu0 %v5323_v10  ;;  %2050 = vmatpush1.bf16.msra.mxu1 %v5326_v12 }
 0x546   :  { %v3943_v30 = vpop.eup %3942  ;;  %2010 = vmatprep.subr.bf16.mxu0 %v5329_v22  ;;  %2051 = vmatprep.subr.bf16.mxu1 %v5332_v4 }
 0x547   :  { %v3945_v19 = vpop.eup %3944  ;;  %v1918_v38 = vmul.f32 %v3943_v30, %v3941_v0  ;;  %v5363_v0 = vld [vmem:[#allocation3 + $0x60] ss:$16 sps:$4 sm:$0xff]   ;;  %v5366_v30 = vld [vmem:[#allocation3 + $0x68] ss:$16 sps:$4 sm:$0xff]  }
 0x548   :  { %v1917_v31 = vmul.f32 %v3945_v19, %v5108_v8  ;;  %v5351_v8 = vld [vmem:[#allocation3 + $0x80] ss:$16 sps:$4 sm:$0xff]   ;;  %6636 = vst [vmem:[#allocation77_spill] sm:$0xff] %v5363_v0  ;;  %6637 = vst [vmem:[#allocation79_spill] sm:$0xff] %v5366_v30  ;;  %v5369_v19 = vld [vmem:[#allocation3 + $0x44] ss:$16 sps:$4 sm:$0xff]  }
 0x549   :  { %2011 = vmatpush1.bf16.msra.mxu0 %v5336_v41  ;;  %2052 = vmatpush1.bf16.msra.mxu1 %v5339_v11  ;;  %6632 = vst [vmem:[#allocation25_spill] sm:$0xff] %v5351_v8  ;;  %6638 = vst [vmem:[#allocation80_spill] sm:$0xff] %v5369_v19 }
 0x54a   :  { %v5342_v33 = vadd.f32 %v1918_v38, %v1917_v31  ;;  %2012 = vmatprep.subr.bf16.mxu0 %v5344_v49  ;;  %2053 = vmatprep.subr.bf16.mxu1 %v5347_v7  ;;  %v5375_v31 = vld [vmem:[#allocation3 + $0x40] ss:$16 sps:$4 sm:$0xff]   ;;  %v5378_v38 = vld [vmem:[#allocation3 + $0x48] ss:$16 sps:$4 sm:$0xff]  }
 0x54b   :  { %6640 = vst [vmem:[#allocation82_spill] sm:$0xff] %v5375_v31  ;;  %6641 = vst [vmem:[#allocation83_spill] sm:$0xff] %v5378_v38 }
 0x54c   :  { %3948 = vtanh.f32 %v5342_v33 }
 0x54d   :  { %2013 = vmatpush1.bf16.msra.mxu0 %v5351_v8  ;;  %2054 = vmatpush1.bf16.msra.mxu1 %v5354_v25  ;;  %v5399_v25 = vld [vmem:[#allocation3] ss:$16 sps:$4 sm:$0xff]   ;;  %v5402_v8 = vld [vmem:[#allocation3 + $0x8] ss:$16 sps:$4 sm:$0xff]  }
 0x54e   :  { %2014 = vmatprep.subr.bf16.mxu0 %v5357_v13  ;;  %2055 = vmatprep.subr.bf16.mxu1 %v5360_v45  ;;  %v5387_v13 = vld [vmem:[#allocation3 + $0x20] ss:$16 sps:$4 sm:$0xff]  }
 0x551   :  { %2015 = vmatpush1.bf16.msra.mxu0 %v5363_v0  ;;  %2056 = vmatpush1.bf16.msra.mxu1 %v5366_v30  ;;  %v5381_v0 = vld [vmem:[#allocation3 + $0x24] ss:$16 sps:$4 sm:$0xff]   ;;  %v5384_v30 = vld [vmem:[#allocation3 + $0x2c] ss:$16 sps:$4 sm:$0xff]  }
 0x552   :  { %2016 = vmatprep.subr.bf16.mxu0 %v5369_v19  ;;  %2057 = vmatprep.subr.bf16.mxu1 %v5372_v51  ;;  %6642 = vst [vmem:[#allocation84_spill] sm:$0xff] %v5381_v0  ;;  %6643 = vst [vmem:[#allocation85_spill] sm:$0xff] %v5384_v30  ;;  %v3947_v19 = vpop.eup %3946  ;;  %v5390_v51 = vld [vmem:[#allocation3 + $0x28] ss:$16 sps:$4 sm:$0xff]  }
 0x555   :  { %2017 = vmatpush1.bf16.msra.mxu0 %v5375_v31  ;;  %2058 = vmatpush1.bf16.msra.mxu1 %v5378_v38  ;;  %v5393_v31 = vld [vmem:[#allocation3 + $0x4] ss:$16 sps:$4 sm:$0xff]   ;;  %v5396_v38 = vld [vmem:[#allocation3 + $0xc] ss:$16 sps:$4 sm:$0xff]  }
 0x556   :  { %2018 = vmatprep.subr.bf16.mxu0 %v5381_v0  ;;  %2059 = vmatprep.subr.bf16.mxu1 %v5384_v30 }
 0x559   :  { %v3949_v45 = vpop.eup %3948  ;;  %2019 = vmatpush1.bf16.msra.mxu0 %v5387_v13  ;;  %2060 = vmatpush1.bf16.msra.mxu1 %v5390_v51 }
 0x55a   :  { %2020 = vmatprep.subr.bf16.mxu0 %v5393_v31  ;;  %2061 = vmatprep.subr.bf16.mxu1 %v5396_v38  ;;  %v1921_v0 = vmul.f32 %v3949_v45, %v3947_v19  ;;  %v6662_v45 = vld [vmem:[#allocation99_spill] sm:$0xff]  ;;  %v6665_v19 = vld [vmem:[#allocation58_spill] sm:$0xff] }
 0x55c   :  { %v1922_v30 = vpack.c.bf16 %v1921_v0, %v1921_v0  ;;  %v6663_v0 = vld [vmem:[#allocation56_spill] sm:$0xff] }
 0x55d   :  { %2021 = vmatpush1.bf16.msra.mxu0 %v5399_v25  ;;  %2062 = vmatpush1.bf16.msra.mxu1 %v5402_v8 }
 0x55e   :  { %2116 = vmatprep.subr.bf16.mxu0 %v6585_v15  ;;  %2157 = vmatprep.subr.bf16.mxu1 %v6586_v23  ;;  %v6650_v15 = vld [vmem:[#allocation71_spill] sm:$0xff]  ;;  %v6651_v23 = vld [vmem:[#allocation72_spill] sm:$0xff] }
 0x560   :  { %2039 = vmatmul.mubr.bf16.vlgmr.msra.gmra.mxu0 %v1922_v30  ;;  %2080 = vmatmul.mubr.bf16.vlgmr.msra.gmra.mxu1 %v1922_v30 }
 0x561   :  { %2117 = vmatpush1.bf16.msra.mxu0 %v6587_v26  ;;  %2158 = vmatpush1.bf16.msra.mxu1 %v6588_v35  ;;  %v6652_v26 = vld [vmem:[#allocation73_spill] sm:$0xff]  ;;  %v6653_v35 = vld [vmem:[#allocation74_spill] sm:$0xff] }
 0x562   :  { %2118 = vmatprep.subr.bf16.mxu0 %v6589_v29  ;;  %2159 = vmatprep.subr.bf16.mxu1 %v6590_v43  ;;  %v6654_v29 = vld [vmem:[#allocation75_spill] sm:$0xff]  ;;  %v6655_v43 = vld [vmem:[#allocation76_spill] sm:$0xff] }
 0x563   :  { %2148 = vmatprep.mubr.bf16.mxu0 %v6430_v5  ;;  %2189 = vmatprep.mubr.bf16.mxu1 %v6430_v5 }
 0x565   :  { %2119 = vmatpush1.bf16.msra.mxu0 %v6591_v18  ;;  %2160 = vmatpush1.bf16.msra.mxu1 %v6592_v52  ;;  %v6656_v18 = vld [vmem:[#allocation78_spill] sm:$0xff]  ;;  %v6657_v52 = vld [vmem:[#allocation92_spill] sm:$0xff] }
 0x566   :  { %2120 = vmatprep.subr.bf16.mxu0 %v6593_v39  ;;  %2161 = vmatprep.subr.bf16.mxu1 %v6594_v34  ;;  %v6658_v39 = vld [vmem:[#allocation94_spill] sm:$0xff]  ;;  %v6659_v34 = vld [vmem:[#allocation96_spill] sm:$0xff] }
 0x569   :  { %2121 = vmatpush1.bf16.msra.mxu0 %v5009_v36  ;;  %2162 = vmatpush1.bf16.msra.mxu1 %v6595_v37  ;;  %v6649_v36 = vld [vmem:[#allocation70_spill] sm:$0xff]  ;;  %v6660_v37 = vld [vmem:[#allocation97_spill] sm:$0xff] }
 0x56a   :  { %2122 = vmatprep.subr.bf16.mxu0 %v6596_v50  ;;  %2163 = vmatprep.subr.bf16.mxu1 %v5018_v28  ;;  %v6646_v28 = vld [vmem:[#allocation23_spill] sm:$0xff]  ;;  %v6661_v50 = vld [vmem:[#allocation98_spill] sm:$0xff] }
 0x56d   :  { %2123 = vmatpush1.bf16.msra.mxu0 %v5021_v16  ;;  %2164 = vmatpush1.bf16.msra.mxu1 %v5148_v53  ;;  %v6647_v16 = vld [vmem:[#allocation22_spill] sm:$0xff] }
 0x56e   :  { %2124 = vmatprep.subr.bf16.mxu0 %v5025_v3  ;;  %2165 = vmatprep.subr.bf16.mxu1 %v5152_v54  ;;  %v6648_v3 = vld [vmem:[#allocation24_spill] sm:$0xff] }
 0x571   :  { %2125 = vmatpush1.bf16.msra.mxu0 %v5029_v44  ;;  %2166 = vmatpush1.bf16.msra.mxu1 %v5156_v57  ;;  %v6644_v44 = vld [vmem:[#allocation20_spill] sm:$0xff] }
 0x572   :  { %2126 = vmatprep.subr.bf16.mxu0 %v5033_v42  ;;  %2167 = vmatprep.subr.bf16.mxu1 %v5160_v58  ;;  %v6645_v42 = vld [vmem:[#allocation21_spill] sm:$0xff] }
 0x575   :  { %2127 = vmatpush1.bf16.msra.mxu0 %v5163_v61  ;;  %2168 = vmatpush1.bf16.msra.mxu1 %v5166_v62 }
 0x576   :  { %2128 = vmatprep.subr.bf16.mxu0 %v5169_v2  ;;  %2169 = vmatprep.subr.bf16.mxu1 %v5172_v24 }
 0x579   :  { %2129 = vmatpush1.bf16.msra.mxu0 %v5175_v32  ;;  %2170 = vmatpush1.bf16.msra.mxu1 %v5178_v1 }
 0x57a   :  { %2130 = vmatprep.subr.bf16.mxu0 %v5181_v55  ;;  %2171 = vmatprep.subr.bf16.mxu1 %v5184_v56 }
 0x57d   :  { %2131 = vmatpush1.bf16.msra.mxu0 %v5187_v59  ;;  %2172 = vmatpush1.bf16.msra.mxu1 %v5190_v60 }
 0x57e   :  { %2228 = vmatprep.subr.bf16.mxu0 %v5193_v63  ;;  %2269 = vmatprep.subr.bf16.mxu1 %v5196_v46 }
 0x580   :  { %2149 = vmatmul.mubr.bf16.vlgmr.msra.gmra.mxu0 %v1922_v30  ;;  %2190 = vmatmul.mubr.bf16.vlgmr.msra.gmra.mxu1 %v1922_v30  ;;  %v6664_v30 = vld [vmem:[#allocation61_spill] sm:$0xff] }
 0x581   :  { %2229 = vmatpush1.bf16.msra.mxu0 %v5199_v27  ;;  %2270 = vmatpush1.bf16.msra.mxu1 %v6644_v44 }
 0x582   :  { %2230 = vmatprep.subr.bf16.mxu0 %v6645_v42  ;;  %2271 = vmatprep.subr.bf16.mxu1 %v6646_v28 }
 0x583   :  { %2260 = vmatprep.mubr.bf16.mxu0 %v6430_v5  ;;  %2301 = vmatprep.mubr.bf16.mxu1 %v6430_v5 }
 0x585   :  { %2231 = vmatpush1.bf16.msra.mxu0 %v6647_v16  ;;  %2272 = vmatpush1.bf16.msra.mxu1 %v6648_v3 }
 0x586   :  { %2232 = vmatprep.subr.bf16.mxu0 %v6649_v36  ;;  %2273 = vmatprep.subr.bf16.mxu1 %v6650_v15 }
 0x589   :  { %2233 = vmatpush1.bf16.msra.mxu0 %v6651_v23  ;;  %2274 = vmatpush1.bf16.msra.mxu1 %v6652_v26 }
 0x58a   :  { %2234 = vmatprep.subr.bf16.mxu0 %v6653_v35  ;;  %2275 = vmatprep.subr.bf16.mxu1 %v6654_v29 }
 0x58d   :  { %2235 = vmatpush1.bf16.msra.mxu0 %v6655_v43  ;;  %2276 = vmatpush1.bf16.msra.mxu1 %v6656_v18  ;;  %v6666_v43 = vld [vmem:[#allocation63_spill] sm:$0xff]  ;;  %v6667_v18 = vld [vmem:[#allocation60_spill] sm:$0xff] }
 0x58e   :  { %2236 = vmatprep.subr.bf16.mxu0 %v6657_v52  ;;  %2277 = vmatprep.subr.bf16.mxu1 %v6658_v39  ;;  %v6668_v52 = vld [vmem:[#allocation65_spill] sm:$0xff]  ;;  %v6669_v39 = vld [vmem:[#allocation62_spill] sm:$0xff] }
 0x591   :  { %2237 = vmatpush1.bf16.msra.mxu0 %v6659_v34  ;;  %2278 = vmatpush1.bf16.msra.mxu1 %v6660_v37  ;;  %v6670_v34 = vld [vmem:[#allocation66_spill] sm:$0xff]  ;;  %v6671_v37 = vld [vmem:[#allocation64_spill] sm:$0xff] }
 0x592   :  { %2238 = vmatprep.subr.bf16.mxu0 %v6661_v50  ;;  %2279 = vmatprep.subr.bf16.mxu1 %v6662_v45  ;;  %v6672_v50 = vld [vmem:[#allocation67_spill] sm:$0xff]  ;;  %v6673_v45 = vld [vmem:[#allocation68_spill] sm:$0xff] }
 0x595   :  { %2239 = vmatpush1.bf16.msra.mxu0 %v6663_v0  ;;  %2280 = vmatpush1.bf16.msra.mxu1 %v6664_v30  ;;  %v6674_v0 = vld [vmem:[#allocation69_spill] sm:$0xff] }
 0x596   :  { %2240 = vmatprep.subr.bf16.mxu0 %v6665_v19  ;;  %2281 = vmatprep.subr.bf16.mxu1 %v6666_v43 }
 0x599   :  { %2241 = vmatpush1.bf16.msra.mxu0 %v6667_v18  ;;  %2282 = vmatpush1.bf16.msra.mxu1 %v6668_v52 }
 0x59a   :  { %2242 = vmatprep.subr.bf16.mxu0 %v6669_v39  ;;  %2283 = vmatprep.subr.bf16.mxu1 %v6670_v34 }
 0x59d   :  { %2243 = vmatpush1.bf16.msra.mxu0 %v6671_v37  ;;  %2284 = vmatpush1.bf16.msra.mxu1 %v6672_v50 }
 0x59e   :  { %2310 = vmatprep.subr.bf16.mxu0 %v6673_v45  ;;  %2351 = vmatprep.subr.bf16.mxu1 %v6674_v0 }
 0x600   :  { %v1958_v30 = vpop.f32.mrf.mxu0  ;;  %v1999_v19 = vpop.f32.mrf.mxu1 }
 0x602   :  { %v1960_v29 = vpop.f32.mrf.mxu0  ;;  %v2001_v43 = vpop.f32.mrf.mxu1 }
 0x604   :  { %v1962_v35 = vpop.f32.mrf.mxu0  ;;  %v2003_v18 = vpop.f32.mrf.mxu1 }
 0x606   :  { %v1963_v26 = vpop.f32.mrf.mxu0  ;;  %v2004_v52 = vpop.f32.mrf.mxu1 }
 0x620   :  { %v2040_v23 = vpop.f32.mrf.mxu0  ;;  %v2081_v39 = vpop.f32.mrf.mxu1 }
 0x621   :  { %v2041_v15 = vadd.f32 %v2040_v23, %v1958_v30  ;;  %v2082_v26 = vadd.f32 %v2081_v39, %v1999_v19 }
 0x622   :  { %v2042_v34 = vpop.f32.mrf.mxu0  ;;  %v2083_v36 = vpop.f32.mrf.mxu1 }
 0x623   :  { %v2088_v37 = vadd.f32 %v2041_v15, %v6503_v47  ;;  %v2043_v50 = vadd.f32 %v2042_v34, %v1960_v29  ;;  %v2090_v18 = vadd.f32 %v2082_v26, %v6505_v40  ;;  %v2084_v52 = vadd.f32 %v2083_v36, %v2001_v43  ;;  %v6676_v36 = vld [vmem:[#allocation35_spill] sm:$0xff] }
 0x624   :  { %v2044_v3 = vpop.f32.mrf.mxu0  ;;  %v2085_v45 = vpop.f32.mrf.mxu1 }
 0x625   :  { %v3602_v16 = vmul.f32 -1.442695, %v2088_v37  ;;  %v2089_v0 = vadd.f32 %v2043_v50, %v6504_v17  ;;  %v3604_v23 = vmul.f32 -1.442695, %v2090_v18  ;;  %v2091_v44 = vadd.f32 %v2084_v52, %v6506_v6 }
 0x626   :  { %v2045_v28 = vpop.f32.mrf.mxu0  ;;  %v2086_v42 = vpop.f32.mrf.mxu1 }
 0x627   :  { %3950 = vpow2.f32 %v3602_v16  ;;  %v3603_v35 = vmul.f32 -1.442695, %v2089_v0  ;;  %v6675_v16 = vld [vmem:[#allocation33_spill] sm:$0xff] }
 0x629   :  { %3952 = vpow2.f32 %v3603_v35 }
 0x62a   :  { %3954 = vpow2.f32 %v3604_v23 }
 0x634   :  { %v3951_v30 = vpop.eup %3950 }
 0x635   :  { %v2101_v15 = vadd.f32 1.0, %v3951_v30 }
 0x636   :  { %v3953_v29 = vpop.eup %3952 }
 0x637   :  { %3956 = vrcp.f32 %v2101_v15  ;;  %v2102_v3 = vadd.f32 1.0, %v3953_v29  ;;  %v3955_v50 = vpop.eup %3954 }
 0x638   :  { %3958 = vtanh.f32 %v2091_v44  ;;  %v2103_v23 = vadd.f32 1.0, %v3955_v50 }
 0x639   :  { %3960 = vrcp.f32 %v2102_v3 }
 0x640   :  { %v2150_v28 = vpop.f32.mrf.mxu0  ;;  %v2191_v42 = vpop.f32.mrf.mxu1 }
 0x641   :  { %v2198_v34 = vadd.f32 %v2150_v28, %v6675_v16  ;;  %v6677_v28 = vld [vmem:[#allocation34_spill] sm:$0xff] }
 0x642   :  { %v2152_v37 = vpop.f32.mrf.mxu0  ;;  %v2193_v39 = vpop.f32.mrf.mxu1  ;;  %v2200_v16 = vadd.f32 %v2191_v42, %v6677_v28  ;;  %v6680_v28 = vld [vmem:[#allocation27_spill] sm:$0xff] }
 0x643   :  { %v3605_v45 = vmul.f32 -1.442695, %v2198_v34  ;;  %v2199_v43 = vadd.f32 %v2152_v37, %v6676_v36  ;;  %v6678_v36 = vld [vmem:[#allocation36_spill] sm:$0xff] }
 0x644   :  { %v3957_v0 = vpop.eup %3956  ;;  %v2154_v19 = vpop.f32.mrf.mxu0  ;;  %v3607_v34 = vmul.f32 -1.442695, %v2200_v16  ;;  %v6681_v16 = vld [vmem:[#allocation26_spill] sm:$0xff] }
 0x645   :  { %v2195_v35 = vpop.f32.mrf.mxu1  ;;  %v3959_v26 = vpop.eup %3958  ;;  %3962 = vpow2.f32 %v3605_v45  ;;  %v3606_v18 = vmul.f32 -1.442695, %v2199_v43  ;;  %v2201_v45 = vadd.f32 %v2193_v39, %v6678_v36  ;;  %v6685_v36 = vld [vmem:[#allocation80_spill] sm:$0xff] }
 0x646   :  { %v3961_v52 = vpop.eup %3960  ;;  %v2155_v44 = vpop.f32.mrf.mxu0  ;;  %v2112_v29 = vmul.f32 %v3959_v26, %v3957_v0 }
 0x647   :  { %v2196_v30 = vpop.f32.mrf.mxu1  ;;  %v2111_v15 = vmul.f32 %v3961_v52, %v5304_v9  ;;  %3964 = vpow2.f32 %v3606_v18 }
 0x648   :  { %3966 = vrcp.f32 %v2103_v23 }
 0x649   :  { %v5482_v3 = vadd.f32 %v2112_v29, %v2111_v15  ;;  %v6679_v29 = vld [vmem:[#allocation25_spill] sm:$0xff] }
 0x64b   :  { %3968 = vtanh.f32 %v5482_v3 }
 0x64c   :  { %3970 = vpow2.f32 %v3607_v34  ;;  %v6683_v34 = vld [vmem:[#allocation77_spill] sm:$0xff] }
 0x652   :  { %v3963_v37 = vpop.eup %3962 }
 0x653   :  { %v2211_v43 = vadd.f32 1.0, %v3963_v37  ;;  %v6684_v37 = vld [vmem:[#allocation79_spill] sm:$0xff] }
 0x654   :  { %v3965_v19 = vpop.eup %3964 }
 0x655   :  { %3972 = vrcp.f32 %v2211_v43  ;;  %v2212_v50 = vadd.f32 1.0, %v3965_v19  ;;  %v3967_v9 = vpop.eup %3966  ;;  %v6687_v43 = vld [vmem:[#allocation82_spill] sm:$0xff]  ;;  %v6688_v19 = vld [vmem:[#allocation83_spill] sm:$0xff] }
 0x656   :  { %3974 = vtanh.f32 %v2201_v45  ;;  %v6686_v45 = vld [vmem:[#allocation81_spill] sm:$0xff] }
 0x657   :  { %3976 = vrcp.f32 %v2212_v50  ;;  %v6689_v50 = vld [vmem:[#allocation84_spill] sm:$0xff] }
 0x658   :  { %v3969_v0 = vpop.eup %3968 }
 0x659   :  { %v2115_v35 = vmul.f32 %v3969_v0, %v3967_v9  ;;  %v3971_v42 = vpop.eup %3970  ;;  %v6690_v9 = vld [vmem:[#allocation85_spill] sm:$0xff] }
 0x65a   :  { %v2213_v23 = vadd.f32 1.0, %v3971_v42 }
 0x65b   :  { %v2227_v26 = vpack.c.bf16 %v2115_v35, %v2115_v35 }
 0x65c   :  { %3978 = vrcp.f32 %v2213_v23  ;;  %v5532_v23 = vld [vmem:[#allocation2 + $0xe8] ss:$16 sps:$4 sm:$0xff]  }
 0x65d   :  { %2261 = vmatmul.mubr.bf16.vlgmr.msra.gmra.mxu0 %v2227_v26  ;;  %2302 = vmatmul.mubr.bf16.vlgmr.msra.gmra.mxu1 %v2227_v26  ;;  %6691 = vst [vmem:[#allocation86_spill] sm:$0xff] %v5532_v23 }
 0x65e   :  { %2311 = vmatpush1.bf16.msra.mxu0 %v5309_v20  ;;  %2352 = vmatpush1.bf16.msra.mxu1 %v5312_v48 }
 0x65f   :  { %2312 = vmatprep.subr.bf16.mxu0 %v5315_v21  ;;  %2353 = vmatprep.subr.bf16.mxu1 %v5318_v14 }
 0x660   :  { %2342 = vmatprep.mubr.bf16.mxu0 %v6430_v5  ;;  %2383 = vmatprep.mubr.bf16.mxu1 %v6430_v5 }
 0x662   :  { %v3973_v39 = vpop.eup %3972  ;;  %2313 = vmatpush1.bf16.msra.mxu0 %v5323_v10  ;;  %2354 = vmatpush1.bf16.msra.mxu1 %v5326_v12 }
 0x663   :  { %v3975_v18 = vpop.eup %3974  ;;  %2314 = vmatprep.subr.bf16.mxu0 %v5329_v22  ;;  %2355 = vmatprep.subr.bf16.mxu1 %v5332_v4 }
 0x664   :  { %v3977_v52 = vpop.eup %3976  ;;  %v2222_v30 = vmul.f32 %v3975_v18, %v3973_v39  ;;  %v5523_v39 = vld [vmem:[#allocation2 + $0xe4] ss:$16 sps:$4 sm:$0xff]   ;;  %v5526_v18 = vld [vmem:[#allocation2 + $0xec] ss:$16 sps:$4 sm:$0xff]  }
 0x665   :  { %v2221_v44 = vmul.f32 %v3977_v52, %v5342_v33  ;;  %v6682_v33 = vld [vmem:[#allocation28_spill] sm:$0xff]  ;;  %v5529_v52 = vld [vmem:[#allocation2 + $0xe0] ss:$16 sps:$4 sm:$0xff]  }
 0x666   :  { %2315 = vmatpush1.bf16.msra.mxu0 %v5336_v41  ;;  %2356 = vmatpush1.bf16.msra.mxu1 %v5339_v11 }
 0x667   :  { %v5500_v15 = vadd.f32 %v2222_v30, %v2221_v44  ;;  %2316 = vmatprep.subr.bf16.mxu0 %v5344_v49  ;;  %2357 = vmatprep.subr.bf16.mxu1 %v5347_v7  ;;  %v5535_v44 = vld [vmem:[#allocation2 + $0xc4] ss:$16 sps:$4 sm:$0xff]   ;;  %v5538_v30 = vld [vmem:[#allocation2 + $0xcc] ss:$16 sps:$4 sm:$0xff]  }
 0x668   :  { %6692 = vst [vmem:[#allocation87_spill] sm:$0xff] %v5535_v44  ;;  %6693 = vst [vmem:[#allocation88_spill] sm:$0xff] %v5538_v30 }
 0x669   :  { %3980 = vtanh.f32 %v5500_v15  ;;  %v3979_v0 = vpop.eup %3978 }
 0x66a   :  { %2317 = vmatpush1.bf16.msra.mxu0 %v6679_v29  ;;  %2358 = vmatpush1.bf16.msra.mxu1 %v6680_v28 }
 0x66b   :  { %2318 = vmatprep.subr.bf16.mxu0 %v6681_v16  ;;  %2359 = vmatprep.subr.bf16.mxu1 %v6682_v33 }
 0x66e   :  { %2319 = vmatpush1.bf16.msra.mxu0 %v6683_v34  ;;  %2360 = vmatpush1.bf16.msra.mxu1 %v6684_v37 }
 0x66f   :  { %2320 = vmatprep.subr.bf16.mxu0 %v6685_v36  ;;  %2361 = vmatprep.subr.bf16.mxu1 %v6686_v45 }
 0x672   :  { %2321 = vmatpush1.bf16.msra.mxu0 %v6687_v43  ;;  %2362 = vmatpush1.bf16.msra.mxu1 %v6688_v19 }
 0x673   :  { %2322 = vmatprep.subr.bf16.mxu0 %v6689_v50  ;;  %2363 = vmatprep.subr.bf16.mxu1 %v6690_v9 }
 0x676   :  { %v3981_v35 = vpop.eup %3980  ;;  %2323 = vmatpush1.bf16.msra.mxu0 %v5387_v13  ;;  %2364 = vmatpush1.bf16.msra.mxu1 %v5390_v51 }
 0x677   :  { %2324 = vmatprep.subr.bf16.mxu0 %v5393_v31  ;;  %2365 = vmatprep.subr.bf16.mxu1 %v5396_v38  ;;  %v2225_v26 = vmul.f32 %v3981_v35, %v3979_v0  ;;  %v5543_v0 = vld [vmem:[#allocation2 + $0xc0] ss:$16 sps:$4 sm:$0xff]   ;;  %v5546_v35 = vld [vmem:[#allocation2 + $0xc8] ss:$16 sps:$4 sm:$0xff]  }
 0x678   :  { %6694 = vst [vmem:[#allocation89_spill] sm:$0xff] %v5543_v0  ;;  %6695 = vst [vmem:[#allocation90_spill] sm:$0xff] %v5546_v35 }
 0x679   :  { %v2226_v42 = vpack.c.bf16 %v2225_v26, %v2225_v26  ;;  %v5549_v26 = vld [vmem:[#allocation2 + $0xa4] ss:$16 sps:$4 sm:$0xff]  }
 0x67a   :  { %2325 = vmatpush1.bf16.msra.mxu0 %v5399_v25  ;;  %2366 = vmatpush1.bf16.msra.mxu1 %v5402_v8  ;;  %6696 = vst [vmem:[#allocation91_spill] sm:$0xff] %v5549_v26 }
 0x67b   :  { %2420 = vmatprep.subr.bf16.mxu0 %v5523_v39  ;;  %2461 = vmatprep.subr.bf16.mxu1 %v5526_v18 }
 0x67d   :  { %2343 = vmatmul.mubr.bf16.vlgmr.msra.gmra.mxu0 %v2226_v42  ;;  %2384 = vmatmul.mubr.bf16.vlgmr.msra.gmra.mxu1 %v2226_v42 }
 0x67e   :  { %2421 = vmatpush1.bf16.msra.mxu0 %v5529_v52  ;;  %2462 = vmatpush1.bf16.msra.mxu1 %v5532_v23  ;;  %v5558_v23 = vld [vmem:[#allocation2 + $0xa8] ss:$16 sps:$4 sm:$0xff]  }
 0x67f   :  { %2422 = vmatprep.subr.bf16.mxu0 %v5535_v44  ;;  %2463 = vmatprep.subr.bf16.mxu1 %v5538_v30  ;;  %v5552_v44 = vld [vmem:[#allocation2 + $0xac] ss:$16 sps:$4 sm:$0xff]   ;;  %v5555_v30 = vld [vmem:[#allocation2 + $0xa0] ss:$16 sps:$4 sm:$0xff]   ;;  %6698 = vst [vmem:[#allocation95_spill] sm:$0xff] %v5558_v23 }
 0x680   :  { %2452 = vmatprep.mubr.bf16.mxu0 %v6430_v5  ;;  %2493 = vmatprep.mubr.bf16.mxu1 %v6430_v5  ;;  %6697 = vst [vmem:[#allocation93_spill] sm:$0xff] %v5552_v44 }
 0x682   :  { %2423 = vmatpush1.bf16.msra.mxu0 %v5543_v0  ;;  %2464 = vmatpush1.bf16.msra.mxu1 %v5546_v35  ;;  %v5561_v0 = vld [vmem:[#allocation2 + $0x84] ss:$16 sps:$4 sm:$0xff]   ;;  %v5564_v35 = vld [vmem:[#allocation2 + $0x8c] ss:$16 sps:$4 sm:$0xff]  }
 0x683   :  { %2424 = vmatprep.subr.bf16.mxu0 %v5549_v26  ;;  %2465 = vmatprep.subr.bf16.mxu1 %v5552_v44  ;;  %6699 = vst [vmem:[#allocation51_spill] sm:$0xff] %v5561_v0  ;;  %v5567_v26 = vld [vmem:[#allocation2 + $0x80] ss:$16 sps:$4 sm:$0xff]   ;;  %v5571_v44 = vld [vmem:[#allocation2 + $0x64] ss:$16 sps:$4 sm:$0xff]  }
 0x684   :  { %6700 = vst [vmem:[#allocation49_spill] sm:$0xff] %v5567_v26  ;;  %6701 = vst [vmem:[#allocation53_spill] sm:$0xff] %v5571_v44 }
 0x686   :  { %2425 = vmatpush1.bf16.msra.mxu0 %v5555_v30  ;;  %2466 = vmatpush1.bf16.msra.mxu1 %v5558_v23  ;;  %v5575_v23 = vld [vmem:[#allocation2 + $0x60] ss:$16 sps:$4 sm:$0xff]  }
 0x687   :  { %2426 = vmatprep.subr.bf16.mxu0 %v5561_v0  ;;  %2467 = vmatprep.subr.bf16.mxu1 %v5564_v35  ;;  %6702 = vst [vmem:[#allocation50_spill] sm:$0xff] %v5575_v23  ;;  %v5579_v0 = vld [vmem:[#allocation2 + $0x44] ss:$16 sps:$4 sm:$0xff]  }
 0x688   :  { %6703 = vst [vmem:[#allocation55_spill] sm:$0xff] %v5579_v0 }
 0x68a   :  { %2427 = vmatpush1.bf16.msra.mxu0 %v5567_v26  ;;  %2468 = vmatpush1.bf16.msra.mxu1 %v5148_v53  ;;  %v6704_v53 = vld [vmem:[#allocation20_spill] sm:$0xff] }
 0x68b   :  { %2428 = vmatprep.subr.bf16.mxu0 %v5571_v44  ;;  %2469 = vmatprep.subr.bf16.mxu1 %v5152_v54  ;;  %v6705_v54 = vld [vmem:[#allocation21_spill] sm:$0xff] }
 0x68e   :  { %2429 = vmatpush1.bf16.msra.mxu0 %v5575_v23  ;;  %2470 = vmatpush1.bf16.msra.mxu1 %v5156_v57  ;;  %v6706_v57 = vld [vmem:[#allocation23_spill] sm:$0xff] }
 0x68f   :  { %2430 = vmatprep.subr.bf16.mxu0 %v5579_v0  ;;  %2471 = vmatprep.subr.bf16.mxu1 %v5160_v58  ;;  %v6707_v58 = vld [vmem:[#allocation22_spill] sm:$0xff] }
 0x692   :  { %2431 = vmatpush1.bf16.msra.mxu0 %v5163_v61  ;;  %2472 = vmatpush1.bf16.msra.mxu1 %v5166_v62  ;;  %v6708_v61 = vld [vmem:[#allocation24_spill] sm:$0xff]  ;;  %v6709_v62 = vld [vmem:[#allocation70_spill] sm:$0xff] }
 0x693   :  { %2432 = vmatprep.subr.bf16.mxu0 %v5169_v2  ;;  %2473 = vmatprep.subr.bf16.mxu1 %v5172_v24  ;;  %v6710_v2 = vld [vmem:[#allocation71_spill] sm:$0xff]  ;;  %v6711_v24 = vld [vmem:[#allocation72_spill] sm:$0xff] }
 0x696   :  { %2433 = vmatpush1.bf16.msra.mxu0 %v5175_v32  ;;  %2474 = vmatpush1.bf16.msra.mxu1 %v5178_v1  ;;  %v6712_v32 = vld [vmem:[#allocation73_spill] sm:$0xff]  ;;  %v6713_v1 = vld [vmem:[#allocation74_spill] sm:$0xff] }
 0x697   :  { %2434 = vmatprep.subr.bf16.mxu0 %v5181_v55  ;;  %2475 = vmatprep.subr.bf16.mxu1 %v5184_v56  ;;  %v6714_v55 = vld [vmem:[#allocation75_spill] sm:$0xff]  ;;  %v6715_v56 = vld [vmem:[#allocation76_spill] sm:$0xff] }
 0x69a   :  { %2435 = vmatpush1.bf16.msra.mxu0 %v5187_v59  ;;  %2476 = vmatpush1.bf16.msra.mxu1 %v5190_v60  ;;  %v6716_v59 = vld [vmem:[#allocation78_spill] sm:$0xff]  ;;  %v6717_v60 = vld [vmem:[#allocation92_spill] sm:$0xff] }
 0x69b   :  { %2532 = vmatprep.subr.bf16.mxu0 %v5193_v63  ;;  %2573 = vmatprep.subr.bf16.mxu1 %v5196_v46  ;;  %v6718_v63 = vld [vmem:[#allocation94_spill] sm:$0xff]  ;;  %v6719_v46 = vld [vmem:[#allocation96_spill] sm:$0xff] }
 0x69d   :  { %2453 = vmatmul.mubr.bf16.vlgmr.msra.gmra.mxu0 %v2226_v42  ;;  %2494 = vmatmul.mubr.bf16.vlgmr.msra.gmra.mxu1 %v2226_v42  ;;  %v6721_v42 = vld [vmem:[#allocation98_spill] sm:$0xff] }
 0x69e   :  { %2533 = vmatpush1.bf16.msra.mxu0 %v5199_v27  ;;  %2574 = vmatpush1.bf16.msra.mxu1 %v6704_v53  ;;  %v6720_v27 = vld [vmem:[#allocation97_spill] sm:$0xff]  ;;  %v6722_v53 = vld [vmem:[#allocation99_spill] sm:$0xff] }
 0x69f   :  { %2534 = vmatprep.subr.bf16.mxu0 %v6705_v54  ;;  %2575 = vmatprep.subr.bf16.mxu1 %v6706_v57  ;;  %v6723_v54 = vld [vmem:[#allocation56_spill] sm:$0xff]  ;;  %v6724_v57 = vld [vmem:[#allocation61_spill] sm:$0xff] }
 0x6a0   :  { %2564 = vmatprep.mubr.bf16.mxu0 %v6430_v5  ;;  %2605 = vmatprep.mubr.bf16.mxu1 %v6430_v5 }
 0x6a2   :  { %2535 = vmatpush1.bf16.msra.mxu0 %v6707_v58  ;;  %2576 = vmatpush1.bf16.msra.mxu1 %v6708_v61  ;;  %v6725_v58 = vld [vmem:[#allocation58_spill] sm:$0xff]  ;;  %v6726_v61 = vld [vmem:[#allocation63_spill] sm:$0xff] }
 0x6a3   :  { %2536 = vmatprep.subr.bf16.mxu0 %v6709_v62  ;;  %2577 = vmatprep.subr.bf16.mxu1 %v6710_v2  ;;  %v6727_v62 = vld [vmem:[#allocation60_spill] sm:$0xff]  ;;  %v6728_v2 = vld [vmem:[#allocation65_spill] sm:$0xff] }
 0x6a6   :  { %2537 = vmatpush1.bf16.msra.mxu0 %v6711_v24  ;;  %2578 = vmatpush1.bf16.msra.mxu1 %v6712_v32  ;;  %v6729_v24 = vld [vmem:[#allocation62_spill] sm:$0xff] }
 0x6a7   :  { %2538 = vmatprep.subr.bf16.mxu0 %v6713_v1  ;;  %2579 = vmatprep.subr.bf16.mxu1 %v6714_v55  ;;  %v6730_v32 = vld [vmem:[#allocation66_spill] sm:$0xff]  ;;  %v6731_v1 = vld [vmem:[#allocation64_spill] sm:$0xff]  ;;  %v6732_v55 = vld [vmem:[#allocation67_spill] sm:$0xff] }
 0x6aa   :  { %2539 = vmatpush1.bf16.msra.mxu0 %v6715_v56  ;;  %2580 = vmatpush1.bf16.msra.mxu1 %v6716_v59  ;;  %v6733_v56 = vld [vmem:[#allocation68_spill] sm:$0xff]  ;;  %v6734_v59 = vld [vmem:[#allocation69_spill] sm:$0xff] }
 0x6ab   :  { %2540 = vmatprep.subr.bf16.mxu0 %v6717_v60  ;;  %2581 = vmatprep.subr.bf16.mxu1 %v6718_v63 }
 0x6ae   :  { %2541 = vmatpush1.bf16.msra.mxu0 %v6719_v46  ;;  %2582 = vmatpush1.bf16.msra.mxu1 %v6720_v27 }
 0x6af   :  { %2542 = vmatprep.subr.bf16.mxu0 %v6721_v42  ;;  %2583 = vmatprep.subr.bf16.mxu1 %v6722_v53 }
 0x6b2   :  { %2543 = vmatpush1.bf16.msra.mxu0 %v6723_v54  ;;  %2584 = vmatpush1.bf16.msra.mxu1 %v6724_v57 }
 0x6b3   :  { %2544 = vmatprep.subr.bf16.mxu0 %v6725_v58  ;;  %2585 = vmatprep.subr.bf16.mxu1 %v6726_v61 }
 0x6b6   :  { %2545 = vmatpush1.bf16.msra.mxu0 %v6727_v62  ;;  %2586 = vmatpush1.bf16.msra.mxu1 %v6728_v2 }
 0x6b7   :  { %2546 = vmatprep.subr.bf16.mxu0 %v6729_v24  ;;  %2587 = vmatprep.subr.bf16.mxu1 %v6730_v32 }
 0x6ba   :  { %2547 = vmatpush1.bf16.msra.mxu0 %v6731_v1  ;;  %2588 = vmatpush1.bf16.msra.mxu1 %v6732_v55 }
 0x6bb   :  { %2614 = vmatprep.subr.bf16.mxu0 %v6733_v56  ;;  %2655 = vmatprep.subr.bf16.mxu1 %v6734_v59 }
 0x71d   :  { %v2262_v60 = vpop.f32.mrf.mxu0  ;;  %v2303_v63 = vpop.f32.mrf.mxu1 }
 0x71f   :  { %v2264_v46 = vpop.f32.mrf.mxu0  ;;  %v2305_v27 = vpop.f32.mrf.mxu1 }
 0x721   :  { %v2266_v42 = vpop.f32.mrf.mxu0  ;;  %v2307_v53 = vpop.f32.mrf.mxu1 }
 0x723   :  { %v2267_v54 = vpop.f32.mrf.mxu0  ;;  %v2308_v57 = vpop.f32.mrf.mxu1 }
 0x73d   :  { %v2344_v58 = vpop.f32.mrf.mxu0  ;;  %v2385_v61 = vpop.f32.mrf.mxu1 }
 0x73e   :  { %v2345_v62 = vadd.f32 %v2344_v58, %v2262_v60  ;;  %v2386_v53 = vadd.f32 %v2385_v61, %v2303_v63 }
 0x73f   :  { %v2346_v2 = vpop.f32.mrf.mxu0  ;;  %v2387_v24 = vpop.f32.mrf.mxu1 }
 0x740   :  { %v2392_v32 = vadd.f32 %v2345_v62, %v6503_v47  ;;  %v2347_v1 = vadd.f32 %v2346_v2, %v2264_v46  ;;  %v2394_v54 = vadd.f32 %v2386_v53, %v6505_v40  ;;  %v2388_v57 = vadd.f32 %v2387_v24, %v2305_v27  ;;  %v6736_v27 = vld [vmem:[#allocation39_spill] sm:$0xff] }
 0x741   :  { %v2348_v55 = vpop.f32.mrf.mxu0  ;;  %v2389_v56 = vpop.f32.mrf.mxu1 }
 0x742   :  { %v3608_v0 = vmul.f32 -1.442695, %v2392_v32  ;;  %v2393_v59 = vadd.f32 %v2347_v1, %v6504_v17  ;;  %v3610_v60 = vmul.f32 -1.442695, %v2394_v54  ;;  %v2395_v26 = vadd.f32 %v2388_v57, %v6506_v6 }
 0x743   :  { %v2349_v23 = vpop.f32.mrf.mxu0  ;;  %v2390_v44 = vpop.f32.mrf.mxu1 }
 0x744   :  { %3982 = vpow2.f32 %v3608_v0  ;;  %v3609_v42 = vmul.f32 -1.442695, %v2393_v59  ;;  %v6735_v0 = vld [vmem:[#allocation37_spill] sm:$0xff] }
 0x746   :  { %3984 = vpow2.f32 %v3609_v42 }
 0x747   :  { %3986 = vpow2.f32 %v3610_v60 }
 0x751   :  { %v3983_v58 = vpop.eup %3982 }
 0x752   :  { %v2405_v62 = vadd.f32 1.0, %v3983_v58 }
 0x753   :  { %v3985_v46 = vpop.eup %3984 }
 0x754   :  { %3988 = vrcp.f32 %v2405_v62  ;;  %v2406_v2 = vadd.f32 1.0, %v3985_v46  ;;  %v3987_v61 = vpop.eup %3986 }
 0x755   :  { %3990 = vtanh.f32 %v2395_v26  ;;  %v2407_v60 = vadd.f32 1.0, %v3987_v61 }
 0x756   :  { %3992 = vrcp.f32 %v2406_v2 }
 0x75d   :  { %v2454_v23 = vpop.f32.mrf.mxu0  ;;  %v2495_v44 = vpop.f32.mrf.mxu1 }
 0x75e   :  { %v2502_v32 = vadd.f32 %v2454_v23, %v6735_v0  ;;  %v6737_v23 = vld [vmem:[#allocation38_spill] sm:$0xff] }
 0x75f   :  { %v2456_v1 = vpop.f32.mrf.mxu0  ;;  %v2497_v63 = vpop.f32.mrf.mxu1  ;;  %v2504_v0 = vadd.f32 %v2495_v44, %v6737_v23  ;;  %v5742_v23 = vld [vmem:[#allocation4 + $0xec] ss:$16 sps:$4 sm:$0xff]  }
 0x760   :  { %v3611_v55 = vmul.f32 -1.442695, %v2502_v32  ;;  %v2503_v24 = vadd.f32 %v2456_v1, %v6736_v27  ;;  %v6738_v27 = vld [vmem:[#allocation40_spill] sm:$0xff] }
 0x761   :  { %v3989_v56 = vpop.eup %3988  ;;  %v2458_v59 = vpop.f32.mrf.mxu0  ;;  %v3613_v32 = vmul.f32 -1.442695, %v2504_v0  ;;  %v5745_v0 = vld [vmem:[#allocation4 + $0xe0] ss:$16 sps:$4 sm:$0xff]  }
 0x762   :  { %v2499_v42 = vpop.f32.mrf.mxu1  ;;  %v3991_v53 = vpop.eup %3990  ;;  %3994 = vpow2.f32 %v3611_v55  ;;  %v3612_v54 = vmul.f32 -1.442695, %v2503_v24  ;;  %v2505_v55 = vadd.f32 %v2497_v63, %v6738_v27  ;;  %v5754_v27 = vld [vmem:[#allocation4 + $0xcc] ss:$16 sps:$4 sm:$0xff]  }
 0x763   :  { %v3993_v57 = vpop.eup %3992  ;;  %v2459_v26 = vpop.f32.mrf.mxu0  ;;  %v2416_v46 = vmul.f32 %v3991_v53, %v3989_v56  ;;  %6754 = vst [vmem:[#allocation54_spill] sm:$0xff] %v5754_v27 }
 0x764   :  { %v2500_v58 = vpop.f32.mrf.mxu1  ;;  %v2415_v62 = vmul.f32 %v3993_v57, %v5482_v3  ;;  %3996 = vpow2.f32 %v3612_v54  ;;  %v5730_v26 = vld [vmem:[#allocation2 + $0xc] ss:$16 sps:$4 sm:$0xff]  }
 0x765   :  { %3998 = vrcp.f32 %v2407_v60  ;;  %v5727_v60 = vld [vmem:[#allocation2 + $0x4] ss:$16 sps:$4 sm:$0xff]   ;;  %v5733_v58 = vld [vmem:[#allocation2] ss:$16 sps:$4 sm:$0xff]  }
 0x766   :  { %v5636_v2 = vadd.f32 %v2416_v46, %v2415_v62  ;;  %v5736_v62 = vld [vmem:[#allocation2 + $0x8] ss:$16 sps:$4 sm:$0xff]   ;;  %v5739_v46 = vld [vmem:[#allocation4 + $0xe4] ss:$16 sps:$4 sm:$0xff]  }
 0x768   :  { %4000 = vtanh.f32 %v5636_v2 }
 0x769   :  { %4002 = vpow2.f32 %v3613_v32  ;;  %v5748_v32 = vld [vmem:[#allocation4 + $0xe8] ss:$16 sps:$4 sm:$0xff]  }
 0x76a   :  { %6752 = vst [vmem:[#allocation52_spill] sm:$0xff] %v5748_v32 }
 0x76f   :  { %v3995_v1 = vpop.eup %3994 }
 0x770   :  { %v2515_v24 = vadd.f32 1.0, %v3995_v1  ;;  %v5751_v1 = vld [vmem:[#allocation4 + $0xc4] ss:$16 sps:$4 sm:$0xff]  }
 0x771   :  { %v3997_v59 = vpop.eup %3996  ;;  %6753 = vst [vmem:[#allocation57_spill] sm:$0xff] %v5751_v1 }
 0x772   :  { %4004 = vrcp.f32 %v2515_v24  ;;  %v2516_v61 = vadd.f32 1.0, %v3997_v59  ;;  %v3999_v3 = vpop.eup %3998  ;;  %v5762_v24 = vld [vmem:[#allocation4 + $0xc8] ss:$16 sps:$4 sm:$0xff]   ;;  %v5765_v59 = vld [vmem:[#allocation4 + $0xa4] ss:$16 sps:$4 sm:$0xff]  }
 0x773   :  { %4006 = vtanh.f32 %v2505_v55  ;;  %v5759_v55 = vld [vmem:[#allocation4 + $0xc0] ss:$16 sps:$4 sm:$0xff]   ;;  %6756 = vst [vmem:[#allocation17_spill] sm:$0xff] %v5762_v24  ;;  %6757 = vst [vmem:[#allocation19_spill] sm:$0xff] %v5765_v59 }
 0x774   :  { %4008 = vrcp.f32 %v2516_v61  ;;  %6755 = vst [vmem:[#allocation59_spill] sm:$0xff] %v5759_v55  ;;  %v5768_v61 = vld [vmem:[#allocation4 + $0xac] ss:$16 sps:$4 sm:$0xff]  }
 0x775   :  { %v4001_v56 = vpop.eup %4000  ;;  %6758 = vst [vmem:[#allocation18_spill] sm:$0xff] %v5768_v61 }
 0x776   :  { %v2419_v42 = vmul.f32 %v4001_v56, %v3999_v3  ;;  %v4003_v44 = vpop.eup %4002  ;;  %v5771_v3 = vld [vmem:[#allocation4 + $0xa0] ss:$16 sps:$4 sm:$0xff]   ;;  %v5774_v56 = vld [vmem:[#allocation4 + $0xa8] ss:$16 sps:$4 sm:$0xff]  }
 0x777   :  { %6759 = vst [vmem:[#allocation29_spill] sm:$0xff] %v5771_v3  ;;  %6760 = vst [vmem:[#allocation31_spill] sm:$0xff] %v5774_v56 }
 0x778   :  { %v2531_v53 = vpack.c.bf16 %v2419_v42, %v2419_v42  ;;  %v5777_v42 = vld [vmem:[#allocation4 + $0x84] ss:$16 sps:$4 sm:$0xff]  }
 0x779   :  { %6761 = vst [vmem:[#allocation30_spill] sm:$0xff] %v5777_v42 }
 0x77a   :  { %2565 = vmatmul.mubr.bf16.vlgmr.msra.gmra.mxu0 %v2531_v53  ;;  %2606 = vmatmul.mubr.bf16.vlgmr.msra.gmra.mxu1 %v2531_v53  ;;  %v5780_v53 = vld [vmem:[#allocation4 + $0x8c] ss:$16 sps:$4 sm:$0xff]  }
 0x77b   :  { %2615 = vmatpush1.bf16.msra.mxu0 %v5309_v20  ;;  %2656 = vmatpush1.bf16.msra.mxu1 %v5312_v48  ;;  %v2517_v48 = vadd.f32 1.0, %v4003_v44  ;;  %6762 = vst [vmem:[#allocation32_spill] sm:$0xff] %v5780_v53  ;;  %v5783_v44 = vld [vmem:[#allocation4 + $0x80] ss:$16 sps:$4 sm:$0xff]  }
 0x77c   :  { %2616 = vmatprep.subr.bf16.mxu0 %v5315_v21  ;;  %2657 = vmatprep.subr.bf16.mxu1 %v5318_v14  ;;  %6763 = vst [vmem:[#allocation33_spill] sm:$0xff] %v5783_v44 }
 0x77d   :  { %2646 = vmatprep.mubr.bf16.mxu0 %v6430_v5  ;;  %2687 = vmatprep.mubr.bf16.mxu1 %v6430_v5  ;;  %4010 = vrcp.f32 %v2517_v48  ;;  %v5795_v48 = vld [vmem:[#allocation4 + $0x60] ss:$16 sps:$4 sm:$0xff]  }
 0x77e   :  { %6767 = vst [vmem:[#allocation25_spill] sm:$0xff] %v5795_v48 }
 0x77f   :  { %v4005_v63 = vpop.eup %4004  ;;  %2617 = vmatpush1.bf16.msra.mxu0 %v5323_v10  ;;  %2658 = vmatpush1.bf16.msra.mxu1 %v5326_v12 }
 0x780   :  { %v4007_v54 = vpop.eup %4006  ;;  %2618 = vmatprep.subr.bf16.mxu0 %v5329_v22  ;;  %2659 = vmatprep.subr.bf16.mxu1 %v5332_v4 }
 0x781   :  { %v4009_v20 = vpop.eup %4008  ;;  %v2526_v14 = vmul.f32 %v4007_v54, %v4005_v63  ;;  %v5786_v63 = vld [vmem:[#allocation4 + $0x88] ss:$16 sps:$4 sm:$0xff]   ;;  %v5789_v54 = vld [vmem:[#allocation4 + $0x64] ss:$16 sps:$4 sm:$0xff]  }
 0x782   :  { %v2525_v21 = vmul.f32 %v4009_v20, %v5500_v15  ;;  %v5694_v15 = vld [vmem:[#allocation2 + $0x88] ss:$16 sps:$4 sm:$0xff]   ;;  %6764 = vst [vmem:[#allocation35_spill] sm:$0xff] %v5786_v63  ;;  %6765 = vst [vmem:[#allocation34_spill] sm:$0xff] %v5789_v54  ;;  %v5792_v20 = vld [vmem:[#allocation4 + $0x6c] ss:$16 sps:$4 sm:$0xff]  }
 0x783   :  { %2619 = vmatpush1.bf16.msra.mxu0 %v5336_v41  ;;  %2660 = vmatpush1.bf16.msra.mxu1 %v5339_v11  ;;  %v6739_v41 = vld [vmem:[#allocation86_spill] sm:$0xff]  ;;  %v6740_v11 = vld [vmem:[#allocation87_spill] sm:$0xff]  ;;  %6766 = vst [vmem:[#allocation36_spill] sm:$0xff] %v5792_v20 }
 0x784   :  { %v5654_v57 = vadd.f32 %v2526_v14, %v2525_v21  ;;  %2620 = vmatprep.subr.bf16.mxu0 %v5344_v49  ;;  %2661 = vmatprep.subr.bf16.mxu1 %v5347_v7  ;;  %v6741_v49 = vld [vmem:[#allocation88_spill] sm:$0xff]  ;;  %v6742_v7 = vld [vmem:[#allocation89_spill] sm:$0xff] }
 0x785   :  { %v5798_v21 = vld [vmem:[#allocation4 + $0x68] ss:$16 sps:$4 sm:$0xff]   ;;  %v5801_v14 = vld [vmem:[#allocation4 + $0x44] ss:$16 sps:$4 sm:$0xff]  }
 0x786   :  { %4012 = vtanh.f32 %v5654_v57  ;;  %6768 = vst [vmem:[#allocation27_spill] sm:$0xff] %v5798_v21  ;;  %6769 = vst [vmem:[#allocation26_spill] sm:$0xff] %v5801_v14 }
 0x787   :  { %2621 = vmatpush1.bf16.msra.mxu0 %v6679_v29  ;;  %2662 = vmatpush1.bf16.msra.mxu1 %v6680_v28  ;;  %v6749_v29 = vld [vmem:[#allocation53_spill] sm:$0xff]  ;;  %v5698_v28 = vld [vmem:[#allocation2 + $0x6c] ss:$16 sps:$4 sm:$0xff]  }
 0x788   :  { %2622 = vmatprep.subr.bf16.mxu0 %v6681_v16  ;;  %2663 = vmatprep.subr.bf16.mxu1 %v6682_v33  ;;  %v6750_v16 = vld [vmem:[#allocation50_spill] sm:$0xff] }
 0x789   :  { %v5702_v33 = vld [vmem:[#allocation2 + $0x68] ss:$16 sps:$4 sm:$0xff]  }
 0x78a   :  { %v4011_v10 = vpop.eup %4010 }
 0x78b   :  { %2623 = vmatpush1.bf16.msra.mxu0 %v6683_v34  ;;  %2664 = vmatpush1.bf16.msra.mxu1 %v6684_v37  ;;  %v6751_v34 = vld [vmem:[#allocation55_spill] sm:$0xff]  ;;  %v5706_v37 = vld [vmem:[#allocation2 + $0x4c] ss:$16 sps:$4 sm:$0xff]  }
 0x78c   :  { %2624 = vmatprep.subr.bf16.mxu0 %v6685_v36  ;;  %2665 = vmatprep.subr.bf16.mxu1 %v6686_v45  ;;  %v5709_v36 = vld [vmem:[#allocation2 + $0x40] ss:$16 sps:$4 sm:$0xff]   ;;  %v5712_v45 = vld [vmem:[#allocation2 + $0x48] ss:$16 sps:$4 sm:$0xff]  }
 0x78f   :  { %2625 = vmatpush1.bf16.msra.mxu0 %v6687_v43  ;;  %2666 = vmatpush1.bf16.msra.mxu1 %v6688_v19  ;;  %v5715_v43 = vld [vmem:[#allocation2 + $0x24] ss:$16 sps:$4 sm:$0xff]   ;;  %v5718_v19 = vld [vmem:[#allocation2 + $0x2c] ss:$16 sps:$4 sm:$0xff]  }
 0x790   :  { %2626 = vmatprep.subr.bf16.mxu0 %v6689_v50  ;;  %2667 = vmatprep.subr.bf16.mxu1 %v6690_v9  ;;  %v5721_v50 = vld [vmem:[#allocation2 + $0x20] ss:$16 sps:$4 sm:$0xff]   ;;  %v5724_v9 = vld [vmem:[#allocation2 + $0x28] ss:$16 sps:$4 sm:$0xff]  }
 0x793   :  { %v4013_v12 = vpop.eup %4012  ;;  %2627 = vmatpush1.bf16.msra.mxu0 %v5387_v13  ;;  %2668 = vmatpush1.bf16.msra.mxu1 %v5390_v51  ;;  %v6745_v13 = vld [vmem:[#allocation93_spill] sm:$0xff]  ;;  %v6746_v51 = vld [vmem:[#allocation95_spill] sm:$0xff] }
 0x794   :  { %2628 = vmatprep.subr.bf16.mxu0 %v5393_v31  ;;  %2669 = vmatprep.subr.bf16.mxu1 %v5396_v38  ;;  %v2529_v22 = vmul.f32 %v4013_v12, %v4011_v10  ;;  %v6747_v31 = vld [vmem:[#allocation51_spill] sm:$0xff]  ;;  %v6748_v38 = vld [vmem:[#allocation49_spill] sm:$0xff]  ;;  %v5804_v10 = vld [vmem:[#allocation4 + $0x4c] ss:$16 sps:$4 sm:$0xff]  }
 0x795   :  { %6770 = vst [vmem:[#allocation28_spill] sm:$0xff] %v5804_v10  ;;  %v5807_v12 = vld [vmem:[#allocation4 + $0x40] ss:$16 sps:$4 sm:$0xff]  }
 0x796   :  { %v2530_v4 = vpack.c.bf16 %v2529_v22, %v2529_v22  ;;  %6771 = vst [vmem:[#allocation77_spill] sm:$0xff] %v5807_v12  ;;  %v5810_v22 = vld [vmem:[#allocation4 + $0x48] ss:$16 sps:$4 sm:$0xff]  }
 0x797   :  { %2629 = vmatpush1.bf16.msra.mxu0 %v5399_v25  ;;  %2670 = vmatpush1.bf16.msra.mxu1 %v5402_v8  ;;  %v6743_v8 = vld [vmem:[#allocation90_spill] sm:$0xff]  ;;  %v6744_v25 = vld [vmem:[#allocation91_spill] sm:$0xff]  ;;  %6772 = vst [vmem:[#allocation79_spill] sm:$0xff] %v5810_v22 }
 0x798   :  { %2724 = vmatprep.subr.bf16.mxu0 %v5523_v39  ;;  %2765 = vmatprep.subr.bf16.mxu1 %v5526_v18 }
 0x79a   :  { %2647 = vmatmul.mubr.bf16.vlgmr.msra.gmra.mxu0 %v2530_v4  ;;  %2688 = vmatmul.mubr.bf16.vlgmr.msra.gmra.mxu1 %v2530_v4 }
 0x79b   :  { %2725 = vmatpush1.bf16.msra.mxu0 %v5529_v52  ;;  %2766 = vmatpush1.bf16.msra.mxu1 %v6739_v41 }
 0x79c   :  { %2726 = vmatprep.subr.bf16.mxu0 %v6740_v11  ;;  %2767 = vmatprep.subr.bf16.mxu1 %v6741_v49 }
 0x79d   :  { %2756 = vmatprep.mubr.bf16.mxu0 %v6430_v5  ;;  %2797 = vmatprep.mubr.bf16.mxu1 %v6430_v5 }
 0x79f   :  { %2727 = vmatpush1.bf16.msra.mxu0 %v6742_v7  ;;  %2768 = vmatpush1.bf16.msra.mxu1 %v6743_v8 }
 0x7a0   :  { %2728 = vmatprep.subr.bf16.mxu0 %v6744_v25  ;;  %2769 = vmatprep.subr.bf16.mxu1 %v6745_v13 }
 0x7a3   :  { %2729 = vmatpush1.bf16.msra.mxu0 %v5555_v30  ;;  %2770 = vmatpush1.bf16.msra.mxu1 %v6746_v51 }
 0x7a4   :  { %2730 = vmatprep.subr.bf16.mxu0 %v6747_v31  ;;  %2771 = vmatprep.subr.bf16.mxu1 %v5564_v35 }
 0x7a7   :  { %2731 = vmatpush1.bf16.msra.mxu0 %v6748_v38  ;;  %2772 = vmatpush1.bf16.msra.mxu1 %v5694_v15 }
 0x7a8   :  { %2732 = vmatprep.subr.bf16.mxu0 %v6749_v29  ;;  %2773 = vmatprep.subr.bf16.mxu1 %v5698_v28 }
 0x7ab   :  { %2733 = vmatpush1.bf16.msra.mxu0 %v6750_v16  ;;  %2774 = vmatpush1.bf16.msra.mxu1 %v5702_v33 }
 0x7ac   :  { %2734 = vmatprep.subr.bf16.mxu0 %v6751_v34  ;;  %2775 = vmatprep.subr.bf16.mxu1 %v5706_v37 }
 0x7af   :  { %2735 = vmatpush1.bf16.msra.mxu0 %v5709_v36  ;;  %2776 = vmatpush1.bf16.msra.mxu1 %v5712_v45 }
 0x7b0   :  { %2736 = vmatprep.subr.bf16.mxu0 %v5715_v43  ;;  %2777 = vmatprep.subr.bf16.mxu1 %v5718_v19 }
 0x7b3   :  { %2737 = vmatpush1.bf16.msra.mxu0 %v5721_v50  ;;  %2778 = vmatpush1.bf16.msra.mxu1 %v5724_v9 }
 0x7b4   :  { %2738 = vmatprep.subr.bf16.mxu0 %v5727_v60  ;;  %2779 = vmatprep.subr.bf16.mxu1 %v5730_v26 }
 0x7b7   :  { %2739 = vmatpush1.bf16.msra.mxu0 %v5733_v58  ;;  %2780 = vmatpush1.bf16.msra.mxu1 %v5736_v62 }
 0x7b8   :  { %2836 = vmatprep.subr.bf16.mxu0 %v5739_v46  ;;  %2877 = vmatprep.subr.bf16.mxu1 %v5742_v23 }
 0x7ba   :  { %2757 = vmatmul.mubr.bf16.vlgmr.msra.gmra.mxu0 %v2530_v4  ;;  %2798 = vmatmul.mubr.bf16.vlgmr.msra.gmra.mxu1 %v2530_v4  ;;  %v5813_v4 = vld [vmem:[#allocation4 + $0x24] ss:$16 sps:$4 sm:$0xff]  }
 0x7bb   :  { %2837 = vmatpush1.bf16.msra.mxu0 %v5745_v0  ;;  %2878 = vmatpush1.bf16.msra.mxu1 %v5748_v32  ;;  %6773 = vst [vmem:[#allocation80_spill] sm:$0xff] %v5813_v4 }
 0x7bc   :  { %2838 = vmatprep.subr.bf16.mxu0 %v5751_v1  ;;  %2879 = vmatprep.subr.bf16.mxu1 %v5754_v27 }
 0x7bd   :  { %2868 = vmatprep.mubr.bf16.mxu0 %v6430_v5  ;;  %2909 = vmatprep.mubr.bf16.mxu1 %v6430_v5 }
 0x7bf   :  { %2839 = vmatpush1.bf16.msra.mxu0 %v5759_v55  ;;  %2880 = vmatpush1.bf16.msra.mxu1 %v5762_v24 }
 0x7c0   :  { %2840 = vmatprep.subr.bf16.mxu0 %v5765_v59  ;;  %2881 = vmatprep.subr.bf16.mxu1 %v5768_v61 }
 0x7c3   :  { %2841 = vmatpush1.bf16.msra.mxu0 %v5771_v3  ;;  %2882 = vmatpush1.bf16.msra.mxu1 %v5774_v56 }
 0x7c4   :  { %2842 = vmatprep.subr.bf16.mxu0 %v5777_v42  ;;  %2883 = vmatprep.subr.bf16.mxu1 %v5780_v53 }
 0x7c7   :  { %2843 = vmatpush1.bf16.msra.mxu0 %v5783_v44  ;;  %2884 = vmatpush1.bf16.msra.mxu1 %v5786_v63 }
 0x7c8   :  { %2844 = vmatprep.subr.bf16.mxu0 %v5789_v54  ;;  %2885 = vmatprep.subr.bf16.mxu1 %v5792_v20 }
 0x7cb   :  { %2845 = vmatpush1.bf16.msra.mxu0 %v5795_v48  ;;  %2886 = vmatpush1.bf16.msra.mxu1 %v5798_v21  ;;  %v5816_v21 = vld [vmem:[#allocation4 + $0x2c] ss:$16 sps:$4 sm:$0xff]  }
 0x7cc   :  { %2846 = vmatprep.subr.bf16.mxu0 %v5801_v14  ;;  %2887 = vmatprep.subr.bf16.mxu1 %v5804_v10  ;;  %6774 = vst [vmem:[#allocation81_spill] sm:$0xff] %v5816_v21  ;;  %v5819_v14 = vld [vmem:[#allocation4 + $0x20] ss:$16 sps:$4 sm:$0xff]   ;;  %v5822_v10 = vld [vmem:[#allocation4 + $0x28] ss:$16 sps:$4 sm:$0xff]  }
 0x7cd   :  { %6775 = vst [vmem:[#allocation82_spill] sm:$0xff] %v5819_v14  ;;  %6776 = vst [vmem:[#allocation83_spill] sm:$0xff] %v5822_v10 }
 0x7cf   :  { %2847 = vmatpush1.bf16.msra.mxu0 %v5807_v12  ;;  %2888 = vmatpush1.bf16.msra.mxu1 %v5810_v22  ;;  %v5825_v12 = vld [vmem:[#allocation4 + $0x4] ss:$16 sps:$4 sm:$0xff]   ;;  %v5828_v22 = vld [vmem:[#allocation4 + $0xc] ss:$16 sps:$4 sm:$0xff]  }
 0x7d0   :  { %2848 = vmatprep.subr.bf16.mxu0 %v5813_v4  ;;  %2889 = vmatprep.subr.bf16.mxu1 %v5816_v21  ;;  %6777 = vst [vmem:[#allocation84_spill] sm:$0xff] %v5825_v12  ;;  %6778 = vst [vmem:[#allocation85_spill] sm:$0xff] %v5828_v22  ;;  %v5831_v4 = vld [vmem:[#allocation4] ss:$16 sps:$4 sm:$0xff]   ;;  %v5834_v21 = vld [vmem:[#allocation4 + $0x8] ss:$16 sps:$4 sm:$0xff]  }
 0x7d1   :  { %6779 = vst [vmem:[#allocation20_spill] sm:$0xff] %v5831_v4  ;;  %6780 = vst [vmem:[#allocation21_spill] sm:$0xff] %v5834_v21 }
 0x7d3   :  { %2849 = vmatpush1.bf16.msra.mxu0 %v5819_v14  ;;  %2890 = vmatpush1.bf16.msra.mxu1 %v5822_v10  ;;  %v5837_v14 = vld [vmem:[#allocation3 + $0xe4] ss:$16 sps:$4 sm:$0xff]   ;;  %v5840_v10 = vld [vmem:[#allocation3 + $0xec] ss:$16 sps:$4 sm:$0xff]  }
 0x7d4   :  { %2850 = vmatprep.subr.bf16.mxu0 %v5825_v12  ;;  %2891 = vmatprep.subr.bf16.mxu1 %v5828_v22  ;;  %6781 = vst [vmem:[#allocation23_spill] sm:$0xff] %v5837_v14  ;;  %6782 = vst [vmem:[#allocation22_spill] sm:$0xff] %v5840_v10 }
 0x7d7   :  { %2851 = vmatpush1.bf16.msra.mxu0 %v5831_v4  ;;  %2892 = vmatpush1.bf16.msra.mxu1 %v5834_v21 }
 0x7d8   :  { %2918 = vmatprep.subr.bf16.mxu0 %v5837_v14  ;;  %2959 = vmatprep.subr.bf16.mxu1 %v5840_v10 }
 0x83a   :  { %v2566_v12 = vpop.f32.mrf.mxu0  ;;  %v2607_v48 = vpop.f32.mrf.mxu1 }
 0x83c   :  { %v2568_v20 = vpop.f32.mrf.mxu0  ;;  %v2609_v22 = vpop.f32.mrf.mxu1 }
 0x83e   :  { %v2570_v54 = vpop.f32.mrf.mxu0  ;;  %v2611_v63 = vpop.f32.mrf.mxu1 }
 0x840   :  { %v2571_v44 = vpop.f32.mrf.mxu0  ;;  %v2612_v4 = vpop.f32.mrf.mxu1 }
 0x85a   :  { %v2648_v53 = vpop.f32.mrf.mxu0  ;;  %v2689_v42 = vpop.f32.mrf.mxu1 }
 0x85b   :  { %v2649_v56 = vadd.f32 %v2648_v53, %v2566_v12  ;;  %v2690_v44 = vadd.f32 %v2689_v42, %v2607_v48 }
 0x85c   :  { %v2650_v21 = vpop.f32.mrf.mxu0  ;;  %v2691_v3 = vpop.f32.mrf.mxu1 }
 0x85d   :  { %v2696_v61 = vadd.f32 %v2649_v56, %v6503_v47  ;;  %v2651_v14 = vadd.f32 %v2650_v21, %v2568_v20  ;;  %v2698_v63 = vadd.f32 %v2690_v44, %v6505_v40  ;;  %v2692_v4 = vadd.f32 %v2691_v3, %v2609_v22  ;;  %v6784_v3 = vld [vmem:[#allocation43_spill] sm:$0xff] }
 0x85e   :  { %v2652_v59 = vpop.f32.mrf.mxu0  ;;  %v2693_v24 = vpop.f32.mrf.mxu1 }
 0x85f   :  { %v3614_v55 = vmul.f32 -1.442695, %v2696_v61  ;;  %v2697_v10 = vadd.f32 %v2651_v14, %v6504_v17  ;;  %v3616_v53 = vmul.f32 -1.442695, %v2698_v63  ;;  %v2699_v32 = vadd.f32 %v2692_v4, %v6506_v6 }
 0x860   :  { %v2653_v27 = vpop.f32.mrf.mxu0  ;;  %v2694_v1 = vpop.f32.mrf.mxu1 }
 0x861   :  { %4014 = vpow2.f32 %v3614_v55  ;;  %v3615_v54 = vmul.f32 -1.442695, %v2697_v10  ;;  %v6783_v55 = vld [vmem:[#allocation41_spill] sm:$0xff] }
 0x863   :  { %4016 = vpow2.f32 %v3615_v54 }
 0x864   :  { %4018 = vpow2.f32 %v3616_v53 }
 0x86e   :  { %v4015_v12 = vpop.eup %4014 }
 0x86f   :  { %v2709_v56 = vadd.f32 1.0, %v4015_v12 }
 0x870   :  { %v4017_v20 = vpop.eup %4016 }
 0x871   :  { %4020 = vrcp.f32 %v2709_v56  ;;  %v2710_v24 = vadd.f32 1.0, %v4017_v20  ;;  %v4019_v48 = vpop.eup %4018 }
 0x872   :  { %4022 = vtanh.f32 %v2699_v32  ;;  %v2711_v53 = vadd.f32 1.0, %v4019_v48 }
 0x873   :  { %4024 = vrcp.f32 %v2710_v24 }
 0x87a   :  { %v2758_v27 = vpop.f32.mrf.mxu0  ;;  %v2799_v1 = vpop.f32.mrf.mxu1 }
 0x87b   :  { %v2806_v59 = vadd.f32 %v2758_v27, %v6783_v55  ;;  %v6785_v27 = vld [vmem:[#allocation42_spill] sm:$0xff] }
 0x87c   :  { %v2760_v61 = vpop.f32.mrf.mxu0  ;;  %v2801_v42 = vpop.f32.mrf.mxu1  ;;  %v2808_v55 = vadd.f32 %v2799_v1, %v6785_v27  ;;  %v5858_v1 = vld [vmem:[#allocation3 + $0xe8] ss:$16 sps:$4 sm:$0xff]   ;;  %v5875_v27 = vld [vmem:[#allocation3 + $0xa4] ss:$16 sps:$4 sm:$0xff]  }
 0x87d   :  { %v3617_v21 = vmul.f32 -1.442695, %v2806_v59  ;;  %v2807_v14 = vadd.f32 %v2760_v61, %v6784_v3  ;;  %v6786_v3 = vld [vmem:[#allocation44_spill] sm:$0xff] }
 0x87e   :  { %v4021_v10 = vpop.eup %4020  ;;  %v2762_v22 = vpop.f32.mrf.mxu0  ;;  %v3619_v59 = vmul.f32 -1.442695, %v2808_v55  ;;  %v5878_v55 = vld [vmem:[#allocation3 + $0xac] ss:$16 sps:$4 sm:$0xff]  }
 0x87f   :  { %v2803_v54 = vpop.f32.mrf.mxu1  ;;  %v4023_v44 = vpop.eup %4022  ;;  %4026 = vpow2.f32 %v3617_v21  ;;  %v3618_v63 = vmul.f32 -1.442695, %v2807_v14  ;;  %v2809_v21 = vadd.f32 %v2801_v42, %v6786_v3  ;;  %v5861_v42 = vld [vmem:[#allocation3 + $0xc4] ss:$16 sps:$4 sm:$0xff]  }
 0x880   :  { %v4025_v4 = vpop.eup %4024  ;;  %v2763_v32 = vpop.f32.mrf.mxu0  ;;  %v2720_v20 = vmul.f32 %v4023_v44, %v4021_v10 }
 0x881   :  { %v2804_v12 = vpop.f32.mrf.mxu1  ;;  %v2719_v56 = vmul.f32 %v4025_v4, %v5636_v2  ;;  %4028 = vpow2.f32 %v3618_v63  ;;  %v5855_v63 = vld [vmem:[#allocation3 + $0xe0] ss:$16 sps:$4 sm:$0xff]   ;;  %v5864_v4 = vld [vmem:[#allocation3 + $0xcc] ss:$16 sps:$4 sm:$0xff]  }
 0x882   :  { %4030 = vrcp.f32 %v2711_v53  ;;  %v5869_v12 = vld [vmem:[#allocation3 + $0xc0] ss:$16 sps:$4 sm:$0xff]  }
 0x883   :  { %v5850_v24 = vadd.f32 %v2720_v20, %v2719_v56  ;;  %v5872_v56 = vld [vmem:[#allocation3 + $0xc8] ss:$16 sps:$4 sm:$0xff]  }
 0x885   :  { %4032 = vtanh.f32 %v5850_v24 }
 0x886   :  { %4034 = vpow2.f32 %v3619_v59 }
 0x88c   :  { %v4027_v61 = vpop.eup %4026 }
 0x88d   :  { %v2819_v14 = vadd.f32 1.0, %v4027_v61 }
 0x88e   :  { %v4029_v22 = vpop.eup %4028 }
 0x88f   :  { %4036 = vrcp.f32 %v2819_v14  ;;  %v2820_v48 = vadd.f32 1.0, %v4029_v22  ;;  %v4031_v2 = vpop.eup %4030  ;;  %v5882_v14 = vld [vmem:[#allocation3 + $0xa0] ss:$16 sps:$4 sm:$0xff]   ;;  %v5885_v22 = vld [vmem:[#allocation3 + $0xa8] ss:$16 sps:$4 sm:$0xff]  }
 0x890   :  { %4038 = vtanh.f32 %v2809_v21 }
 0x891   :  { %4040 = vrcp.f32 %v2820_v48 }
 0x892   :  { %v4033_v10 = vpop.eup %4032 }
 0x893   :  { %v2723_v54 = vmul.f32 %v4033_v10, %v4031_v2  ;;  %v4035_v53 = vpop.eup %4034  ;;  %v5890_v2 = vld [vmem:[#allocation3 + $0x84] ss:$16 sps:$4 sm:$0xff]   ;;  %v5893_v10 = vld [vmem:[#allocation3 + $0x8c] ss:$16 sps:$4 sm:$0xff]  }
 0x894   :  { %v2821_v61 = vadd.f32 1.0, %v4035_v53  ;;  %v5906_v53 = vld [vmem:[#allocation3 + $0x6c] ss:$16 sps:$4 sm:$0xff]  }
 0x895   :  { %v2835_v44 = vpack.c.bf16 %v2723_v54, %v2723_v54  ;;  %v5900_v54 = vld [vmem:[#allocation3 + $0x88] ss:$16 sps:$4 sm:$0xff]   ;;  %6790 = vst [vmem:[#allocation72_spill] sm:$0xff] %v5906_v53 }
 0x896   :  { %4042 = vrcp.f32 %v2821_v61  ;;  %6788 = vst [vmem:[#allocation70_spill] sm:$0xff] %v5900_v54  ;;  %v5918_v61 = vld [vmem:[#allocation3 + $0x4c] ss:$16 sps:$4 sm:$0xff]  }
 0x897   :  { %2869 = vmatmul.mubr.bf16.vlgmr.msra.gmra.mxu0 %v2835_v44  ;;  %2910 = vmatmul.mubr.bf16.vlgmr.msra.gmra.mxu1 %v2835_v44  ;;  %v5903_v44 = vld [vmem:[#allocation3 + $0x64] ss:$16 sps:$4 sm:$0xff]   ;;  %6794 = vst [vmem:[#allocation76_spill] sm:$0xff] %v5918_v61 }
 0x898   :  { %2919 = vmatpush1.bf16.msra.mxu0 %v5855_v63  ;;  %2960 = vmatpush1.bf16.msra.mxu1 %v5858_v1  ;;  %6789 = vst [vmem:[#allocation71_spill] sm:$0xff] %v5903_v44 }
 0x899   :  { %2920 = vmatprep.subr.bf16.mxu0 %v5861_v42  ;;  %2961 = vmatprep.subr.bf16.mxu1 %v5864_v4 }
 0x89a   :  { %2950 = vmatprep.mubr.bf16.mxu0 %v6430_v5  ;;  %2991 = vmatprep.mubr.bf16.mxu1 %v6430_v5 }
 0x89c   :  { %v4037_v32 = vpop.eup %4036  ;;  %2921 = vmatpush1.bf16.msra.mxu0 %v5869_v12  ;;  %2962 = vmatpush1.bf16.msra.mxu1 %v5872_v56 }
 0x89d   :  { %v4039_v20 = vpop.eup %4038  ;;  %2922 = vmatprep.subr.bf16.mxu0 %v5875_v27  ;;  %2963 = vmatprep.subr.bf16.mxu1 %v5878_v55 }
 0x89e   :  { %v4041_v59 = vpop.eup %4040  ;;  %v2830_v21 = vmul.f32 %v4039_v20, %v4037_v32  ;;  %v5909_v32 = vld [vmem:[#allocation3 + $0x60] ss:$16 sps:$4 sm:$0xff]   ;;  %v5912_v20 = vld [vmem:[#allocation3 + $0x68] ss:$16 sps:$4 sm:$0xff]  }
 0x89f   :  { %v2829_v3 = vmul.f32 %v4041_v59, %v5654_v57  ;;  %v5897_v57 = vld [vmem:[#allocation3 + $0x80] ss:$16 sps:$4 sm:$0xff]   ;;  %6791 = vst [vmem:[#allocation73_spill] sm:$0xff] %v5909_v32  ;;  %6792 = vst [vmem:[#allocation74_spill] sm:$0xff] %v5912_v20  ;;  %v5915_v59 = vld [vmem:[#allocation3 + $0x44] ss:$16 sps:$4 sm:$0xff]  }
 0x8a0   :  { %2923 = vmatpush1.bf16.msra.mxu0 %v5882_v14  ;;  %2964 = vmatpush1.bf16.msra.mxu1 %v5885_v22  ;;  %6787 = vst [vmem:[#allocation24_spill] sm:$0xff] %v5897_v57  ;;  %6793 = vst [vmem:[#allocation75_spill] sm:$0xff] %v5915_v59 }
 0x8a1   :  { %v5888_v48 = vadd.f32 %v2830_v21, %v2829_v3  ;;  %2924 = vmatprep.subr.bf16.mxu0 %v5890_v2  ;;  %2965 = vmatprep.subr.bf16.mxu1 %v5893_v10  ;;  %v5921_v3 = vld [vmem:[#allocation3 + $0x40] ss:$16 sps:$4 sm:$0xff]   ;;  %v5924_v21 = vld [vmem:[#allocation3 + $0x48] ss:$16 sps:$4 sm:$0xff]  }
 0x8a2   :  { %6795 = vst [vmem:[#allocation78_spill] sm:$0xff] %v5921_v3  ;;  %6796 = vst [vmem:[#allocation92_spill] sm:$0xff] %v5924_v21 }
 0x8a3   :  { %4044 = vtanh.f32 %v5888_v48 }
 0x8a4   :  { %2925 = vmatpush1.bf16.msra.mxu0 %v5897_v57  ;;  %2966 = vmatpush1.bf16.msra.mxu1 %v5900_v54  ;;  %v5945_v54 = vld [vmem:[#allocation3] ss:$16 sps:$4 sm:$0xff]   ;;  %v5948_v57 = vld [vmem:[#allocation3 + $0x8] ss:$16 sps:$4 sm:$0xff]  }
 0x8a5   :  { %2926 = vmatprep.subr.bf16.mxu0 %v5903_v44  ;;  %2967 = vmatprep.subr.bf16.mxu1 %v5906_v53  ;;  %v5933_v44 = vld [vmem:[#allocation3 + $0x20] ss:$16 sps:$4 sm:$0xff]  }
 0x8a8   :  { %2927 = vmatpush1.bf16.msra.mxu0 %v5909_v32  ;;  %2968 = vmatpush1.bf16.msra.mxu1 %v5912_v20  ;;  %v5927_v32 = vld [vmem:[#allocation3 + $0x24] ss:$16 sps:$4 sm:$0xff]   ;;  %v5930_v20 = vld [vmem:[#allocation3 + $0x2c] ss:$16 sps:$4 sm:$0xff]  }
 0x8a9   :  { %2928 = vmatprep.subr.bf16.mxu0 %v5915_v59  ;;  %2969 = vmatprep.subr.bf16.mxu1 %v5918_v61  ;;  %6797 = vst [vmem:[#allocation94_spill] sm:$0xff] %v5927_v32  ;;  %6798 = vst [vmem:[#allocation96_spill] sm:$0xff] %v5930_v20  ;;  %v4043_v59 = vpop.eup %4042  ;;  %v5936_v61 = vld [vmem:[#allocation3 + $0x28] ss:$16 sps:$4 sm:$0xff]  }
 0x8ac   :  { %2929 = vmatpush1.bf16.msra.mxu0 %v5921_v3  ;;  %2970 = vmatpush1.bf16.msra.mxu1 %v5924_v21  ;;  %v5939_v3 = vld [vmem:[#allocation3 + $0x4] ss:$16 sps:$4 sm:$0xff]   ;;  %v5942_v21 = vld [vmem:[#allocation3 + $0xc] ss:$16 sps:$4 sm:$0xff]  }
 0x8ad   :  { %2930 = vmatprep.subr.bf16.mxu0 %v5927_v32  ;;  %2971 = vmatprep.subr.bf16.mxu1 %v5930_v20 }
 0x8b0   :  { %v4045_v53 = vpop.eup %4044  ;;  %2931 = vmatpush1.bf16.msra.mxu0 %v5933_v44  ;;  %2972 = vmatpush1.bf16.msra.mxu1 %v5936_v61 }
 0x8b1   :  { %2932 = vmatprep.subr.bf16.mxu0 %v5939_v3  ;;  %2973 = vmatprep.subr.bf16.mxu1 %v5942_v21  ;;  %v2833_v32 = vmul.f32 %v4045_v53, %v4043_v59 }
 0x8b3   :  { %v2834_v20 = vpack.c.bf16 %v2833_v32, %v2833_v32 }
 0x8b4   :  { %2933 = vmatpush1.bf16.msra.mxu0 %v5945_v54  ;;  %2974 = vmatpush1.bf16.msra.mxu1 %v5948_v57 }
 0x8b5   :  { %3028 = vmatprep.subr.bf16.mxu0 %v5523_v39  ;;  %3069 = vmatprep.subr.bf16.mxu1 %v5526_v18  ;;  %v6799_v39 = vld [vmem:[#allocation52_spill] sm:$0xff]  ;;  %v6800_v18 = vld [vmem:[#allocation57_spill] sm:$0xff] }
 0x8b7   :  { %2951 = vmatmul.mubr.bf16.vlgmr.msra.gmra.mxu0 %v2834_v20  ;;  %2992 = vmatmul.mubr.bf16.vlgmr.msra.gmra.mxu1 %v2834_v20 }
 0x8b8   :  { %3029 = vmatpush1.bf16.msra.mxu0 %v5529_v52  ;;  %3070 = vmatpush1.bf16.msra.mxu1 %v6739_v41  ;;  %v6801_v52 = vld [vmem:[#allocation54_spill] sm:$0xff]  ;;  %v6804_v41 = vld [vmem:[#allocation19_spill] sm:$0xff] }
 0x8b9   :  { %3030 = vmatprep.subr.bf16.mxu0 %v6740_v11  ;;  %3071 = vmatprep.subr.bf16.mxu1 %v6741_v49  ;;  %v6805_v11 = vld [vmem:[#allocation18_spill] sm:$0xff]  ;;  %v6806_v49 = vld [vmem:[#allocation29_spill] sm:$0xff] }
 0x8ba   :  { %3060 = vmatprep.mubr.bf16.mxu0 %v6430_v5  ;;  %3101 = vmatprep.mubr.bf16.mxu1 %v6430_v5 }
 0x8bc   :  { %3031 = vmatpush1.bf16.msra.mxu0 %v6742_v7  ;;  %3072 = vmatpush1.bf16.msra.mxu1 %v6743_v8  ;;  %v6807_v7 = vld [vmem:[#allocation31_spill] sm:$0xff]  ;;  %v6808_v8 = vld [vmem:[#allocation30_spill] sm:$0xff] }
 0x8bd   :  { %3032 = vmatprep.subr.bf16.mxu0 %v6744_v25  ;;  %3073 = vmatprep.subr.bf16.mxu1 %v6745_v13  ;;  %v6809_v25 = vld [vmem:[#allocation32_spill] sm:$0xff]  ;;  %v6810_v13 = vld [vmem:[#allocation33_spill] sm:$0xff] }
 0x8c0   :  { %3033 = vmatpush1.bf16.msra.mxu0 %v5555_v30  ;;  %3074 = vmatpush1.bf16.msra.mxu1 %v6746_v51  ;;  %v6802_v30 = vld [vmem:[#allocation59_spill] sm:$0xff] }
 0x8c1   :  { %3034 = vmatprep.subr.bf16.mxu0 %v6747_v31  ;;  %3075 = vmatprep.subr.bf16.mxu1 %v5564_v35  ;;  %v6803_v35 = vld [vmem:[#allocation17_spill] sm:$0xff]  ;;  %v6811_v51 = vld [vmem:[#allocation35_spill] sm:$0xff]  ;;  %v6812_v31 = vld [vmem:[#allocation34_spill] sm:$0xff] }
 0x8c4   :  { %3035 = vmatpush1.bf16.msra.mxu0 %v6748_v38  ;;  %3076 = vmatpush1.bf16.msra.mxu1 %v5694_v15  ;;  %v6813_v38 = vld [vmem:[#allocation36_spill] sm:$0xff]  ;;  %v6814_v15 = vld [vmem:[#allocation25_spill] sm:$0xff] }
 0x8c5   :  { %3036 = vmatprep.subr.bf16.mxu0 %v6749_v29  ;;  %3077 = vmatprep.subr.bf16.mxu1 %v5698_v28  ;;  %v6815_v29 = vld [vmem:[#allocation27_spill] sm:$0xff]  ;;  %v6816_v28 = vld [vmem:[#allocation26_spill] sm:$0xff] }
 0x8c8   :  { %3037 = vmatpush1.bf16.msra.mxu0 %v6750_v16  ;;  %3078 = vmatpush1.bf16.msra.mxu1 %v5702_v33  ;;  %v6817_v16 = vld [vmem:[#allocation28_spill] sm:$0xff]  ;;  %v6818_v33 = vld [vmem:[#allocation77_spill] sm:$0xff] }
 0x8c9   :  { %3038 = vmatprep.subr.bf16.mxu0 %v6751_v34  ;;  %3079 = vmatprep.subr.bf16.mxu1 %v5706_v37  ;;  %v6819_v34 = vld [vmem:[#allocation79_spill] sm:$0xff]  ;;  %v6820_v37 = vld [vmem:[#allocation80_spill] sm:$0xff] }
 0x8cc   :  { %3039 = vmatpush1.bf16.msra.mxu0 %v5709_v36  ;;  %3080 = vmatpush1.bf16.msra.mxu1 %v5712_v45  ;;  %v6821_v36 = vld [vmem:[#allocation81_spill] sm:$0xff]  ;;  %v6822_v45 = vld [vmem:[#allocation82_spill] sm:$0xff] }
 0x8cd   :  { %3040 = vmatprep.subr.bf16.mxu0 %v5715_v43  ;;  %3081 = vmatprep.subr.bf16.mxu1 %v5718_v19  ;;  %v6823_v43 = vld [vmem:[#allocation83_spill] sm:$0xff]  ;;  %v6824_v19 = vld [vmem:[#allocation84_spill] sm:$0xff] }
 0x8d0   :  { %3041 = vmatpush1.bf16.msra.mxu0 %v5721_v50  ;;  %3082 = vmatpush1.bf16.msra.mxu1 %v5724_v9  ;;  %v6825_v50 = vld [vmem:[#allocation85_spill] sm:$0xff]  ;;  %v6826_v9 = vld [vmem:[#allocation20_spill] sm:$0xff] }
 0x8d1   :  { %3042 = vmatprep.subr.bf16.mxu0 %v5727_v60  ;;  %3083 = vmatprep.subr.bf16.mxu1 %v5730_v26  ;;  %v6827_v60 = vld [vmem:[#allocation21_spill] sm:$0xff]  ;;  %v6828_v26 = vld [vmem:[#allocation23_spill] sm:$0xff] }
 0x8d4   :  { %3043 = vmatpush1.bf16.msra.mxu0 %v5733_v58  ;;  %3084 = vmatpush1.bf16.msra.mxu1 %v5736_v62  ;;  %v6829_v58 = vld [vmem:[#allocation22_spill] sm:$0xff] }
 0x8d5   :  { %3140 = vmatprep.subr.bf16.mxu0 %v5739_v46  ;;  %3181 = vmatprep.subr.bf16.mxu1 %v5742_v23 }
 0x8d7   :  { %3061 = vmatmul.mubr.bf16.vlgmr.msra.gmra.mxu0 %v2834_v20  ;;  %3102 = vmatmul.mubr.bf16.vlgmr.msra.gmra.mxu1 %v2834_v20 }
 0x8d8   :  { %3141 = vmatpush1.bf16.msra.mxu0 %v5745_v0  ;;  %3182 = vmatpush1.bf16.msra.mxu1 %v6799_v39 }
 0x8d9   :  { %3142 = vmatprep.subr.bf16.mxu0 %v6800_v18  ;;  %3183 = vmatprep.subr.bf16.mxu1 %v6801_v52 }
 0x8da   :  { %3172 = vmatprep.mubr.bf16.mxu0 %v6430_v5  ;;  %3213 = vmatprep.mubr.bf16.mxu1 %v6430_v5 }
 0x8dc   :  { %3143 = vmatpush1.bf16.msra.mxu0 %v6802_v30  ;;  %3184 = vmatpush1.bf16.msra.mxu1 %v6803_v35 }
 0x8dd   :  { %3144 = vmatprep.subr.bf16.mxu0 %v6804_v41  ;;  %3185 = vmatprep.subr.bf16.mxu1 %v6805_v11 }
 0x8e0   :  { %3145 = vmatpush1.bf16.msra.mxu0 %v6806_v49  ;;  %3186 = vmatpush1.bf16.msra.mxu1 %v6807_v7 }
 0x8e1   :  { %3146 = vmatprep.subr.bf16.mxu0 %v6808_v8  ;;  %3187 = vmatprep.subr.bf16.mxu1 %v6809_v25 }
 0x8e4   :  { %3147 = vmatpush1.bf16.msra.mxu0 %v6810_v13  ;;  %3188 = vmatpush1.bf16.msra.mxu1 %v6811_v51 }
 0x8e5   :  { %3148 = vmatprep.subr.bf16.mxu0 %v6812_v31  ;;  %3189 = vmatprep.subr.bf16.mxu1 %v6813_v38 }
 0x8e8   :  { %3149 = vmatpush1.bf16.msra.mxu0 %v6814_v15  ;;  %3190 = vmatpush1.bf16.msra.mxu1 %v6815_v29 }
 0x8e9   :  { %3150 = vmatprep.subr.bf16.mxu0 %v6816_v28  ;;  %3191 = vmatprep.subr.bf16.mxu1 %v6817_v16 }
 0x8ec   :  { %3151 = vmatpush1.bf16.msra.mxu0 %v6818_v33  ;;  %3192 = vmatpush1.bf16.msra.mxu1 %v6819_v34 }
 0x8ed   :  { %3152 = vmatprep.subr.bf16.mxu0 %v6820_v37  ;;  %3193 = vmatprep.subr.bf16.mxu1 %v6821_v36 }
 0x8f0   :  { %3153 = vmatpush1.bf16.msra.mxu0 %v6822_v45  ;;  %3194 = vmatpush1.bf16.msra.mxu1 %v6823_v43 }
 0x8f1   :  { %3154 = vmatprep.subr.bf16.mxu0 %v6824_v19  ;;  %3195 = vmatprep.subr.bf16.mxu1 %v6825_v50  ;;  %v6830_v19 = vld [vmem:[#allocation45_spill] sm:$0xff] }
 0x8f4   :  { %3155 = vmatpush1.bf16.msra.mxu0 %v6826_v9  ;;  %3196 = vmatpush1.bf16.msra.mxu1 %v6827_v60 }
 0x8f5   :  { %3222 = vmatprep.subr.bf16.mxu0 %v6828_v26  ;;  %3263 = vmatprep.subr.bf16.mxu1 %v6829_v58 }
 0x957   :  { %v2870_v62 = vpop.f32.mrf.mxu0  ;;  %v2911_v46 = vpop.f32.mrf.mxu1 }
 0x959   :  { %v2872_v23 = vpop.f32.mrf.mxu0  ;;  %v2913_v0 = vpop.f32.mrf.mxu1 }
 0x95b   :  { %v2874_v53 = vpop.f32.mrf.mxu0  ;;  %v2915_v32 = vpop.f32.mrf.mxu1 }
 0x95d   :  { %v2875_v20 = vpop.f32.mrf.mxu0  ;;  %v2916_v59 = vpop.f32.mrf.mxu1 }
 0x977   :  { %v2952_v39 = vpop.f32.mrf.mxu0  ;;  %v2993_v18 = vpop.f32.mrf.mxu1 }
 0x978   :  { %v2953_v52 = vadd.f32 %v2952_v39, %v2870_v62  ;;  %v2994_v38 = vadd.f32 %v2993_v18, %v2911_v46  ;;  %v6831_v62 = vld [vmem:[#allocation47_spill] sm:$0xff] }
 0x979   :  { %v2954_v30 = vpop.f32.mrf.mxu0  ;;  %v2995_v35 = vpop.f32.mrf.mxu1 }
 0x97a   :  { %v3000_v41 = vadd.f32 %v2953_v52, %v6503_v47  ;;  %v2955_v11 = vadd.f32 %v2954_v30, %v2872_v23  ;;  %v3002_v15 = vadd.f32 %v2994_v38, %v6505_v40  ;;  %v2996_v29 = vadd.f32 %v2995_v35, %v2913_v0 }
 0x97b   :  { %v2956_v49 = vpop.f32.mrf.mxu0  ;;  %v2997_v7 = vpop.f32.mrf.mxu1 }
 0x97c   :  { %v3620_v8 = vmul.f32 -1.442695, %v3000_v41  ;;  %v3001_v25 = vadd.f32 %v2955_v11, %v6504_v17  ;;  %v3622_v28 = vmul.f32 -1.442695, %v3002_v15  ;;  %v3003_v33 = vadd.f32 %v2996_v29, %v6506_v6  ;;  %v6832_v11 = vld [vmem:[#allocation46_spill] sm:$0xff] }
 0x97d   :  { %v2957_v13 = vpop.f32.mrf.mxu0  ;;  %v2998_v51 = vpop.f32.mrf.mxu1 }
 0x97e   :  { %4046 = vpow2.f32 %v3620_v8  ;;  %v3621_v31 = vmul.f32 -1.442695, %v3001_v25  ;;  %v6833_v25 = vld [vmem:[#allocation48_spill] sm:$0xff] }
 0x980   :  { %4048 = vpow2.f32 %v3621_v31 }
 0x981   :  { %4050 = vpow2.f32 %v3622_v28 }
 0x98b   :  { %v4047_v16 = vpop.eup %4046 }
 0x98c   :  { %v3013_v34 = vadd.f32 1.0, %v4047_v16 }
 0x98d   :  { %v4049_v37 = vpop.eup %4048 }
 0x98e   :  { %4052 = vrcp.f32 %v3013_v34  ;;  %v3014_v36 = vadd.f32 1.0, %v4049_v37  ;;  %v4051_v26 = vpop.eup %4050  ;;  %v6841_v37 = vld [vmem:[#allocation76_spill] sm:$0xff] }
 0x98f   :  { %4054 = vtanh.f32 %v3003_v33  ;;  %v3015_v39 = vadd.f32 1.0, %v4051_v26  ;;  %v4356_v26 = vmov 0.0  }
 0x990   :  { %4056 = vrcp.f32 %v3014_v36  ;;  %v6844_v36 = vld [vmem:[#allocation94_spill] sm:$0xff] }
 0x997   :  { %v3062_v45 = vpop.f32.mrf.mxu0  ;;  %v3103_v43 = vpop.f32.mrf.mxu1 }
 0x998   :  { %v3110_v50 = vadd.f32 %v3062_v45, %v6830_v19  ;;  %v3112_v49 = vadd.f32 %v3103_v43, %v6832_v11  ;;  %v6845_v45 = vld [vmem:[#allocation96_spill] sm:$0xff] }
 0x999   :  { %v3064_v9 = vpop.f32.mrf.mxu0  ;;  %v3105_v60 = vpop.f32.mrf.mxu1 }
 0x99a   :  { %v3623_v58 = vmul.f32 -1.442695, %v3110_v50  ;;  %v3111_v46 = vadd.f32 %v3064_v9, %v6831_v62  ;;  %v3625_v7 = vmul.f32 -1.442695, %v3112_v49  ;;  %v3113_v13 = vadd.f32 %v3105_v60, %v6833_v25  ;;  %v3830_v60 = vld [vmem:[%s6105_s7 + $0x38] sm:$0xff]  }
 0x99b   :  { %v4053_v23 = vpop.eup %4052  ;;  %v3066_v0 = vpop.f32.mrf.mxu0 }
 0x99c   :  { %v3107_v53 = vpop.f32.mrf.mxu1  ;;  %v4055_v32 = vpop.eup %4054  ;;  %4058 = vpow2.f32 %v3623_v58  ;;  %v3624_v20 = vmul.f32 -1.442695, %v3111_v46  ;;  %v3837_v58 = vld [vmem:[%s6105_s7] sm:$0xff]  }
 0x99d   :  { %v4057_v59 = vpop.eup %4056  ;;  %v3067_v18 = vpop.f32.mrf.mxu0  ;;  %v3024_v35 = vmul.f32 %v4055_v32, %v4053_v23 }
 0x99e   :  { %v3108_v52 = vpop.f32.mrf.mxu1  ;;  %v3023_v30 = vmul.f32 %v4057_v59, %v5850_v24  ;;  %4060 = vpow2.f32 %v3624_v20 }
 0x99f   :  { %4062 = vrcp.f32 %v3015_v39 }
 0x9a0   :  { %v6028_v41 = vadd.f32 %v3024_v35, %v3023_v30 }
 0x9a2   :  { %4064 = vtanh.f32 %v6028_v41 }
 0x9a3   :  { %4066 = vpow2.f32 %v3625_v7 }
 0x9a9   :  { %v4059_v8 = vpop.eup %4058 }
 0x9aa   :  { %v3123_v51 = vadd.f32 1.0, %v4059_v8 }
 0x9ab   :  { %v4061_v31 = vpop.eup %4060 }
 0x9ac   :  { %4068 = vrcp.f32 %v3123_v51  ;;  %v3124_v38 = vadd.f32 1.0, %v4061_v31  ;;  %v4063_v24 = vpop.eup %4062 }
 0x9ad   :  { %4070 = vtanh.f32 %v3113_v13 }
 0x9ae   :  { %4072 = vrcp.f32 %v3124_v38 }
 0x9af   :  { %v4065_v15 = vpop.eup %4064 }
 0x9b0   :  { %v3027_v29 = vmul.f32 %v4065_v15, %v4063_v24  ;;  %v4067_v16 = vpop.eup %4066 }
 0x9b2   :  { %v3139_v28 = vpack.c.bf16 %v3027_v29, %v3027_v29 }
 0x9b4   :  { %3173 = vmatmul.mubr.bf16.vlgmr.msra.gmra.mxu0 %v3139_v28  ;;  %3214 = vmatmul.mubr.bf16.vlgmr.msra.gmra.mxu1 %v3139_v28 }
 0x9b5   :  { %3223 = vmatpush1.bf16.msra.mxu0 %v5855_v63  ;;  %3264 = vmatpush1.bf16.msra.mxu1 %v5858_v1  ;;  %v3125_v1 = vadd.f32 1.0, %v4067_v16 }
 0x9b6   :  { %3224 = vmatprep.subr.bf16.mxu0 %v5861_v42  ;;  %3265 = vmatprep.subr.bf16.mxu1 %v5864_v4 }
 0x9b7   :  { %3254 = vmatprep.mubr.bf16.mxu0 %v6430_v5  ;;  %3295 = vmatprep.mubr.bf16.mxu1 %v6430_v5  ;;  %4074 = vrcp.f32 %v3125_v1 }
 0x9b9   :  { %v4069_v33 = vpop.eup %4068  ;;  %3225 = vmatpush1.bf16.msra.mxu0 %v5869_v12  ;;  %3266 = vmatpush1.bf16.msra.mxu1 %v5872_v56  ;;  %v6834_v12 = vld [vmem:[#allocation24_spill] sm:$0xff]  ;;  %v6835_v56 = vld [vmem:[#allocation70_spill] sm:$0xff] }
 0x9ba   :  { %v4071_v34 = vpop.eup %4070  ;;  %3226 = vmatprep.subr.bf16.mxu0 %v5875_v27  ;;  %3267 = vmatprep.subr.bf16.mxu1 %v5878_v55  ;;  %v6836_v27 = vld [vmem:[#allocation71_spill] sm:$0xff]  ;;  %v6837_v55 = vld [vmem:[#allocation72_spill] sm:$0xff] }
 0x9bb   :  { %v4073_v63 = vpop.eup %4072  ;;  %v3134_v4 = vmul.f32 %v4071_v34, %v4069_v33 }
 0x9bc   :  { %v3133_v42 = vmul.f32 %v4073_v63, %v5888_v48  ;;  %v6838_v48 = vld [vmem:[#allocation73_spill] sm:$0xff] }
 0x9bd   :  { %3227 = vmatpush1.bf16.msra.mxu0 %v5882_v14  ;;  %3268 = vmatpush1.bf16.msra.mxu1 %v5885_v22  ;;  %v6839_v14 = vld [vmem:[#allocation74_spill] sm:$0xff]  ;;  %v6840_v22 = vld [vmem:[#allocation75_spill] sm:$0xff] }
 0x9be   :  { %v3135_v5 = vadd.f32 %v3134_v4, %v3133_v42  ;;  %3228 = vmatprep.subr.bf16.mxu0 %v5890_v2  ;;  %3269 = vmatprep.subr.bf16.mxu1 %v5893_v10  ;;  %v6842_v2 = vld [vmem:[#allocation78_spill] sm:$0xff]  ;;  %v6843_v10 = vld [vmem:[#allocation92_spill] sm:$0xff] }
 0x9c0   :  { %4076 = vtanh.f32 %v3135_v5 }
 0x9c1   :  { %3229 = vmatpush1.bf16.msra.mxu0 %v6834_v12  ;;  %3270 = vmatpush1.bf16.msra.mxu1 %v6835_v56 }
 0x9c2   :  { %3230 = vmatprep.subr.bf16.mxu0 %v6836_v27  ;;  %3271 = vmatprep.subr.bf16.mxu1 %v6837_v55 }
 0x9c4   :  { %v4075_v43 = vpop.eup %4074 }
 0x9c5   :  { %3231 = vmatpush1.bf16.msra.mxu0 %v6838_v48  ;;  %3272 = vmatpush1.bf16.msra.mxu1 %v6839_v14  ;;  %v3629_v14 = vld [vmem:[%s6106_s8] ss:$0 sm:$0xff] }
 0x9c6   :  { %3232 = vmatprep.subr.bf16.mxu0 %v6840_v22  ;;  %3273 = vmatprep.subr.bf16.mxu1 %v6841_v37 }
 0x9c9   :  { %3233 = vmatpush1.bf16.msra.mxu0 %v6842_v2  ;;  %3274 = vmatpush1.bf16.msra.mxu1 %v6843_v10 }
 0x9ca   :  { %3234 = vmatprep.subr.bf16.mxu0 %v6844_v36  ;;  %3275 = vmatprep.subr.bf16.mxu1 %v6845_v45 }
 0x9cd   :  { %v4077_v19 = vpop.eup %4076  ;;  %3235 = vmatpush1.bf16.msra.mxu0 %v5933_v44  ;;  %3276 = vmatpush1.bf16.msra.mxu1 %v5936_v61  ;;  %v3831_v44 = vld [vmem:[%s6105_s7 + $0x30] sm:$0xff]   ;;  %v3834_v61 = vld [vmem:[%s6105_s7 + $0x18] sm:$0xff]  }
 0x9ce   :  { %3236 = vmatprep.subr.bf16.mxu0 %v5939_v3  ;;  %3277 = vmatprep.subr.bf16.mxu1 %v5942_v21  ;;  %v3137_v50 = vmul.f32 %v4077_v19, %v4075_v43  ;;  %v3835_v3 = vld [vmem:[%s6105_s7 + $0x10] sm:$0xff]   ;;  %v3836_v21 = vld [vmem:[%s6105_s7 + $0x8] sm:$0xff]  }
 0x9d0   :  { %v3138_v9 = vpack.c.bf16 %v3137_v50, %v3137_v50 }
 0x9d1   :  { %3237 = vmatpush1.bf16.msra.mxu0 %v5945_v54  ;;  %3278 = vmatpush1.bf16.msra.mxu1 %v5948_v57  ;;  %v3832_v57 = vld [vmem:[%s6105_s7 + $0x28] sm:$0xff]   ;;  %v3833_v54 = vld [vmem:[%s6105_s7 + $0x20] sm:$0xff]  }
 0x9d2   :  { %3650 = vmatprep.subr.bf16.mxu0 %v4356_v26 }
 0x9d4   :  { %3255 = vmatmul.mubr.bf16.vlgmr.msra.gmra.mxu0 %v3138_v9  ;;  %3296 = vmatmul.mubr.bf16.vlgmr.msra.gmra.mxu1 %v3138_v9 }
 0x9d5   :  { %3651 = vmatpush3.bf16.msra.mxu0 %v3830_v60  ;;  %3666 = vmatprep.mubr.msk.bf16.mxu0 %vm4357_vm1, %v4356_v26 }
 0x9d6   :  { %3652 = vmatprep.subr.bf16.mxu0 %v4356_v26 }
 0x9d9   :  { %3653 = vmatpush3.bf16.msra.mxu0 %v3831_v44 }
 0x9da   :  { %3654 = vmatprep.subr.bf16.mxu0 %v4356_v26 }
 0x9dd   :  { %3655 = vmatpush3.bf16.msra.mxu0 %v3832_v57 }
 0x9de   :  { %3656 = vmatprep.subr.bf16.mxu0 %v4356_v26 }
 0x9e1   :  { %3657 = vmatpush3.bf16.msra.mxu0 %v3833_v54 }
 0x9e2   :  { %3658 = vmatprep.subr.bf16.mxu0 %v4356_v26 }
 0x9e5   :  { %3659 = vmatpush3.bf16.msra.mxu0 %v3834_v61 }
 0x9e6   :  { %3660 = vmatprep.subr.bf16.mxu0 %v4356_v26 }
 0x9e9   :  { %3661 = vmatpush3.bf16.msra.mxu0 %v3835_v3 }
 0x9ea   :  { %3662 = vmatprep.subr.bf16.mxu0 %v4356_v26 }
 0x9ed   :  { %3663 = vmatpush3.bf16.msra.mxu0 %v3836_v21 }
 0x9ee   :  { %3664 = vmatprep.subr.bf16.mxu0 %v4356_v26 }
 0x9f1   :  { %3665 = vmatpush3.bf16.msra.mxu0 %v3837_v58 }
 0xa74   :  { %v3174_v62 = vpop.f32.mrf.mxu0  ;;  %v3215_v46 = vpop.f32.mrf.mxu1 }
 0xa76   :  { %v3176_v23 = vpop.f32.mrf.mxu0  ;;  %v3217_v0 = vpop.f32.mrf.mxu1 }
 0xa78   :  { %v3178_v53 = vpop.f32.mrf.mxu0  ;;  %v3219_v32 = vpop.f32.mrf.mxu1 }
 0xa7a   :  { %v3179_v20 = vpop.f32.mrf.mxu0  ;;  %v3220_v59 = vpop.f32.mrf.mxu1 }
 0xa94   :  { %v3256_v39 = vpop.f32.mrf.mxu0  ;;  %v3297_v18 = vpop.f32.mrf.mxu1 }
 0xa95   :  { %v3257_v52 = vadd.f32 %v3256_v39, %v3174_v62  ;;  %v3298_v24 = vadd.f32 %v3297_v18, %v3215_v46 }
 0xa96   :  { %v3258_v30 = vpop.f32.mrf.mxu0  ;;  %v3299_v35 = vpop.f32.mrf.mxu1 }
 0xa97   :  { %v3304_v11 = vadd.f32 %v3257_v52, %v6503_v47  ;;  %v3259_v49 = vadd.f32 %v3258_v30, %v3176_v23  ;;  %v3306_v15 = vadd.f32 %v3298_v24, %v6505_v40  ;;  %v3300_v29 = vadd.f32 %v3299_v35, %v3217_v0 }
 0xa98   :  { %v3260_v7 = vpop.f32.mrf.mxu0  ;;  %v3301_v8 = vpop.f32.mrf.mxu1 }
 0xa99   :  { %v3626_v25 = vmul.f32 -1.442695, %v3304_v11  ;;  %v3305_v13 = vadd.f32 %v3259_v49, %v6504_v17  ;;  %v3628_v28 = vmul.f32 -1.442695, %v3306_v15  ;;  %v3307_v33 = vadd.f32 %v3300_v29, %v6506_v6 }
 0xa9a   :  { %v3261_v51 = vpop.f32.mrf.mxu0  ;;  %v3302_v31 = vpop.f32.mrf.mxu1 }
 0xa9b   :  { %4078 = vpow2.f32 %v3626_v25  ;;  %v3627_v38 = vmul.f32 -1.442695, %v3305_v13 }
 0xa9d   :  { %4080 = vpow2.f32 %v3627_v38 }
 0xa9e   :  { %4082 = vpow2.f32 %v3628_v28 }
 0xaa8   :  { %v4079_v16 = vpop.eup %4078 }
 0xaa9   :  { %v3317_v47 = vadd.f32 1.0, %v4079_v16 }
 0xaaa   :  { %v4081_v34 = vpop.eup %4080 }
 0xaab   :  { %4084 = vrcp.f32 %v3317_v47  ;;  %v3318_v63 = vadd.f32 1.0, %v4081_v34  ;;  %v4083_v17 = vpop.eup %4082 }
 0xaac   :  { %4086 = vtanh.f32 %v3307_v33  ;;  %v3319_v5 = vadd.f32 1.0, %v4083_v17 }
 0xaad   :  { %4088 = vrcp.f32 %v3318_v63 }
 0xaae   :  { %4090 = vrcp.f32 %v3319_v5 }
 0xab8   :  { %v4085_v1 = vpop.eup %4084 }
 0xab9   :  { %v4087_v42 = vpop.eup %4086 }
 0xaba   :  { %v4089_v4 = vpop.eup %4088  ;;  %v3328_v40 = vmul.f32 %v4087_v42, %v4085_v1 }
 0xabb   :  { %v3327_v12 = vmul.f32 %v4089_v4, %v6028_v41  ;;  %v4091_v27 = vpop.eup %4090 }
 0xabd   :  { %v3329_v56 = vadd.f32 %v3328_v40, %v3327_v12 }
 0xabf   :  { %4092 = vtanh.f32 %v3329_v56 }
 0xacc   :  { %v4093_v6 = vpop.eup %4092 }
 0xacd   :  { %v3331_v55 = vmul.f32 %v4093_v6, %v4091_v27 }
 0xacf   :  { %v3332_v48 = vpack.c.bf16 %v3331_v55, %v3331_v55 }
 0xad1   :  { %3667 = vmatmul.mubr.bf16.vlgmr.msra.gmra.mxu0 %v3332_v48 }
 0xb91   :  { %v3438_v22 = vpop.f32.mrf.mxu0 }
 0xb92   :  { %v3439_v37 = vadd.f32 %v3629_v14, %v3438_v22 }
 0xb93   :  { %v3668_v2 = vpop.f32.mrf.mxu0 }
 0xb94   :  { %3444 = vst [vmem:[%s6107_s9] sm:$0xff] %v3439_v37 }
 0xb95   :  { %v3441_v41 = vpop.f32.mrf.mxu0 }
 0xb97   :  { %v3669_v10 = vpop.f32.mrf.mxu0 }
 0xb98   :  { %3449 = vsyncmov [#allocation5] }
 0xb9b   :  { %s3450_s11 = vpop.sfrf %3449 }
 0xb9c   :  { %p3638_p1 = scmp.ne.s32.totalorder %s3450_s11, 0 }
 0xb9e   :  { %3454 = shalt.err (%p3638_p1)  }
 0xb9f   :  { %3456 = vsyncmov [#allocation5 + $0x1] }
 0xba2   :  { %s3457_s12 = vpop.sfrf %3456 }
 0xba3   :  { %p3639_p2 = scmp.ne.s32.totalorder %s3457_s12, 0 }
 0xba5   :  { %3461 = shalt.err (%p3639_p2)  }
 0xba6   :  { %3463 = vsyncmov [#allocation5 + $0x2] }
 0xba9   :  { %s3464_s13 = vpop.sfrf %3463 }
 0xbaa   :  { %p3640_p3 = scmp.ne.s32.totalorder %s3464_s13, 0 }
 0xbac   :  { %3468 = shalt.err (%p3640_p3)  }

</bundles_post_ra>
